<compile_context>
chip_gen: v5e
topology: v5e:2x2
jax: 0.10.0
libtpu: 0.0.40
codegen_flags: <defaults>
</compile_context>

<pallas_src>
import math

import jax
import jax.numpy as jnp
from jax import lax
from jax.experimental import pallas as pl
from jax.experimental.pallas import tpu as pltpu

# ----------------------------- model config --------------------------------
SRC_SIZE = 16
TGT_SIZE = 16
H = 4
D_MODEL = 32
D_FF = 64
NUM_LAYER = 2          # constructor arg (default is 6; small for the demo)
P_DROP = 0.1           # dropout prob (identity in eval mode)
LN_EPS = 1e-5
MAX_LEN = 512
DK = D_MODEL // H
VOCAB_PAD = 128        # lane-dense width for the generator / log-softmax output
MASK_NEG = -1e9        # additive attention mask value
NEG_INF = -1e30        # padding value for unused vocab columns


# ----------------------- in-kernel building blocks --------------------------
# These are plain traced functions used INSIDE the single fused kernel; every
# value here lives in vregs / VMEM.

def _layer_norm(x, g, b):
    mu = jnp.mean(x, axis=-1, keepdims=True)
    xc = x - mu
    var = jnp.mean(xc * xc, axis=-1, keepdims=True)
    return xc * lax.rsqrt(var + LN_EPS) * g + b


def _ffn(x, w1, b1, w2, b2):
    h = jnp.dot(x, w1, preferred_element_type=jnp.float32) + b1
    h = jnp.maximum(h, 0.0)
    return jnp.dot(h, w2, preferred_element_type=jnp.float32) + b2


def _attention(q, k, v, wo, bo, amask, need_probs):
    """q: (Lq, D); k, v: (Lk, D); amask additive, broadcastable to (Lq, Lk).

    Returns (out (Lq, D), mean-over-heads probs (Lq, Lk) or None). The output
    projection is accumulated per head (== concat(heads) @ wo + bo).
    """
    scale = 1.0 / math.sqrt(DK)
    out = bo                       # (1, D) -> broadcasts to (Lq, D) on first add
    prob_sum = None
    for h in range(H):
        lo, hi = h * DK, (h + 1) * DK
        qh, kh, vh = q[:, lo:hi], k[:, lo:hi], v[:, lo:hi]
        # Q.K^T without an in-kernel transpose: contract last dims.
        s = lax.dot_general(qh, kh, (((1,), (1,)), ((), ())),
                            preferred_element_type=jnp.float32) * scale + amask
        s = s - jnp.max(s, axis=-1, keepdims=True)
        e = jnp.exp(s)
        p = e / jnp.sum(e, axis=-1, keepdims=True)
        oh = jnp.dot(p, vh, preferred_element_type=jnp.float32)          # (Lq, DK)
        out = out + jnp.dot(oh, wo[lo:hi, :], preferred_element_type=jnp.float32)
        if need_probs:
            prob_sum = p if prob_sum is None else prob_sum + p
    if need_probs:
        return out, prob_sum * (1.0 / H)
    return out, None


def _mha_self(x, wqkv, bqkv, wo, bo, amask):
    qkv = jnp.dot(x, wqkv, preferred_element_type=jnp.float32) + bqkv    # (L, 3D)
    q = qkv[:, :D_MODEL]
    k = qkv[:, D_MODEL:2 * D_MODEL]
    v = qkv[:, 2 * D_MODEL:]
    out, _ = _attention(q, k, v, wo, bo, amask, need_probs=False)
    return out


def _mha_cross(x, ctx, wq, bq, wkv, bkv, wo, bo, amask, need_probs):
    q = jnp.dot(x, wq, preferred_element_type=jnp.float32) + bq          # (Lt, D)
    kv = jnp.dot(ctx, wkv, preferred_element_type=jnp.float32) + bkv     # (Ls, 2D)
    k = kv[:, :D_MODEL]
    v = kv[:, D_MODEL:]
    return _attention(q, k, v, wo, bo, amask, need_probs)


# ----------------------------- the fused kernel ------------------------------

def _transformer_kernel(
        # per-batch activations / masks
        src_ref, tgt_ref, amsrc_ref, amtgt_ref,
        # encoder weights (stacked over layers)
        e_wqkv, e_bqkv, e_wo, e_bo, e_ln1g, e_ln1b,
        e_w1, e_b1, e_w2, e_b2, e_ln2g, e_ln2b,
        # decoder weights (stacked over layers)
        d_sa_wqkv, d_sa_bqkv, d_sa_wo, d_sa_bo, d_ln1g, d_ln1b,
        d_ca_wq, d_ca_bq, d_ca_wkv, d_ca_bkv, d_ca_wo, d_ca_bo, d_ln2g, d_ln2b,
        d_w1, d_b1, d_w2, d_b2, d_ln3g, d_ln3b,
        # generator (tied to tgt embedding, padded to VOCAB_PAD lanes)
        gen_w,
        # outputs
        logp_ref, cov_ref):
    x = src_ref[0]                 # (Ls, D)
    am_s = amsrc_ref[0]            # (1, Ls)  additive; broadcasts over query rows
    am_t = amtgt_ref[0]            # (Lt, Lt) additive

    # TODO(synk): dropout layers (pos_emb / sublayers) are identity (eval mode).
    # TODO(synk): for NUM_LAYER >> 2 switch the static layer loop to
    #             lax.fori_loop with dynamic ref[l] weight indexing.

    # ---------------- encoder stack ----------------
    for l in range(NUM_LAYER):
        a = _mha_self(x, e_wqkv[l], e_bqkv[l], e_wo[l], e_bo[l], am_s)
        x = _layer_norm(x + a, e_ln1g[l], e_ln1b[l])
        f = _ffn(x, e_w1[l], e_b1[l], e_w2[l], e_b2[l])
        x = _layer_norm(x + f, e_ln2g[l], e_ln2b[l])
    ctx = x                        # (Ls, D), stays in VMEM/vregs

    # ---------------- decoder stack ----------------
    y = tgt_ref[0]                 # (Lt, D)
    cov = None
    for l in range(NUM_LAYER):
        sa = _mha_self(y, d_sa_wqkv[l], d_sa_bqkv[l], d_sa_wo[l], d_sa_bo[l], am_t)
        y = _layer_norm(y + sa, d_ln1g[l], d_ln1b[l])
        need_cov = (l == NUM_LAYER - 1)     # only consumer of attention probs
        ca, cov_l = _mha_cross(y, ctx,
                               d_ca_wq[l], d_ca_bq[l], d_ca_wkv[l], d_ca_bkv[l],
                               d_ca_wo[l], d_ca_bo[l], am_s, need_cov)
        if need_cov:
            cov = cov_l
        y = _layer_norm(y + ca, d_ln2g[l], d_ln2b[l])
        f = _ffn(y, d_w1[l], d_b1[l], d_w2[l], d_b2[l])
        y = _layer_norm(y + f, d_ln3g[l], d_ln3b[l])

    # ---------- generator + log-softmax (lane-dense, VOCAB_PAD wide) ----------
    logits = jnp.dot(y, gen_w[...], preferred_element_type=jnp.float32)  # (Lt, 128)
    col = lax.broadcasted_iota(jnp.int32, logits.shape, 1)
    logits = jnp.where(col < TGT_SIZE, logits, jnp.float32(NEG_INF))
    logits = logits - jnp.max(logits, axis=-1, keepdims=True)
    logp = logits - jnp.log(jnp.sum(jnp.exp(logits), axis=-1, keepdims=True))

    logp_ref[0] = logp
    cov_ref[0] = cov


# ----------------------------- wrapper ---------------------------------------

def _batched_spec(x):
    nd = x.ndim
    return pl.BlockSpec((1,) + tuple(x.shape[1:]),
                        lambda b, _nd=nd: (b,) + (0,) * (_nd - 1))


def _replicated_spec(x):
    nd = x.ndim
    return pl.BlockSpec(tuple(x.shape), lambda b, _nd=nd: (0,) * _nd)


def transformer_forward(params, src, tgt):
    B, Ls = src.shape
    Lt = tgt.shape[1]
    sqrt_d = math.sqrt(D_MODEL)
    pe = params["pe"]

    # --- embeddings + positional encoding (gather glue stays in XLA) ---
    src_x = params["word_emb"][src] * sqrt_d + pe[:Ls][None]          # (B, Ls, D)
    tgt_x = params["tgt_emb"][tgt] * sqrt_d + pe[:Lt][None]           # (B, Lt, D)

    # --- additive masks (no H-expansion; broadcast happens in-kernel) ---
    amask_src = jnp.where((src == 0)[:, None, :],
                          jnp.float32(MASK_NEG), jnp.float32(0.0))    # (B, 1, Ls)
    triu = jnp.triu(jnp.ones((Lt, Lt), jnp.int32), k=1)
    mtgt = ((tgt == 0)[:, None, :].astype(jnp.int32) + triu[None]) > 0
    amask_tgt = jnp.where(mtgt, jnp.float32(MASK_NEG), jnp.float32(0.0))  # (B, Lt, Lt)

    # --- generator weight tied to tgt embedding, padded to 128 lanes ---
    gen_w = jnp.zeros((D_MODEL, VOCAB_PAD), jnp.float32)
    gen_w = gen_w.at[:, :TGT_SIZE].set(params["tgt_emb"].T)

    batched = [src_x, tgt_x, amask_src, amask_tgt]
    replicated = list(params["encoder"]) + list(params["decoder"]) + [gen_w]

    in_specs = ([_batched_spec(a) for a in batched]
                + [_replicated_spec(w) for w in replicated])
    out_specs = (
        pl.BlockSpec((1, Lt, VOCAB_PAD), lambda b: (b, 0, 0)),
        pl.BlockSpec((1, Lt, Ls), lambda b: (b, 0, 0)),
    )
    out_shape = (
        jax.ShapeDtypeStruct((B, Lt, VOCAB_PAD), jnp.float32),
        jax.ShapeDtypeStruct((B, Lt, Ls), jnp.float32),
    )

    logp_pad, coverage = pl.pallas_call(
        _transformer_kernel,
        grid=(B,),
        in_specs=in_specs,
        out_specs=out_specs,
        out_shape=out_shape,
        compiler_params=pltpu.CompilerParams(
            dimension_semantics=("parallel",)),   # batch -> v7x's 2 TensorCores
    )(*batched, *replicated)

    logp = logp_pad.reshape(B * Lt, VOCAB_PAD)[:, :TGT_SIZE]
    return logp, coverage


# ----------------------------- parameters ------------------------------------

def positional_encoding_table(max_len, d_model):
    pos = jnp.arange(max_len, dtype=jnp.float32)[:, None]
    i = jnp.arange(0, d_model, 2, dtype=jnp.float32)
    div = jnp.exp(-jnp.log(10000.0) * i / d_model)
    pe = jnp.zeros((max_len, d_model), jnp.float32)
    pe = pe.at[:, 0::2].set(jnp.sin(pos * div))
    pe = pe.at[:, 1::2].set(jnp.cos(pos * div))
    return pe


class ParamGen:
    def __init__(self, key):
        self.key = key
        self.count = 0

    def normal(self, shape, scale=0.02):
        k = jax.random.fold_in(self.key, self.count)
        self.count += 1
        return scale * jax.random.normal(k, shape, dtype=jnp.float32)


def init_params(key):
    g = ParamGen(key)
    d = D_MODEL
    nl = NUM_LAYER

    def w(shape):          # stacked random weights
        return g.normal((nl,) + shape)

    def zeros(shape):
        return jnp.zeros((nl,) + shape, jnp.float32)

    def ones(shape):
        return jnp.ones((nl,) + shape, jnp.float32)

    word_emb = g.normal((SRC_SIZE, d), scale=1.0 / math.sqrt(d)).at[0].set(0.0)
    tgt_emb = g.normal((TGT_SIZE, d), scale=1.0 / math.sqrt(d)).at[0].set(0.0)

    # Flat ordered lists matching the kernel signature.
    encoder = [
        w((d, 3 * d)), zeros((1, 3 * d)),        # fused QKV
        w((d, d)), zeros((1, d)),                # output proj
        ones((1, d)), zeros((1, d)),             # LN1
        w((d, D_FF)), zeros((1, D_FF)),          # FFN w1/b1
        w((D_FF, d)), zeros((1, d)),             # FFN w2/b2
        ones((1, d)), zeros((1, d)),             # LN2
    ]
    decoder = [
        w((d, 3 * d)), zeros((1, 3 * d)),        # self-attn fused QKV
        w((d, d)), zeros((1, d)),                # self-attn output proj
        ones((1, d)), zeros((1, d)),             # LN1
        w((d, d)), zeros((1, d)),                # cross-attn Wq
        w((d, 2 * d)), zeros((1, 2 * d)),        # cross-attn fused KV
        w((d, d)), zeros((1, d)),                # cross-attn output proj
        ones((1, d)), zeros((1, d)),             # LN2
        w((d, D_FF)), zeros((1, D_FF)),          # FFN w1/b1
        w((D_FF, d)), zeros((1, d)),             # FFN w2/b2
        ones((1, d)), zeros((1, d)),             # LN3
    ]
    return dict(
        word_emb=word_emb,
        tgt_emb=tgt_emb,
        pe=positional_encoding_table(MAX_LEN, d),
        encoder=encoder,
        decoder=decoder,
    )


# --------------------------------- main --------------------------------------

if __name__ == "__main__":
    key = jax.random.PRNGKey(0)
    params = init_params(jax.random.fold_in(key, 1))

    B, LEN_SRC, LEN_TGT = 2, 8, 8
    k_src, k_tgt = jax.random.split(jax.random.fold_in(key, 2))
    # token ids (0 = padding); include zeros to exercise the padding masks.
    src = jax.random.randint(k_src, (B, LEN_SRC), 0, SRC_SIZE, dtype=jnp.int32)
    tgt = jax.random.randint(k_tgt, (B, LEN_TGT), 0, TGT_SIZE, dtype=jnp.int32)

    fwd = jax.jit(transformer_forward)
    out, coverage = fwd(params, src, tgt)
    out = jax.block_until_ready(out)
    coverage = jax.block_until_ready(coverage)

    assert out.shape == (B * LEN_TGT, TGT_SIZE)
    assert coverage.shape == (B, LEN_TGT, LEN_SRC)
    assert bool(jnp.all(jnp.isfinite(out)))
    assert bool(jnp.all(jnp.isfinite(coverage)))
    # coverage rows are softmax means -> each row sums to ~1
    assert bool(jnp.allclose(coverage.sum(-1), 1.0, atol=1e-3))
    print("KERNEL_OK")
</pallas_src>

<mosaic_0001>
module attributes {stable_mosaic.version = 11 : i64} {
  func.func @_transformer_kernel(%arg0: i32, %arg1: memref<1x8x32xf32, #tpu.memory_space<vmem>>, %arg2: memref<1x8x32xf32, #tpu.memory_space<vmem>>, %arg3: memref<1x1x8xf32, #tpu.memory_space<vmem>>, %arg4: memref<1x8x8xf32, #tpu.memory_space<vmem>>, %arg5: memref<2x32x96xf32, #tpu.memory_space<vmem>>, %arg6: memref<2x1x96xf32, #tpu.memory_space<vmem>>, %arg7: memref<2x32x32xf32, #tpu.memory_space<vmem>>, %arg8: memref<2x1x32xf32, #tpu.memory_space<vmem>>, %arg9: memref<2x1x32xf32, #tpu.memory_space<vmem>>, %arg10: memref<2x1x32xf32, #tpu.memory_space<vmem>>, %arg11: memref<2x32x64xf32, #tpu.memory_space<vmem>>, %arg12: memref<2x1x64xf32, #tpu.memory_space<vmem>>, %arg13: memref<2x64x32xf32, #tpu.memory_space<vmem>>, %arg14: memref<2x1x32xf32, #tpu.memory_space<vmem>>, %arg15: memref<2x1x32xf32, #tpu.memory_space<vmem>>, %arg16: memref<2x1x32xf32, #tpu.memory_space<vmem>>, %arg17: memref<2x32x96xf32, #tpu.memory_space<vmem>>, %arg18: memref<2x1x96xf32, #tpu.memory_space<vmem>>, %arg19: memref<2x32x32xf32, #tpu.memory_space<vmem>>, %arg20: memref<2x1x32xf32, #tpu.memory_space<vmem>>, %arg21: memref<2x1x32xf32, #tpu.memory_space<vmem>>, %arg22: memref<2x1x32xf32, #tpu.memory_space<vmem>>, %arg23: memref<2x32x32xf32, #tpu.memory_space<vmem>>, %arg24: memref<2x1x32xf32, #tpu.memory_space<vmem>>, %arg25: memref<2x32x64xf32, #tpu.memory_space<vmem>>, %arg26: memref<2x1x64xf32, #tpu.memory_space<vmem>>, %arg27: memref<2x32x32xf32, #tpu.memory_space<vmem>>, %arg28: memref<2x1x32xf32, #tpu.memory_space<vmem>>, %arg29: memref<2x1x32xf32, #tpu.memory_space<vmem>>, %arg30: memref<2x1x32xf32, #tpu.memory_space<vmem>>, %arg31: memref<2x32x64xf32, #tpu.memory_space<vmem>>, %arg32: memref<2x1x64xf32, #tpu.memory_space<vmem>>, %arg33: memref<2x64x32xf32, #tpu.memory_space<vmem>>, %arg34: memref<2x1x32xf32, #tpu.memory_space<vmem>>, %arg35: memref<2x1x32xf32, #tpu.memory_space<vmem>>, %arg36: memref<2x1x32xf32, #tpu.memory_space<vmem>>, %arg37: memref<32x128xf32, #tpu.memory_space<vmem>>, %arg38: memref<1x8x128xf32, #tpu.memory_space<vmem>>, %arg39: memref<1x8x8xf32, #tpu.memory_space<vmem>>) attributes {dimension_semantics = [#tpu.dimension_semantics<parallel>], iteration_bounds = array<i64: 2>, scalar_prefetch = 0 : i64, scratch_operands = 0 : i64, tpu.core_type = #tpu.core_type<tc>, window_params = [{transform_indices = @transform_0, window_bounds = array<i64: 1, 8, 32>}, {transform_indices = @transform_1, window_bounds = array<i64: 1, 8, 32>}, {transform_indices = @transform_2, window_bounds = array<i64: 1, 1, 8>}, {transform_indices = @transform_3, window_bounds = array<i64: 1, 8, 8>}, {pipeline_mode = #tpu.pipeline_mode<synchronous>, transform_indices = @transform_4, window_bounds = array<i64: 2, 32, 96>}, {pipeline_mode = #tpu.pipeline_mode<synchronous>, transform_indices = @transform_5, window_bounds = array<i64: 2, 1, 96>}, {pipeline_mode = #tpu.pipeline_mode<synchronous>, transform_indices = @transform_6, window_bounds = array<i64: 2, 32, 32>}, {pipeline_mode = #tpu.pipeline_mode<synchronous>, transform_indices = @transform_7, window_bounds = array<i64: 2, 1, 32>}, {pipeline_mode = #tpu.pipeline_mode<synchronous>, transform_indices = @transform_8, window_bounds = array<i64: 2, 1, 32>}, {pipeline_mode = #tpu.pipeline_mode<synchronous>, transform_indices = @transform_9, window_bounds = array<i64: 2, 1, 32>}, {pipeline_mode = #tpu.pipeline_mode<synchronous>, transform_indices = @transform_10, window_bounds = array<i64: 2, 32, 64>}, {pipeline_mode = #tpu.pipeline_mode<synchronous>, transform_indices = @transform_11, window_bounds = array<i64: 2, 1, 64>}, {pipeline_mode = #tpu.pipeline_mode<synchronous>, transform_indices = @transform_12, window_bounds = array<i64: 2, 64, 32>}, {pipeline_mode = #tpu.pipeline_mode<synchronous>, transform_indices = @transform_13, window_bounds = array<i64: 2, 1, 32>}, {pipeline_mode = #tpu.pipeline_mode<synchronous>, transform_indices = @transform_14, window_bounds = array<i64: 2, 1, 32>}, {pipeline_mode = #tpu.pipeline_mode<synchronous>, transform_indices = @transform_15, window_bounds = array<i64: 2, 1, 32>}, {pipeline_mode = #tpu.pipeline_mode<synchronous>, transform_indices = @transform_16, window_bounds = array<i64: 2, 32, 96>}, {pipeline_mode = #tpu.pipeline_mode<synchronous>, transform_indices = @transform_17, window_bounds = array<i64: 2, 1, 96>}, {pipeline_mode = #tpu.pipeline_mode<synchronous>, transform_indices = @transform_18, window_bounds = array<i64: 2, 32, 32>}, {pipeline_mode = #tpu.pipeline_mode<synchronous>, transform_indices = @transform_19, window_bounds = array<i64: 2, 1, 32>}, {pipeline_mode = #tpu.pipeline_mode<synchronous>, transform_indices = @transform_20, window_bounds = array<i64: 2, 1, 32>}, {pipeline_mode = #tpu.pipeline_mode<synchronous>, transform_indices = @transform_21, window_bounds = array<i64: 2, 1, 32>}, {pipeline_mode = #tpu.pipeline_mode<synchronous>, transform_indices = @transform_22, window_bounds = array<i64: 2, 32, 32>}, {pipeline_mode = #tpu.pipeline_mode<synchronous>, transform_indices = @transform_23, window_bounds = array<i64: 2, 1, 32>}, {pipeline_mode = #tpu.pipeline_mode<synchronous>, transform_indices = @transform_24, window_bounds = array<i64: 2, 32, 64>}, {pipeline_mode = #tpu.pipeline_mode<synchronous>, transform_indices = @transform_25, window_bounds = array<i64: 2, 1, 64>}, {pipeline_mode = #tpu.pipeline_mode<synchronous>, transform_indices = @transform_26, window_bounds = array<i64: 2, 32, 32>}, {pipeline_mode = #tpu.pipeline_mode<synchronous>, transform_indices = @transform_27, window_bounds = array<i64: 2, 1, 32>}, {pipeline_mode = #tpu.pipeline_mode<synchronous>, transform_indices = @transform_28, window_bounds = array<i64: 2, 1, 32>}, {pipeline_mode = #tpu.pipeline_mode<synchronous>, transform_indices = @transform_29, window_bounds = array<i64: 2, 1, 32>}, {pipeline_mode = #tpu.pipeline_mode<synchronous>, transform_indices = @transform_30, window_bounds = array<i64: 2, 32, 64>}, {pipeline_mode = #tpu.pipeline_mode<synchronous>, transform_indices = @transform_31, window_bounds = array<i64: 2, 1, 64>}, {pipeline_mode = #tpu.pipeline_mode<synchronous>, transform_indices = @transform_32, window_bounds = array<i64: 2, 64, 32>}, {pipeline_mode = #tpu.pipeline_mode<synchronous>, transform_indices = @transform_33, window_bounds = array<i64: 2, 1, 32>}, {pipeline_mode = #tpu.pipeline_mode<synchronous>, transform_indices = @transform_34, window_bounds = array<i64: 2, 1, 32>}, {pipeline_mode = #tpu.pipeline_mode<synchronous>, transform_indices = @transform_35, window_bounds = array<i64: 2, 1, 32>}, {pipeline_mode = #tpu.pipeline_mode<synchronous>, transform_indices = @transform_36, window_bounds = array<i64: 32, 128>}, {transform_indices = @transform_37, window_bounds = array<i64: 1, 8, 128>}, {transform_indices = @transform_38, window_bounds = array<i64: 1, 8, 8>}]} {
    %c0 = arith.constant 0 : index
    %c0_0 = arith.constant 0 : index
    %c0_1 = arith.constant 0 : index
    %0 = vector.load %arg1[%c0, %c0_0, %c0_1] : memref<1x8x32xf32, #tpu.memory_space<vmem>>, vector<1x8x32xf32>
    %1 = vector.shape_cast %0 : vector<1x8x32xf32> to vector<8x32xf32>
    %c0_2 = arith.constant 0 : index
    %c0_3 = arith.constant 0 : index
    %c0_4 = arith.constant 0 : index
    %2 = vector.load %arg3[%c0_2, %c0_3, %c0_4] : memref<1x1x8xf32, #tpu.memory_space<vmem>>, vector<1x1x8xf32>
    %3 = vector.shape_cast %2 : vector<1x1x8xf32> to vector<1x8xf32>
    %c0_5 = arith.constant 0 : index
    %c0_6 = arith.constant 0 : index
    %c0_7 = arith.constant 0 : index
    %4 = vector.load %arg4[%c0_5, %c0_6, %c0_7] : memref<1x8x8xf32, #tpu.memory_space<vmem>>, vector<1x8x8xf32>
    %5 = vector.shape_cast %4 : vector<1x8x8xf32> to vector<8x8xf32>
    %c0_8 = arith.constant 0 : index
    %c0_9 = arith.constant 0 : index
    %c0_10 = arith.constant 0 : index
    %6 = vector.load %arg5[%c0_8, %c0_9, %c0_10] : memref<2x32x96xf32, #tpu.memory_space<vmem>>, vector<1x32x96xf32>
    %7 = vector.shape_cast %6 : vector<1x32x96xf32> to vector<32x96xf32>
    %c0_11 = arith.constant 0 : index
    %c0_12 = arith.constant 0 : index
    %c0_13 = arith.constant 0 : index
    %8 = vector.load %arg6[%c0_11, %c0_12, %c0_13] : memref<2x1x96xf32, #tpu.memory_space<vmem>>, vector<1x1x96xf32>
    %9 = vector.shape_cast %8 : vector<1x1x96xf32> to vector<1x96xf32>
    %c0_14 = arith.constant 0 : index
    %c0_15 = arith.constant 0 : index
    %c0_16 = arith.constant 0 : index
    %10 = vector.load %arg7[%c0_14, %c0_15, %c0_16] : memref<2x32x32xf32, #tpu.memory_space<vmem>>, vector<1x32x32xf32>
    %11 = vector.shape_cast %10 : vector<1x32x32xf32> to vector<32x32xf32>
    %c0_17 = arith.constant 0 : index
    %c0_18 = arith.constant 0 : index
    %c0_19 = arith.constant 0 : index
    %12 = vector.load %arg8[%c0_17, %c0_18, %c0_19] : memref<2x1x32xf32, #tpu.memory_space<vmem>>, vector<1x1x32xf32>
    %13 = vector.shape_cast %12 : vector<1x1x32xf32> to vector<1x32xf32>
    %cst = arith.constant dense<0.000000e+00> : vector<8x96xf32>
    %14 = tpu.matmul %1, %7, %cst {dimension_numbers = #tpu.dot_dimension_numbers<[1], [0], [0], [1], [0, 0, 1, 1], [], []>} : vector<8x32xf32>, vector<32x96xf32>, vector<8x96xf32> -> vector<8x96xf32>
    %15 = vector.broadcast %9 : vector<1x96xf32> to vector<8x96xf32>
    %16 = arith.addf %14, %15 : vector<8x96xf32>
    %17 = vector.extract_strided_slice %16 {offsets = [0, 0], sizes = [8, 32], strides = [1, 1]} : vector<8x96xf32> to vector<8x32xf32>
    %18 = vector.extract_strided_slice %16 {offsets = [0, 32], sizes = [8, 32], strides = [1, 1]} : vector<8x96xf32> to vector<8x32xf32>
    %19 = vector.extract_strided_slice %16 {offsets = [0, 64], sizes = [8, 32], strides = [1, 1]} : vector<8x96xf32> to vector<8x32xf32>
    %20 = vector.extract_strided_slice %17 {offsets = [0, 0], sizes = [8, 8], strides = [1, 1]} : vector<8x32xf32> to vector<8x8xf32>
    %21 = vector.extract_strided_slice %18 {offsets = [0, 0], sizes = [8, 8], strides = [1, 1]} : vector<8x32xf32> to vector<8x8xf32>
    %22 = vector.extract_strided_slice %19 {offsets = [0, 0], sizes = [8, 8], strides = [1, 1]} : vector<8x32xf32> to vector<8x8xf32>
    %cst_20 = arith.constant dense<0.000000e+00> : vector<8x8xf32>
    %23 = tpu.matmul %20, %21, %cst_20 {dimension_numbers = #tpu.dot_dimension_numbers<[1], [1], [0], [0], [0, 0, 1, 0], [], []>} : vector<8x8xf32>, vector<8x8xf32>, vector<8x8xf32> -> vector<8x8xf32>
    %cst_21 = arith.constant 0.353553385 : f32
    %24 = vector.broadcast %cst_21 : f32 to vector<8x8xf32>
    %25 = arith.mulf %23, %24 : vector<8x8xf32>
    %26 = vector.broadcast %3 : vector<1x8xf32> to vector<8x8xf32>
    %27 = arith.addf %25, %26 : vector<8x8xf32>
    %cst_22 = arith.constant dense<0xFF800000> : vector<8xf32>
    %28 = vector.multi_reduction <maximumf>, %27, %cst_22 [1] : vector<8x8xf32> to vector<8xf32>
    %29 = vector.shape_cast %28 : vector<8xf32> to vector<8x1xf32>
    %30 = vector.broadcast %29 : vector<8x1xf32> to vector<8x8xf32>
    %31 = arith.subf %27, %30 : vector<8x8xf32>
    %32 = math.exp %31 : vector<8x8xf32>
    %cst_23 = arith.constant dense<0.000000e+00> : vector<8xf32>
    %33 = vector.multi_reduction <add>, %32, %cst_23 [1] : vector<8x8xf32> to vector<8xf32>
    %34 = vector.shape_cast %33 : vector<8xf32> to vector<8x1xf32>
    %35 = vector.broadcast %34 : vector<8x1xf32> to vector<8x8xf32>
    %36 = arith.divf %32, %35 : vector<8x8xf32>
    %cst_24 = arith.constant dense<0.000000e+00> : vector<8x8xf32>
    %37 = tpu.matmul %36, %22, %cst_24 {dimension_numbers = #tpu.dot_dimension_numbers<[1], [0], [0], [1], [0, 0, 1, 1], [], []>} : vector<8x8xf32>, vector<8x8xf32>, vector<8x8xf32> -> vector<8x8xf32>
    %38 = vector.extract_strided_slice %11 {offsets = [0, 0], sizes = [8, 32], strides = [1, 1]} : vector<32x32xf32> to vector<8x32xf32>
    %cst_25 = arith.constant dense<0.000000e+00> : vector<8x32xf32>
    %39 = tpu.matmul %37, %38, %cst_25 {dimension_numbers = #tpu.dot_dimension_numbers<[1], [0], [0], [1], [0, 0, 1, 1], [], []>} : vector<8x8xf32>, vector<8x32xf32>, vector<8x32xf32> -> vector<8x32xf32>
    %40 = vector.broadcast %13 : vector<1x32xf32> to vector<8x32xf32>
    %41 = arith.addf %40, %39 : vector<8x32xf32>
    %42 = vector.extract_strided_slice %17 {offsets = [0, 8], sizes = [8, 8], strides = [1, 1]} : vector<8x32xf32> to vector<8x8xf32>
    %43 = vector.extract_strided_slice %18 {offsets = [0, 8], sizes = [8, 8], strides = [1, 1]} : vector<8x32xf32> to vector<8x8xf32>
    %44 = vector.extract_strided_slice %19 {offsets = [0, 8], sizes = [8, 8], strides = [1, 1]} : vector<8x32xf32> to vector<8x8xf32>
    %cst_26 = arith.constant dense<0.000000e+00> : vector<8x8xf32>
    %45 = tpu.matmul %42, %43, %cst_26 {dimension_numbers = #tpu.dot_dimension_numbers<[1], [1], [0], [0], [0, 0, 1, 0], [], []>} : vector<8x8xf32>, vector<8x8xf32>, vector<8x8xf32> -> vector<8x8xf32>
    %cst_27 = arith.constant 0.353553385 : f32
    %46 = vector.broadcast %cst_27 : f32 to vector<8x8xf32>
    %47 = arith.mulf %45, %46 : vector<8x8xf32>
    %48 = vector.broadcast %3 : vector<1x8xf32> to vector<8x8xf32>
    %49 = arith.addf %47, %48 : vector<8x8xf32>
    %cst_28 = arith.constant dense<0xFF800000> : vector<8xf32>
    %50 = vector.multi_reduction <maximumf>, %49, %cst_28 [1] : vector<8x8xf32> to vector<8xf32>
    %51 = vector.shape_cast %50 : vector<8xf32> to vector<8x1xf32>
    %52 = vector.broadcast %51 : vector<8x1xf32> to vector<8x8xf32>
    %53 = arith.subf %49, %52 : vector<8x8xf32>
    %54 = math.exp %53 : vector<8x8xf32>
    %cst_29 = arith.constant dense<0.000000e+00> : vector<8xf32>
    %55 = vector.multi_reduction <add>, %54, %cst_29 [1] : vector<8x8xf32> to vector<8xf32>
    %56 = vector.shape_cast %55 : vector<8xf32> to vector<8x1xf32>
    %57 = vector.broadcast %56 : vector<8x1xf32> to vector<8x8xf32>
    %58 = arith.divf %54, %57 : vector<8x8xf32>
    %cst_30 = arith.constant dense<0.000000e+00> : vector<8x8xf32>
    %59 = tpu.matmul %58, %44, %cst_30 {dimension_numbers = #tpu.dot_dimension_numbers<[1], [0], [0], [1], [0, 0, 1, 1], [], []>} : vector<8x8xf32>, vector<8x8xf32>, vector<8x8xf32> -> vector<8x8xf32>
    %60 = vector.extract_strided_slice %11 {offsets = [8, 0], sizes = [8, 32], strides = [1, 1]} : vector<32x32xf32> to vector<8x32xf32>
    %cst_31 = arith.constant dense<0.000000e+00> : vector<8x32xf32>
    %61 = tpu.matmul %59, %60, %cst_31 {dimension_numbers = #tpu.dot_dimension_numbers<[1], [0], [0], [1], [0, 0, 1, 1], [], []>} : vector<8x8xf32>, vector<8x32xf32>, vector<8x32xf32> -> vector<8x32xf32>
    %62 = arith.addf %41, %61 : vector<8x32xf32>
    %63 = vector.extract_strided_slice %17 {offsets = [0, 16], sizes = [8, 8], strides = [1, 1]} : vector<8x32xf32> to vector<8x8xf32>
    %64 = vector.extract_strided_slice %18 {offsets = [0, 16], sizes = [8, 8], strides = [1, 1]} : vector<8x32xf32> to vector<8x8xf32>
    %65 = vector.extract_strided_slice %19 {offsets = [0, 16], sizes = [8, 8], strides = [1, 1]} : vector<8x32xf32> to vector<8x8xf32>
    %cst_32 = arith.constant dense<0.000000e+00> : vector<8x8xf32>
    %66 = tpu.matmul %63, %64, %cst_32 {dimension_numbers = #tpu.dot_dimension_numbers<[1], [1], [0], [0], [0, 0, 1, 0], [], []>} : vector<8x8xf32>, vector<8x8xf32>, vector<8x8xf32> -> vector<8x8xf32>
    %cst_33 = arith.constant 0.353553385 : f32
    %67 = vector.broadcast %cst_33 : f32 to vector<8x8xf32>
    %68 = arith.mulf %66, %67 : vector<8x8xf32>
    %69 = vector.broadcast %3 : vector<1x8xf32> to vector<8x8xf32>
    %70 = arith.addf %68, %69 : vector<8x8xf32>
    %cst_34 = arith.constant dense<0xFF800000> : vector<8xf32>
    %71 = vector.multi_reduction <maximumf>, %70, %cst_34 [1] : vector<8x8xf32> to vector<8xf32>
    %72 = vector.shape_cast %71 : vector<8xf32> to vector<8x1xf32>
    %73 = vector.broadcast %72 : vector<8x1xf32> to vector<8x8xf32>
    %74 = arith.subf %70, %73 : vector<8x8xf32>
    %75 = math.exp %74 : vector<8x8xf32>
    %cst_35 = arith.constant dense<0.000000e+00> : vector<8xf32>
    %76 = vector.multi_reduction <add>, %75, %cst_35 [1] : vector<8x8xf32> to vector<8xf32>
    %77 = vector.shape_cast %76 : vector<8xf32> to vector<8x1xf32>
    %78 = vector.broadcast %77 : vector<8x1xf32> to vector<8x8xf32>
    %79 = arith.divf %75, %78 : vector<8x8xf32>
    %cst_36 = arith.constant dense<0.000000e+00> : vector<8x8xf32>
    %80 = tpu.matmul %79, %65, %cst_36 {dimension_numbers = #tpu.dot_dimension_numbers<[1], [0], [0], [1], [0, 0, 1, 1], [], []>} : vector<8x8xf32>, vector<8x8xf32>, vector<8x8xf32> -> vector<8x8xf32>
    %81 = vector.extract_strided_slice %11 {offsets = [16, 0], sizes = [8, 32], strides = [1, 1]} : vector<32x32xf32> to vector<8x32xf32>
    %cst_37 = arith.constant dense<0.000000e+00> : vector<8x32xf32>
    %82 = tpu.matmul %80, %81, %cst_37 {dimension_numbers = #tpu.dot_dimension_numbers<[1], [0], [0], [1], [0, 0, 1, 1], [], []>} : vector<8x8xf32>, vector<8x32xf32>, vector<8x32xf32> -> vector<8x32xf32>
    %83 = arith.addf %62, %82 : vector<8x32xf32>
    %84 = vector.extract_strided_slice %17 {offsets = [0, 24], sizes = [8, 8], strides = [1, 1]} : vector<8x32xf32> to vector<8x8xf32>
    %85 = vector.extract_strided_slice %18 {offsets = [0, 24], sizes = [8, 8], strides = [1, 1]} : vector<8x32xf32> to vector<8x8xf32>
    %86 = vector.extract_strided_slice %19 {offsets = [0, 24], sizes = [8, 8], strides = [1, 1]} : vector<8x32xf32> to vector<8x8xf32>
    %cst_38 = arith.constant dense<0.000000e+00> : vector<8x8xf32>
    %87 = tpu.matmul %84, %85, %cst_38 {dimension_numbers = #tpu.dot_dimension_numbers<[1], [1], [0], [0], [0, 0, 1, 0], [], []>} : vector<8x8xf32>, vector<8x8xf32>, vector<8x8xf32> -> vector<8x8xf32>
    %cst_39 = arith.constant 0.353553385 : f32
    %88 = vector.broadcast %cst_39 : f32 to vector<8x8xf32>
    %89 = arith.mulf %87, %88 : vector<8x8xf32>
    %90 = vector.broadcast %3 : vector<1x8xf32> to vector<8x8xf32>
    %91 = arith.addf %89, %90 : vector<8x8xf32>
    %cst_40 = arith.constant dense<0xFF800000> : vector<8xf32>
    %92 = vector.multi_reduction <maximumf>, %91, %cst_40 [1] : vector<8x8xf32> to vector<8xf32>
    %93 = vector.shape_cast %92 : vector<8xf32> to vector<8x1xf32>
    %94 = vector.broadcast %93 : vector<8x1xf32> to vector<8x8xf32>
    %95 = arith.subf %91, %94 : vector<8x8xf32>
    %96 = math.exp %95 : vector<8x8xf32>
    %cst_41 = arith.constant dense<0.000000e+00> : vector<8xf32>
    %97 = vector.multi_reduction <add>, %96, %cst_41 [1] : vector<8x8xf32> to vector<8xf32>
    %98 = vector.shape_cast %97 : vector<8xf32> to vector<8x1xf32>
    %99 = vector.broadcast %98 : vector<8x1xf32> to vector<8x8xf32>
    %100 = arith.divf %96, %99 : vector<8x8xf32>
    %cst_42 = arith.constant dense<0.000000e+00> : vector<8x8xf32>
    %101 = tpu.matmul %100, %86, %cst_42 {dimension_numbers = #tpu.dot_dimension_numbers<[1], [0], [0], [1], [0, 0, 1, 1], [], []>} : vector<8x8xf32>, vector<8x8xf32>, vector<8x8xf32> -> vector<8x8xf32>
    %102 = vector.extract_strided_slice %11 {offsets = [24, 0], sizes = [8, 32], strides = [1, 1]} : vector<32x32xf32> to vector<8x32xf32>
    %cst_43 = arith.constant dense<0.000000e+00> : vector<8x32xf32>
    %103 = tpu.matmul %101, %102, %cst_43 {dimension_numbers = #tpu.dot_dimension_numbers<[1], [0], [0], [1], [0, 0, 1, 1], [], []>} : vector<8x8xf32>, vector<8x32xf32>, vector<8x32xf32> -> vector<8x32xf32>
    %104 = arith.addf %83, %103 : vector<8x32xf32>
    %105 = arith.addf %1, %104 : vector<8x32xf32>
    %c0_44 = arith.constant 0 : index
    %c0_45 = arith.constant 0 : index
    %c0_46 = arith.constant 0 : index
    %106 = vector.load %arg9[%c0_44, %c0_45, %c0_46] : memref<2x1x32xf32, #tpu.memory_space<vmem>>, vector<1x1x32xf32>
    %107 = vector.shape_cast %106 : vector<1x1x32xf32> to vector<1x32xf32>
    %c0_47 = arith.constant 0 : index
    %c0_48 = arith.constant 0 : index
    %c0_49 = arith.constant 0 : index
    %108 = vector.load %arg10[%c0_47, %c0_48, %c0_49] : memref<2x1x32xf32, #tpu.memory_space<vmem>>, vector<1x1x32xf32>
    %109 = vector.shape_cast %108 : vector<1x1x32xf32> to vector<1x32xf32>
    %cst_50 = arith.constant dense<0.000000e+00> : vector<8xf32>
    %110 = vector.multi_reduction <add>, %105, %cst_50 [1] : vector<8x32xf32> to vector<8xf32>
    %111 = vector.shape_cast %110 : vector<8xf32> to vector<8x1xf32>
    %cst_51 = arith.constant 3.200000e+01 : f32
    %112 = vector.broadcast %cst_51 : f32 to vector<8x1xf32>
    %113 = arith.divf %111, %112 : vector<8x1xf32>
    %114 = vector.broadcast %113 : vector<8x1xf32> to vector<8x32xf32>
    %115 = arith.subf %105, %114 : vector<8x32xf32>
    %116 = arith.mulf %115, %115 : vector<8x32xf32>
    %cst_52 = arith.constant dense<0.000000e+00> : vector<8xf32>
    %117 = vector.multi_reduction <add>, %116, %cst_52 [1] : vector<8x32xf32> to vector<8xf32>
    %118 = vector.shape_cast %117 : vector<8xf32> to vector<8x1xf32>
    %cst_53 = arith.constant 3.200000e+01 : f32
    %119 = vector.broadcast %cst_53 : f32 to vector<8x1xf32>
    %120 = arith.divf %118, %119 : vector<8x1xf32>
    %cst_54 = arith.constant 9.99999974E-6 : f32
    %121 = vector.broadcast %cst_54 : f32 to vector<8x1xf32>
    %122 = arith.addf %120, %121 : vector<8x1xf32>
    %123 = math.rsqrt %122 : vector<8x1xf32>
    %124 = vector.broadcast %123 : vector<8x1xf32> to vector<8x32xf32>
    %125 = arith.mulf %115, %124 : vector<8x32xf32>
    %126 = vector.broadcast %107 : vector<1x32xf32> to vector<8x32xf32>
    %127 = arith.mulf %125, %126 : vector<8x32xf32>
    %128 = vector.broadcast %109 : vector<1x32xf32> to vector<8x32xf32>
    %129 = arith.addf %127, %128 : vector<8x32xf32>
    %c0_55 = arith.constant 0 : index
    %c0_56 = arith.constant 0 : index
    %c0_57 = arith.constant 0 : index
    %130 = vector.load %arg11[%c0_55, %c0_56, %c0_57] : memref<2x32x64xf32, #tpu.memory_space<vmem>>, vector<1x32x64xf32>
    %131 = vector.shape_cast %130 : vector<1x32x64xf32> to vector<32x64xf32>
    %c0_58 = arith.constant 0 : index
    %c0_59 = arith.constant 0 : index
    %c0_60 = arith.constant 0 : index
    %132 = vector.load %arg12[%c0_58, %c0_59, %c0_60] : memref<2x1x64xf32, #tpu.memory_space<vmem>>, vector<1x1x64xf32>
    %133 = vector.shape_cast %132 : vector<1x1x64xf32> to vector<1x64xf32>
    %c0_61 = arith.constant 0 : index
    %c0_62 = arith.constant 0 : index
    %c0_63 = arith.constant 0 : index
    %134 = vector.load %arg13[%c0_61, %c0_62, %c0_63] : memref<2x64x32xf32, #tpu.memory_space<vmem>>, vector<1x64x32xf32>
    %135 = vector.shape_cast %134 : vector<1x64x32xf32> to vector<64x32xf32>
    %c0_64 = arith.constant 0 : index
    %c0_65 = arith.constant 0 : index
    %c0_66 = arith.constant 0 : index
    %136 = vector.load %arg14[%c0_64, %c0_65, %c0_66] : memref<2x1x32xf32, #tpu.memory_space<vmem>>, vector<1x1x32xf32>
    %137 = vector.shape_cast %136 : vector<1x1x32xf32> to vector<1x32xf32>
    %cst_67 = arith.constant dense<0.000000e+00> : vector<8x64xf32>
    %138 = tpu.matmul %129, %131, %cst_67 {dimension_numbers = #tpu.dot_dimension_numbers<[1], [0], [0], [1], [0, 0, 1, 1], [], []>} : vector<8x32xf32>, vector<32x64xf32>, vector<8x64xf32> -> vector<8x64xf32>
    %139 = vector.broadcast %133 : vector<1x64xf32> to vector<8x64xf32>
    %140 = arith.addf %138, %139 : vector<8x64xf32>
    %cst_68 = arith.constant 0.000000e+00 : f32
    %141 = vector.broadcast %cst_68 : f32 to vector<8x64xf32>
    %142 = arith.maximumf %140, %141 : vector<8x64xf32>
    %cst_69 = arith.constant dense<0.000000e+00> : vector<8x32xf32>
    %143 = tpu.matmul %142, %135, %cst_69 {dimension_numbers = #tpu.dot_dimension_numbers<[1], [0], [0], [1], [0, 0, 1, 1], [], []>} : vector<8x64xf32>, vector<64x32xf32>, vector<8x32xf32> -> vector<8x32xf32>
    %144 = vector.broadcast %137 : vector<1x32xf32> to vector<8x32xf32>
    %145 = arith.addf %143, %144 : vector<8x32xf32>
    %146 = arith.addf %129, %145 : vector<8x32xf32>
    %c0_70 = arith.constant 0 : index
    %c0_71 = arith.constant 0 : index
    %c0_72 = arith.constant 0 : index
    %147 = vector.load %arg15[%c0_70, %c0_71, %c0_72] : memref<2x1x32xf32, #tpu.memory_space<vmem>>, vector<1x1x32xf32>
    %148 = vector.shape_cast %147 : vector<1x1x32xf32> to vector<1x32xf32>
    %c0_73 = arith.constant 0 : index
    %c0_74 = arith.constant 0 : index
    %c0_75 = arith.constant 0 : index
    %149 = vector.load %arg16[%c0_73, %c0_74, %c0_75] : memref<2x1x32xf32, #tpu.memory_space<vmem>>, vector<1x1x32xf32>
    %150 = vector.shape_cast %149 : vector<1x1x32xf32> to vector<1x32xf32>
    %cst_76 = arith.constant dense<0.000000e+00> : vector<8xf32>
    %151 = vector.multi_reduction <add>, %146, %cst_76 [1] : vector<8x32xf32> to vector<8xf32>
    %152 = vector.shape_cast %151 : vector<8xf32> to vector<8x1xf32>
    %cst_77 = arith.constant 3.200000e+01 : f32
    %153 = vector.broadcast %cst_77 : f32 to vector<8x1xf32>
    %154 = arith.divf %152, %153 : vector<8x1xf32>
    %155 = vector.broadcast %154 : vector<8x1xf32> to vector<8x32xf32>
    %156 = arith.subf %146, %155 : vector<8x32xf32>
    %157 = arith.mulf %156, %156 : vector<8x32xf32>
    %cst_78 = arith.constant dense<0.000000e+00> : vector<8xf32>
    %158 = vector.multi_reduction <add>, %157, %cst_78 [1] : vector<8x32xf32> to vector<8xf32>
    %159 = vector.shape_cast %158 : vector<8xf32> to vector<8x1xf32>
    %cst_79 = arith.constant 3.200000e+01 : f32
    %160 = vector.broadcast %cst_79 : f32 to vector<8x1xf32>
    %161 = arith.divf %159, %160 : vector<8x1xf32>
    %cst_80 = arith.constant 9.99999974E-6 : f32
    %162 = vector.broadcast %cst_80 : f32 to vector<8x1xf32>
    %163 = arith.addf %161, %162 : vector<8x1xf32>
    %164 = math.rsqrt %163 : vector<8x1xf32>
    %165 = vector.broadcast %164 : vector<8x1xf32> to vector<8x32xf32>
    %166 = arith.mulf %156, %165 : vector<8x32xf32>
    %167 = vector.broadcast %148 : vector<1x32xf32> to vector<8x32xf32>
    %168 = arith.mulf %166, %167 : vector<8x32xf32>
    %169 = vector.broadcast %150 : vector<1x32xf32> to vector<8x32xf32>
    %170 = arith.addf %168, %169 : vector<8x32xf32>
    %c1 = arith.constant 1 : index
    %c0_81 = arith.constant 0 : index
    %c0_82 = arith.constant 0 : index
    %171 = vector.load %arg5[%c1, %c0_81, %c0_82] : memref<2x32x96xf32, #tpu.memory_space<vmem>>, vector<1x32x96xf32>
    %172 = vector.shape_cast %171 : vector<1x32x96xf32> to vector<32x96xf32>
    %c1_83 = arith.constant 1 : index
    %c0_84 = arith.constant 0 : index
    %c0_85 = arith.constant 0 : index
    %173 = vector.load %arg6[%c1_83, %c0_84, %c0_85] : memref<2x1x96xf32, #tpu.memory_space<vmem>>, vector<1x1x96xf32>
    %174 = vector.shape_cast %173 : vector<1x1x96xf32> to vector<1x96xf32>
    %c1_86 = arith.constant 1 : index
    %c0_87 = arith.constant 0 : index
    %c0_88 = arith.constant 0 : index
    %175 = vector.load %arg7[%c1_86, %c0_87, %c0_88] : memref<2x32x32xf32, #tpu.memory_space<vmem>>, vector<1x32x32xf32>
    %176 = vector.shape_cast %175 : vector<1x32x32xf32> to vector<32x32xf32>
    %c1_89 = arith.constant 1 : index
    %c0_90 = arith.constant 0 : index
    %c0_91 = arith.constant 0 : index
    %177 = vector.load %arg8[%c1_89, %c0_90, %c0_91] : memref<2x1x32xf32, #tpu.memory_space<vmem>>, vector<1x1x32xf32>
    %178 = vector.shape_cast %177 : vector<1x1x32xf32> to vector<1x32xf32>
    %cst_92 = arith.constant dense<0.000000e+00> : vector<8x96xf32>
    %179 = tpu.matmul %170, %172, %cst_92 {dimension_numbers = #tpu.dot_dimension_numbers<[1], [0], [0], [1], [0, 0, 1, 1], [], []>} : vector<8x32xf32>, vector<32x96xf32>, vector<8x96xf32> -> vector<8x96xf32>
    %180 = vector.broadcast %174 : vector<1x96xf32> to vector<8x96xf32>
    %181 = arith.addf %179, %180 : vector<8x96xf32>
    %182 = vector.extract_strided_slice %181 {offsets = [0, 0], sizes = [8, 32], strides = [1, 1]} : vector<8x96xf32> to vector<8x32xf32>
    %183 = vector.extract_strided_slice %181 {offsets = [0, 32], sizes = [8, 32], strides = [1, 1]} : vector<8x96xf32> to vector<8x32xf32>
    %184 = vector.extract_strided_slice %181 {offsets = [0, 64], sizes = [8, 32], strides = [1, 1]} : vector<8x96xf32> to vector<8x32xf32>
    %185 = vector.extract_strided_slice %182 {offsets = [0, 0], sizes = [8, 8], strides = [1, 1]} : vector<8x32xf32> to vector<8x8xf32>
    %186 = vector.extract_strided_slice %183 {offsets = [0, 0], sizes = [8, 8], strides = [1, 1]} : vector<8x32xf32> to vector<8x8xf32>
    %187 = vector.extract_strided_slice %184 {offsets = [0, 0], sizes = [8, 8], strides = [1, 1]} : vector<8x32xf32> to vector<8x8xf32>
    %cst_93 = arith.constant dense<0.000000e+00> : vector<8x8xf32>
    %188 = tpu.matmul %185, %186, %cst_93 {dimension_numbers = #tpu.dot_dimension_numbers<[1], [1], [0], [0], [0, 0, 1, 0], [], []>} : vector<8x8xf32>, vector<8x8xf32>, vector<8x8xf32> -> vector<8x8xf32>
    %cst_94 = arith.constant 0.353553385 : f32
    %189 = vector.broadcast %cst_94 : f32 to vector<8x8xf32>
    %190 = arith.mulf %188, %189 : vector<8x8xf32>
    %191 = vector.broadcast %3 : vector<1x8xf32> to vector<8x8xf32>
    %192 = arith.addf %190, %191 : vector<8x8xf32>
    %cst_95 = arith.constant dense<0xFF800000> : vector<8xf32>
    %193 = vector.multi_reduction <maximumf>, %192, %cst_95 [1] : vector<8x8xf32> to vector<8xf32>
    %194 = vector.shape_cast %193 : vector<8xf32> to vector<8x1xf32>
    %195 = vector.broadcast %194 : vector<8x1xf32> to vector<8x8xf32>
    %196 = arith.subf %192, %195 : vector<8x8xf32>
    %197 = math.exp %196 : vector<8x8xf32>
    %cst_96 = arith.constant dense<0.000000e+00> : vector<8xf32>
    %198 = vector.multi_reduction <add>, %197, %cst_96 [1] : vector<8x8xf32> to vector<8xf32>
    %199 = vector.shape_cast %198 : vector<8xf32> to vector<8x1xf32>
    %200 = vector.broadcast %199 : vector<8x1xf32> to vector<8x8xf32>
    %201 = arith.divf %197, %200 : vector<8x8xf32>
    %cst_97 = arith.constant dense<0.000000e+00> : vector<8x8xf32>
    %202 = tpu.matmul %201, %187, %cst_97 {dimension_numbers = #tpu.dot_dimension_numbers<[1], [0], [0], [1], [0, 0, 1, 1], [], []>} : vector<8x8xf32>, vector<8x8xf32>, vector<8x8xf32> -> vector<8x8xf32>
    %203 = vector.extract_strided_slice %176 {offsets = [0, 0], sizes = [8, 32], strides = [1, 1]} : vector<32x32xf32> to vector<8x32xf32>
    %cst_98 = arith.constant dense<0.000000e+00> : vector<8x32xf32>
    %204 = tpu.matmul %202, %203, %cst_98 {dimension_numbers = #tpu.dot_dimension_numbers<[1], [0], [0], [1], [0, 0, 1, 1], [], []>} : vector<8x8xf32>, vector<8x32xf32>, vector<8x32xf32> -> vector<8x32xf32>
    %205 = vector.broadcast %178 : vector<1x32xf32> to vector<8x32xf32>
    %206 = arith.addf %205, %204 : vector<8x32xf32>
    %207 = vector.extract_strided_slice %182 {offsets = [0, 8], sizes = [8, 8], strides = [1, 1]} : vector<8x32xf32> to vector<8x8xf32>
    %208 = vector.extract_strided_slice %183 {offsets = [0, 8], sizes = [8, 8], strides = [1, 1]} : vector<8x32xf32> to vector<8x8xf32>
    %209 = vector.extract_strided_slice %184 {offsets = [0, 8], sizes = [8, 8], strides = [1, 1]} : vector<8x32xf32> to vector<8x8xf32>
    %cst_99 = arith.constant dense<0.000000e+00> : vector<8x8xf32>
    %210 = tpu.matmul %207, %208, %cst_99 {dimension_numbers = #tpu.dot_dimension_numbers<[1], [1], [0], [0], [0, 0, 1, 0], [], []>} : vector<8x8xf32>, vector<8x8xf32>, vector<8x8xf32> -> vector<8x8xf32>
    %cst_100 = arith.constant 0.353553385 : f32
    %211 = vector.broadcast %cst_100 : f32 to vector<8x8xf32>
    %212 = arith.mulf %210, %211 : vector<8x8xf32>
    %213 = vector.broadcast %3 : vector<1x8xf32> to vector<8x8xf32>
    %214 = arith.addf %212, %213 : vector<8x8xf32>
    %cst_101 = arith.constant dense<0xFF800000> : vector<8xf32>
    %215 = vector.multi_reduction <maximumf>, %214, %cst_101 [1] : vector<8x8xf32> to vector<8xf32>
    %216 = vector.shape_cast %215 : vector<8xf32> to vector<8x1xf32>
    %217 = vector.broadcast %216 : vector<8x1xf32> to vector<8x8xf32>
    %218 = arith.subf %214, %217 : vector<8x8xf32>
    %219 = math.exp %218 : vector<8x8xf32>
    %cst_102 = arith.constant dense<0.000000e+00> : vector<8xf32>
    %220 = vector.multi_reduction <add>, %219, %cst_102 [1] : vector<8x8xf32> to vector<8xf32>
    %221 = vector.shape_cast %220 : vector<8xf32> to vector<8x1xf32>
    %222 = vector.broadcast %221 : vector<8x1xf32> to vector<8x8xf32>
    %223 = arith.divf %219, %222 : vector<8x8xf32>
    %cst_103 = arith.constant dense<0.000000e+00> : vector<8x8xf32>
    %224 = tpu.matmul %223, %209, %cst_103 {dimension_numbers = #tpu.dot_dimension_numbers<[1], [0], [0], [1], [0, 0, 1, 1], [], []>} : vector<8x8xf32>, vector<8x8xf32>, vector<8x8xf32> -> vector<8x8xf32>
    %225 = vector.extract_strided_slice %176 {offsets = [8, 0], sizes = [8, 32], strides = [1, 1]} : vector<32x32xf32> to vector<8x32xf32>
    %cst_104 = arith.constant dense<0.000000e+00> : vector<8x32xf32>
    %226 = tpu.matmul %224, %225, %cst_104 {dimension_numbers = #tpu.dot_dimension_numbers<[1], [0], [0], [1], [0, 0, 1, 1], [], []>} : vector<8x8xf32>, vector<8x32xf32>, vector<8x32xf32> -> vector<8x32xf32>
    %227 = arith.addf %206, %226 : vector<8x32xf32>
    %228 = vector.extract_strided_slice %182 {offsets = [0, 16], sizes = [8, 8], strides = [1, 1]} : vector<8x32xf32> to vector<8x8xf32>
    %229 = vector.extract_strided_slice %183 {offsets = [0, 16], sizes = [8, 8], strides = [1, 1]} : vector<8x32xf32> to vector<8x8xf32>
    %230 = vector.extract_strided_slice %184 {offsets = [0, 16], sizes = [8, 8], strides = [1, 1]} : vector<8x32xf32> to vector<8x8xf32>
    %cst_105 = arith.constant dense<0.000000e+00> : vector<8x8xf32>
    %231 = tpu.matmul %228, %229, %cst_105 {dimension_numbers = #tpu.dot_dimension_numbers<[1], [1], [0], [0], [0, 0, 1, 0], [], []>} : vector<8x8xf32>, vector<8x8xf32>, vector<8x8xf32> -> vector<8x8xf32>
    %cst_106 = arith.constant 0.353553385 : f32
    %232 = vector.broadcast %cst_106 : f32 to vector<8x8xf32>
    %233 = arith.mulf %231, %232 : vector<8x8xf32>
    %234 = vector.broadcast %3 : vector<1x8xf32> to vector<8x8xf32>
    %235 = arith.addf %233, %234 : vector<8x8xf32>
    %cst_107 = arith.constant dense<0xFF800000> : vector<8xf32>
    %236 = vector.multi_reduction <maximumf>, %235, %cst_107 [1] : vector<8x8xf32> to vector<8xf32>
    %237 = vector.shape_cast %236 : vector<8xf32> to vector<8x1xf32>
    %238 = vector.broadcast %237 : vector<8x1xf32> to vector<8x8xf32>
    %239 = arith.subf %235, %238 : vector<8x8xf32>
    %240 = math.exp %239 : vector<8x8xf32>
    %cst_108 = arith.constant dense<0.000000e+00> : vector<8xf32>
    %241 = vector.multi_reduction <add>, %240, %cst_108 [1] : vector<8x8xf32> to vector<8xf32>
    %242 = vector.shape_cast %241 : vector<8xf32> to vector<8x1xf32>
    %243 = vector.broadcast %242 : vector<8x1xf32> to vector<8x8xf32>
    %244 = arith.divf %240, %243 : vector<8x8xf32>
    %cst_109 = arith.constant dense<0.000000e+00> : vector<8x8xf32>
    %245 = tpu.matmul %244, %230, %cst_109 {dimension_numbers = #tpu.dot_dimension_numbers<[1], [0], [0], [1], [0, 0, 1, 1], [], []>} : vector<8x8xf32>, vector<8x8xf32>, vector<8x8xf32> -> vector<8x8xf32>
    %246 = vector.extract_strided_slice %176 {offsets = [16, 0], sizes = [8, 32], strides = [1, 1]} : vector<32x32xf32> to vector<8x32xf32>
    %cst_110 = arith.constant dense<0.000000e+00> : vector<8x32xf32>
    %247 = tpu.matmul %245, %246, %cst_110 {dimension_numbers = #tpu.dot_dimension_numbers<[1], [0], [0], [1], [0, 0, 1, 1], [], []>} : vector<8x8xf32>, vector<8x32xf32>, vector<8x32xf32> -> vector<8x32xf32>
    %248 = arith.addf %227, %247 : vector<8x32xf32>
    %249 = vector.extract_strided_slice %182 {offsets = [0, 24], sizes = [8, 8], strides = [1, 1]} : vector<8x32xf32> to vector<8x8xf32>
    %250 = vector.extract_strided_slice %183 {offsets = [0, 24], sizes = [8, 8], strides = [1, 1]} : vector<8x32xf32> to vector<8x8xf32>
    %251 = vector.extract_strided_slice %184 {offsets = [0, 24], sizes = [8, 8], strides = [1, 1]} : vector<8x32xf32> to vector<8x8xf32>
    %cst_111 = arith.constant dense<0.000000e+00> : vector<8x8xf32>
    %252 = tpu.matmul %249, %250, %cst_111 {dimension_numbers = #tpu.dot_dimension_numbers<[1], [1], [0], [0], [0, 0, 1, 0], [], []>} : vector<8x8xf32>, vector<8x8xf32>, vector<8x8xf32> -> vector<8x8xf32>
    %cst_112 = arith.constant 0.353553385 : f32
    %253 = vector.broadcast %cst_112 : f32 to vector<8x8xf32>
    %254 = arith.mulf %252, %253 : vector<8x8xf32>
    %255 = vector.broadcast %3 : vector<1x8xf32> to vector<8x8xf32>
    %256 = arith.addf %254, %255 : vector<8x8xf32>
    %cst_113 = arith.constant dense<0xFF800000> : vector<8xf32>
    %257 = vector.multi_reduction <maximumf>, %256, %cst_113 [1] : vector<8x8xf32> to vector<8xf32>
    %258 = vector.shape_cast %257 : vector<8xf32> to vector<8x1xf32>
    %259 = vector.broadcast %258 : vector<8x1xf32> to vector<8x8xf32>
    %260 = arith.subf %256, %259 : vector<8x8xf32>
    %261 = math.exp %260 : vector<8x8xf32>
    %cst_114 = arith.constant dense<0.000000e+00> : vector<8xf32>
    %262 = vector.multi_reduction <add>, %261, %cst_114 [1] : vector<8x8xf32> to vector<8xf32>
    %263 = vector.shape_cast %262 : vector<8xf32> to vector<8x1xf32>
    %264 = vector.broadcast %263 : vector<8x1xf32> to vector<8x8xf32>
    %265 = arith.divf %261, %264 : vector<8x8xf32>
    %cst_115 = arith.constant dense<0.000000e+00> : vector<8x8xf32>
    %266 = tpu.matmul %265, %251, %cst_115 {dimension_numbers = #tpu.dot_dimension_numbers<[1], [0], [0], [1], [0, 0, 1, 1], [], []>} : vector<8x8xf32>, vector<8x8xf32>, vector<8x8xf32> -> vector<8x8xf32>
    %267 = vector.extract_strided_slice %176 {offsets = [24, 0], sizes = [8, 32], strides = [1, 1]} : vector<32x32xf32> to vector<8x32xf32>
    %cst_116 = arith.constant dense<0.000000e+00> : vector<8x32xf32>
    %268 = tpu.matmul %266, %267, %cst_116 {dimension_numbers = #tpu.dot_dimension_numbers<[1], [0], [0], [1], [0, 0, 1, 1], [], []>} : vector<8x8xf32>, vector<8x32xf32>, vector<8x32xf32> -> vector<8x32xf32>
    %269 = arith.addf %248, %268 : vector<8x32xf32>
    %270 = arith.addf %170, %269 : vector<8x32xf32>
    %c1_117 = arith.constant 1 : index
    %c0_118 = arith.constant 0 : index
    %c0_119 = arith.constant 0 : index
    %271 = vector.load %arg9[%c1_117, %c0_118, %c0_119] : memref<2x1x32xf32, #tpu.memory_space<vmem>>, vector<1x1x32xf32>
    %272 = vector.shape_cast %271 : vector<1x1x32xf32> to vector<1x32xf32>
    %c1_120 = arith.constant 1 : index
    %c0_121 = arith.constant 0 : index
    %c0_122 = arith.constant 0 : index
    %273 = vector.load %arg10[%c1_120, %c0_121, %c0_122] : memref<2x1x32xf32, #tpu.memory_space<vmem>>, vector<1x1x32xf32>
    %274 = vector.shape_cast %273 : vector<1x1x32xf32> to vector<1x32xf32>
    %cst_123 = arith.constant dense<0.000000e+00> : vector<8xf32>
    %275 = vector.multi_reduction <add>, %270, %cst_123 [1] : vector<8x32xf32> to vector<8xf32>
    %276 = vector.shape_cast %275 : vector<8xf32> to vector<8x1xf32>
    %cst_124 = arith.constant 3.200000e+01 : f32
    %277 = vector.broadcast %cst_124 : f32 to vector<8x1xf32>
    %278 = arith.divf %276, %277 : vector<8x1xf32>
    %279 = vector.broadcast %278 : vector<8x1xf32> to vector<8x32xf32>
    %280 = arith.subf %270, %279 : vector<8x32xf32>
    %281 = arith.mulf %280, %280 : vector<8x32xf32>
    %cst_125 = arith.constant dense<0.000000e+00> : vector<8xf32>
    %282 = vector.multi_reduction <add>, %281, %cst_125 [1] : vector<8x32xf32> to vector<8xf32>
    %283 = vector.shape_cast %282 : vector<8xf32> to vector<8x1xf32>
    %cst_126 = arith.constant 3.200000e+01 : f32
    %284 = vector.broadcast %cst_126 : f32 to vector<8x1xf32>
    %285 = arith.divf %283, %284 : vector<8x1xf32>
    %cst_127 = arith.constant 9.99999974E-6 : f32
    %286 = vector.broadcast %cst_127 : f32 to vector<8x1xf32>
    %287 = arith.addf %285, %286 : vector<8x1xf32>
    %288 = math.rsqrt %287 : vector<8x1xf32>
    %289 = vector.broadcast %288 : vector<8x1xf32> to vector<8x32xf32>
    %290 = arith.mulf %280, %289 : vector<8x32xf32>
    %291 = vector.broadcast %272 : vector<1x32xf32> to vector<8x32xf32>
    %292 = arith.mulf %290, %291 : vector<8x32xf32>
    %293 = vector.broadcast %274 : vector<1x32xf32> to vector<8x32xf32>
    %294 = arith.addf %292, %293 : vector<8x32xf32>
    %c1_128 = arith.constant 1 : index
    %c0_129 = arith.constant 0 : index
    %c0_130 = arith.constant 0 : index
    %295 = vector.load %arg11[%c1_128, %c0_129, %c0_130] : memref<2x32x64xf32, #tpu.memory_space<vmem>>, vector<1x32x64xf32>
    %296 = vector.shape_cast %295 : vector<1x32x64xf32> to vector<32x64xf32>
    %c1_131 = arith.constant 1 : index
    %c0_132 = arith.constant 0 : index
    %c0_133 = arith.constant 0 : index
    %297 = vector.load %arg12[%c1_131, %c0_132, %c0_133] : memref<2x1x64xf32, #tpu.memory_space<vmem>>, vector<1x1x64xf32>
    %298 = vector.shape_cast %297 : vector<1x1x64xf32> to vector<1x64xf32>
    %c1_134 = arith.constant 1 : index
    %c0_135 = arith.constant 0 : index
    %c0_136 = arith.constant 0 : index
    %299 = vector.load %arg13[%c1_134, %c0_135, %c0_136] : memref<2x64x32xf32, #tpu.memory_space<vmem>>, vector<1x64x32xf32>
    %300 = vector.shape_cast %299 : vector<1x64x32xf32> to vector<64x32xf32>
    %c1_137 = arith.constant 1 : index
    %c0_138 = arith.constant 0 : index
    %c0_139 = arith.constant 0 : index
    %301 = vector.load %arg14[%c1_137, %c0_138, %c0_139] : memref<2x1x32xf32, #tpu.memory_space<vmem>>, vector<1x1x32xf32>
    %302 = vector.shape_cast %301 : vector<1x1x32xf32> to vector<1x32xf32>
    %cst_140 = arith.constant dense<0.000000e+00> : vector<8x64xf32>
    %303 = tpu.matmul %294, %296, %cst_140 {dimension_numbers = #tpu.dot_dimension_numbers<[1], [0], [0], [1], [0, 0, 1, 1], [], []>} : vector<8x32xf32>, vector<32x64xf32>, vector<8x64xf32> -> vector<8x64xf32>
    %304 = vector.broadcast %298 : vector<1x64xf32> to vector<8x64xf32>
    %305 = arith.addf %303, %304 : vector<8x64xf32>
    %cst_141 = arith.constant 0.000000e+00 : f32
    %306 = vector.broadcast %cst_141 : f32 to vector<8x64xf32>
    %307 = arith.maximumf %305, %306 : vector<8x64xf32>
    %cst_142 = arith.constant dense<0.000000e+00> : vector<8x32xf32>
    %308 = tpu.matmul %307, %300, %cst_142 {dimension_numbers = #tpu.dot_dimension_numbers<[1], [0], [0], [1], [0, 0, 1, 1], [], []>} : vector<8x64xf32>, vector<64x32xf32>, vector<8x32xf32> -> vector<8x32xf32>
    %309 = vector.broadcast %302 : vector<1x32xf32> to vector<8x32xf32>
    %310 = arith.addf %308, %309 : vector<8x32xf32>
    %311 = arith.addf %294, %310 : vector<8x32xf32>
    %c1_143 = arith.constant 1 : index
    %c0_144 = arith.constant 0 : index
    %c0_145 = arith.constant 0 : index
    %312 = vector.load %arg15[%c1_143, %c0_144, %c0_145] : memref<2x1x32xf32, #tpu.memory_space<vmem>>, vector<1x1x32xf32>
    %313 = vector.shape_cast %312 : vector<1x1x32xf32> to vector<1x32xf32>
    %c1_146 = arith.constant 1 : index
    %c0_147 = arith.constant 0 : index
    %c0_148 = arith.constant 0 : index
    %314 = vector.load %arg16[%c1_146, %c0_147, %c0_148] : memref<2x1x32xf32, #tpu.memory_space<vmem>>, vector<1x1x32xf32>
    %315 = vector.shape_cast %314 : vector<1x1x32xf32> to vector<1x32xf32>
    %cst_149 = arith.constant dense<0.000000e+00> : vector<8xf32>
    %316 = vector.multi_reduction <add>, %311, %cst_149 [1] : vector<8x32xf32> to vector<8xf32>
    %317 = vector.shape_cast %316 : vector<8xf32> to vector<8x1xf32>
    %cst_150 = arith.constant 3.200000e+01 : f32
    %318 = vector.broadcast %cst_150 : f32 to vector<8x1xf32>
    %319 = arith.divf %317, %318 : vector<8x1xf32>
    %320 = vector.broadcast %319 : vector<8x1xf32> to vector<8x32xf32>
    %321 = arith.subf %311, %320 : vector<8x32xf32>
    %322 = arith.mulf %321, %321 : vector<8x32xf32>
    %cst_151 = arith.constant dense<0.000000e+00> : vector<8xf32>
    %323 = vector.multi_reduction <add>, %322, %cst_151 [1] : vector<8x32xf32> to vector<8xf32>
    %324 = vector.shape_cast %323 : vector<8xf32> to vector<8x1xf32>
    %cst_152 = arith.constant 3.200000e+01 : f32
    %325 = vector.broadcast %cst_152 : f32 to vector<8x1xf32>
    %326 = arith.divf %324, %325 : vector<8x1xf32>
    %cst_153 = arith.constant 9.99999974E-6 : f32
    %327 = vector.broadcast %cst_153 : f32 to vector<8x1xf32>
    %328 = arith.addf %326, %327 : vector<8x1xf32>
    %329 = math.rsqrt %328 : vector<8x1xf32>
    %330 = vector.broadcast %329 : vector<8x1xf32> to vector<8x32xf32>
    %331 = arith.mulf %321, %330 : vector<8x32xf32>
    %332 = vector.broadcast %313 : vector<1x32xf32> to vector<8x32xf32>
    %333 = arith.mulf %331, %332 : vector<8x32xf32>
    %334 = vector.broadcast %315 : vector<1x32xf32> to vector<8x32xf32>
    %335 = arith.addf %333, %334 : vector<8x32xf32>
    %c0_154 = arith.constant 0 : index
    %c0_155 = arith.constant 0 : index
    %c0_156 = arith.constant 0 : index
    %336 = vector.load %arg2[%c0_154, %c0_155, %c0_156] : memref<1x8x32xf32, #tpu.memory_space<vmem>>, vector<1x8x32xf32>
    %337 = vector.shape_cast %336 : vector<1x8x32xf32> to vector<8x32xf32>
    %c0_157 = arith.constant 0 : index
    %c0_158 = arith.constant 0 : index
    %c0_159 = arith.constant 0 : index
    %338 = vector.load %arg17[%c0_157, %c0_158, %c0_159] : memref<2x32x96xf32, #tpu.memory_space<vmem>>, vector<1x32x96xf32>
    %339 = vector.shape_cast %338 : vector<1x32x96xf32> to vector<32x96xf32>
    %c0_160 = arith.constant 0 : index
    %c0_161 = arith.constant 0 : index
    %c0_162 = arith.constant 0 : index
    %340 = vector.load %arg18[%c0_160, %c0_161, %c0_162] : memref<2x1x96xf32, #tpu.memory_space<vmem>>, vector<1x1x96xf32>
    %341 = vector.shape_cast %340 : vector<1x1x96xf32> to vector<1x96xf32>
    %c0_163 = arith.constant 0 : index
    %c0_164 = arith.constant 0 : index
    %c0_165 = arith.constant 0 : index
    %342 = vector.load %arg19[%c0_163, %c0_164, %c0_165] : memref<2x32x32xf32, #tpu.memory_space<vmem>>, vector<1x32x32xf32>
    %343 = vector.shape_cast %342 : vector<1x32x32xf32> to vector<32x32xf32>
    %c0_166 = arith.constant 0 : index
    %c0_167 = arith.constant 0 : index
    %c0_168 = arith.constant 0 : index
    %344 = vector.load %arg20[%c0_166, %c0_167, %c0_168] : memref<2x1x32xf32, #tpu.memory_space<vmem>>, vector<1x1x32xf32>
    %345 = vector.shape_cast %344 : vector<1x1x32xf32> to vector<1x32xf32>
    %cst_169 = arith.constant dense<0.000000e+00> : vector<8x96xf32>
    %346 = tpu.matmul %337, %339, %cst_169 {dimension_numbers = #tpu.dot_dimension_numbers<[1], [0], [0], [1], [0, 0, 1, 1], [], []>} : vector<8x32xf32>, vector<32x96xf32>, vector<8x96xf32> -> vector<8x96xf32>
    %347 = vector.broadcast %341 : vector<1x96xf32> to vector<8x96xf32>
    %348 = arith.addf %346, %347 : vector<8x96xf32>
    %349 = vector.extract_strided_slice %348 {offsets = [0, 0], sizes = [8, 32], strides = [1, 1]} : vector<8x96xf32> to vector<8x32xf32>
    %350 = vector.extract_strided_slice %348 {offsets = [0, 32], sizes = [8, 32], strides = [1, 1]} : vector<8x96xf32> to vector<8x32xf32>
    %351 = vector.extract_strided_slice %348 {offsets = [0, 64], sizes = [8, 32], strides = [1, 1]} : vector<8x96xf32> to vector<8x32xf32>
    %352 = vector.extract_strided_slice %349 {offsets = [0, 0], sizes = [8, 8], strides = [1, 1]} : vector<8x32xf32> to vector<8x8xf32>
    %353 = vector.extract_strided_slice %350 {offsets = [0, 0], sizes = [8, 8], strides = [1, 1]} : vector<8x32xf32> to vector<8x8xf32>
    %354 = vector.extract_strided_slice %351 {offsets = [0, 0], sizes = [8, 8], strides = [1, 1]} : vector<8x32xf32> to vector<8x8xf32>
    %cst_170 = arith.constant dense<0.000000e+00> : vector<8x8xf32>
    %355 = tpu.matmul %352, %353, %cst_170 {dimension_numbers = #tpu.dot_dimension_numbers<[1], [1], [0], [0], [0, 0, 1, 0], [], []>} : vector<8x8xf32>, vector<8x8xf32>, vector<8x8xf32> -> vector<8x8xf32>
    %cst_171 = arith.constant 0.353553385 : f32
    %356 = vector.broadcast %cst_171 : f32 to vector<8x8xf32>
    %357 = arith.mulf %355, %356 : vector<8x8xf32>
    %358 = arith.addf %357, %5 : vector<8x8xf32>
    %cst_172 = arith.constant dense<0xFF800000> : vector<8xf32>
    %359 = vector.multi_reduction <maximumf>, %358, %cst_172 [1] : vector<8x8xf32> to vector<8xf32>
    %360 = vector.shape_cast %359 : vector<8xf32> to vector<8x1xf32>
    %361 = vector.broadcast %360 : vector<8x1xf32> to vector<8x8xf32>
    %362 = arith.subf %358, %361 : vector<8x8xf32>
    %363 = math.exp %362 : vector<8x8xf32>
    %cst_173 = arith.constant dense<0.000000e+00> : vector<8xf32>
    %364 = vector.multi_reduction <add>, %363, %cst_173 [1] : vector<8x8xf32> to vector<8xf32>
    %365 = vector.shape_cast %364 : vector<8xf32> to vector<8x1xf32>
    %366 = vector.broadcast %365 : vector<8x1xf32> to vector<8x8xf32>
    %367 = arith.divf %363, %366 : vector<8x8xf32>
    %cst_174 = arith.constant dense<0.000000e+00> : vector<8x8xf32>
    %368 = tpu.matmul %367, %354, %cst_174 {dimension_numbers = #tpu.dot_dimension_numbers<[1], [0], [0], [1], [0, 0, 1, 1], [], []>} : vector<8x8xf32>, vector<8x8xf32>, vector<8x8xf32> -> vector<8x8xf32>
    %369 = vector.extract_strided_slice %343 {offsets = [0, 0], sizes = [8, 32], strides = [1, 1]} : vector<32x32xf32> to vector<8x32xf32>
    %cst_175 = arith.constant dense<0.000000e+00> : vector<8x32xf32>
    %370 = tpu.matmul %368, %369, %cst_175 {dimension_numbers = #tpu.dot_dimension_numbers<[1], [0], [0], [1], [0, 0, 1, 1], [], []>} : vector<8x8xf32>, vector<8x32xf32>, vector<8x32xf32> -> vector<8x32xf32>
    %371 = vector.broadcast %345 : vector<1x32xf32> to vector<8x32xf32>
    %372 = arith.addf %371, %370 : vector<8x32xf32>
    %373 = vector.extract_strided_slice %349 {offsets = [0, 8], sizes = [8, 8], strides = [1, 1]} : vector<8x32xf32> to vector<8x8xf32>
    %374 = vector.extract_strided_slice %350 {offsets = [0, 8], sizes = [8, 8], strides = [1, 1]} : vector<8x32xf32> to vector<8x8xf32>
    %375 = vector.extract_strided_slice %351 {offsets = [0, 8], sizes = [8, 8], strides = [1, 1]} : vector<8x32xf32> to vector<8x8xf32>
    %cst_176 = arith.constant dense<0.000000e+00> : vector<8x8xf32>
    %376 = tpu.matmul %373, %374, %cst_176 {dimension_numbers = #tpu.dot_dimension_numbers<[1], [1], [0], [0], [0, 0, 1, 0], [], []>} : vector<8x8xf32>, vector<8x8xf32>, vector<8x8xf32> -> vector<8x8xf32>
    %cst_177 = arith.constant 0.353553385 : f32
    %377 = vector.broadcast %cst_177 : f32 to vector<8x8xf32>
    %378 = arith.mulf %376, %377 : vector<8x8xf32>
    %379 = arith.addf %378, %5 : vector<8x8xf32>
    %cst_178 = arith.constant dense<0xFF800000> : vector<8xf32>
    %380 = vector.multi_reduction <maximumf>, %379, %cst_178 [1] : vector<8x8xf32> to vector<8xf32>
    %381 = vector.shape_cast %380 : vector<8xf32> to vector<8x1xf32>
    %382 = vector.broadcast %381 : vector<8x1xf32> to vector<8x8xf32>
    %383 = arith.subf %379, %382 : vector<8x8xf32>
    %384 = math.exp %383 : vector<8x8xf32>
    %cst_179 = arith.constant dense<0.000000e+00> : vector<8xf32>
    %385 = vector.multi_reduction <add>, %384, %cst_179 [1] : vector<8x8xf32> to vector<8xf32>
    %386 = vector.shape_cast %385 : vector<8xf32> to vector<8x1xf32>
    %387 = vector.broadcast %386 : vector<8x1xf32> to vector<8x8xf32>
    %388 = arith.divf %384, %387 : vector<8x8xf32>
    %cst_180 = arith.constant dense<0.000000e+00> : vector<8x8xf32>
    %389 = tpu.matmul %388, %375, %cst_180 {dimension_numbers = #tpu.dot_dimension_numbers<[1], [0], [0], [1], [0, 0, 1, 1], [], []>} : vector<8x8xf32>, vector<8x8xf32>, vector<8x8xf32> -> vector<8x8xf32>
    %390 = vector.extract_strided_slice %343 {offsets = [8, 0], sizes = [8, 32], strides = [1, 1]} : vector<32x32xf32> to vector<8x32xf32>
    %cst_181 = arith.constant dense<0.000000e+00> : vector<8x32xf32>
    %391 = tpu.matmul %389, %390, %cst_181 {dimension_numbers = #tpu.dot_dimension_numbers<[1], [0], [0], [1], [0, 0, 1, 1], [], []>} : vector<8x8xf32>, vector<8x32xf32>, vector<8x32xf32> -> vector<8x32xf32>
    %392 = arith.addf %372, %391 : vector<8x32xf32>
    %393 = vector.extract_strided_slice %349 {offsets = [0, 16], sizes = [8, 8], strides = [1, 1]} : vector<8x32xf32> to vector<8x8xf32>
    %394 = vector.extract_strided_slice %350 {offsets = [0, 16], sizes = [8, 8], strides = [1, 1]} : vector<8x32xf32> to vector<8x8xf32>
    %395 = vector.extract_strided_slice %351 {offsets = [0, 16], sizes = [8, 8], strides = [1, 1]} : vector<8x32xf32> to vector<8x8xf32>
    %cst_182 = arith.constant dense<0.000000e+00> : vector<8x8xf32>
    %396 = tpu.matmul %393, %394, %cst_182 {dimension_numbers = #tpu.dot_dimension_numbers<[1], [1], [0], [0], [0, 0, 1, 0], [], []>} : vector<8x8xf32>, vector<8x8xf32>, vector<8x8xf32> -> vector<8x8xf32>
    %cst_183 = arith.constant 0.353553385 : f32
    %397 = vector.broadcast %cst_183 : f32 to vector<8x8xf32>
    %398 = arith.mulf %396, %397 : vector<8x8xf32>
    %399 = arith.addf %398, %5 : vector<8x8xf32>
    %cst_184 = arith.constant dense<0xFF800000> : vector<8xf32>
    %400 = vector.multi_reduction <maximumf>, %399, %cst_184 [1] : vector<8x8xf32> to vector<8xf32>
    %401 = vector.shape_cast %400 : vector<8xf32> to vector<8x1xf32>
    %402 = vector.broadcast %401 : vector<8x1xf32> to vector<8x8xf32>
    %403 = arith.subf %399, %402 : vector<8x8xf32>
    %404 = math.exp %403 : vector<8x8xf32>
    %cst_185 = arith.constant dense<0.000000e+00> : vector<8xf32>
    %405 = vector.multi_reduction <add>, %404, %cst_185 [1] : vector<8x8xf32> to vector<8xf32>
    %406 = vector.shape_cast %405 : vector<8xf32> to vector<8x1xf32>
    %407 = vector.broadcast %406 : vector<8x1xf32> to vector<8x8xf32>
    %408 = arith.divf %404, %407 : vector<8x8xf32>
    %cst_186 = arith.constant dense<0.000000e+00> : vector<8x8xf32>
    %409 = tpu.matmul %408, %395, %cst_186 {dimension_numbers = #tpu.dot_dimension_numbers<[1], [0], [0], [1], [0, 0, 1, 1], [], []>} : vector<8x8xf32>, vector<8x8xf32>, vector<8x8xf32> -> vector<8x8xf32>
    %410 = vector.extract_strided_slice %343 {offsets = [16, 0], sizes = [8, 32], strides = [1, 1]} : vector<32x32xf32> to vector<8x32xf32>
    %cst_187 = arith.constant dense<0.000000e+00> : vector<8x32xf32>
    %411 = tpu.matmul %409, %410, %cst_187 {dimension_numbers = #tpu.dot_dimension_numbers<[1], [0], [0], [1], [0, 0, 1, 1], [], []>} : vector<8x8xf32>, vector<8x32xf32>, vector<8x32xf32> -> vector<8x32xf32>
    %412 = arith.addf %392, %411 : vector<8x32xf32>
    %413 = vector.extract_strided_slice %349 {offsets = [0, 24], sizes = [8, 8], strides = [1, 1]} : vector<8x32xf32> to vector<8x8xf32>
    %414 = vector.extract_strided_slice %350 {offsets = [0, 24], sizes = [8, 8], strides = [1, 1]} : vector<8x32xf32> to vector<8x8xf32>
    %415 = vector.extract_strided_slice %351 {offsets = [0, 24], sizes = [8, 8], strides = [1, 1]} : vector<8x32xf32> to vector<8x8xf32>
    %cst_188 = arith.constant dense<0.000000e+00> : vector<8x8xf32>
    %416 = tpu.matmul %413, %414, %cst_188 {dimension_numbers = #tpu.dot_dimension_numbers<[1], [1], [0], [0], [0, 0, 1, 0], [], []>} : vector<8x8xf32>, vector<8x8xf32>, vector<8x8xf32> -> vector<8x8xf32>
    %cst_189 = arith.constant 0.353553385 : f32
    %417 = vector.broadcast %cst_189 : f32 to vector<8x8xf32>
    %418 = arith.mulf %416, %417 : vector<8x8xf32>
    %419 = arith.addf %418, %5 : vector<8x8xf32>
    %cst_190 = arith.constant dense<0xFF800000> : vector<8xf32>
    %420 = vector.multi_reduction <maximumf>, %419, %cst_190 [1] : vector<8x8xf32> to vector<8xf32>
    %421 = vector.shape_cast %420 : vector<8xf32> to vector<8x1xf32>
    %422 = vector.broadcast %421 : vector<8x1xf32> to vector<8x8xf32>
    %423 = arith.subf %419, %422 : vector<8x8xf32>
    %424 = math.exp %423 : vector<8x8xf32>
    %cst_191 = arith.constant dense<0.000000e+00> : vector<8xf32>
    %425 = vector.multi_reduction <add>, %424, %cst_191 [1] : vector<8x8xf32> to vector<8xf32>
    %426 = vector.shape_cast %425 : vector<8xf32> to vector<8x1xf32>
    %427 = vector.broadcast %426 : vector<8x1xf32> to vector<8x8xf32>
    %428 = arith.divf %424, %427 : vector<8x8xf32>
    %cst_192 = arith.constant dense<0.000000e+00> : vector<8x8xf32>
    %429 = tpu.matmul %428, %415, %cst_192 {dimension_numbers = #tpu.dot_dimension_numbers<[1], [0], [0], [1], [0, 0, 1, 1], [], []>} : vector<8x8xf32>, vector<8x8xf32>, vector<8x8xf32> -> vector<8x8xf32>
    %430 = vector.extract_strided_slice %343 {offsets = [24, 0], sizes = [8, 32], strides = [1, 1]} : vector<32x32xf32> to vector<8x32xf32>
    %cst_193 = arith.constant dense<0.000000e+00> : vector<8x32xf32>
    %431 = tpu.matmul %429, %430, %cst_193 {dimension_numbers = #tpu.dot_dimension_numbers<[1], [0], [0], [1], [0, 0, 1, 1], [], []>} : vector<8x8xf32>, vector<8x32xf32>, vector<8x32xf32> -> vector<8x32xf32>
    %432 = arith.addf %412, %431 : vector<8x32xf32>
    %433 = arith.addf %337, %432 : vector<8x32xf32>
    %c0_194 = arith.constant 0 : index
    %c0_195 = arith.constant 0 : index
    %c0_196 = arith.constant 0 : index
    %434 = vector.load %arg21[%c0_194, %c0_195, %c0_196] : memref<2x1x32xf32, #tpu.memory_space<vmem>>, vector<1x1x32xf32>
    %435 = vector.shape_cast %434 : vector<1x1x32xf32> to vector<1x32xf32>
    %c0_197 = arith.constant 0 : index
    %c0_198 = arith.constant 0 : index
    %c0_199 = arith.constant 0 : index
    %436 = vector.load %arg22[%c0_197, %c0_198, %c0_199] : memref<2x1x32xf32, #tpu.memory_space<vmem>>, vector<1x1x32xf32>
    %437 = vector.shape_cast %436 : vector<1x1x32xf32> to vector<1x32xf32>
    %cst_200 = arith.constant dense<0.000000e+00> : vector<8xf32>
    %438 = vector.multi_reduction <add>, %433, %cst_200 [1] : vector<8x32xf32> to vector<8xf32>
    %439 = vector.shape_cast %438 : vector<8xf32> to vector<8x1xf32>
    %cst_201 = arith.constant 3.200000e+01 : f32
    %440 = vector.broadcast %cst_201 : f32 to vector<8x1xf32>
    %441 = arith.divf %439, %440 : vector<8x1xf32>
    %442 = vector.broadcast %441 : vector<8x1xf32> to vector<8x32xf32>
    %443 = arith.subf %433, %442 : vector<8x32xf32>
    %444 = arith.mulf %443, %443 : vector<8x32xf32>
    %cst_202 = arith.constant dense<0.000000e+00> : vector<8xf32>
    %445 = vector.multi_reduction <add>, %444, %cst_202 [1] : vector<8x32xf32> to vector<8xf32>
    %446 = vector.shape_cast %445 : vector<8xf32> to vector<8x1xf32>
    %cst_203 = arith.constant 3.200000e+01 : f32
    %447 = vector.broadcast %cst_203 : f32 to vector<8x1xf32>
    %448 = arith.divf %446, %447 : vector<8x1xf32>
    %cst_204 = arith.constant 9.99999974E-6 : f32
    %449 = vector.broadcast %cst_204 : f32 to vector<8x1xf32>
    %450 = arith.addf %448, %449 : vector<8x1xf32>
    %451 = math.rsqrt %450 : vector<8x1xf32>
    %452 = vector.broadcast %451 : vector<8x1xf32> to vector<8x32xf32>
    %453 = arith.mulf %443, %452 : vector<8x32xf32>
    %454 = vector.broadcast %435 : vector<1x32xf32> to vector<8x32xf32>
    %455 = arith.mulf %453, %454 : vector<8x32xf32>
    %456 = vector.broadcast %437 : vector<1x32xf32> to vector<8x32xf32>
    %457 = arith.addf %455, %456 : vector<8x32xf32>
    %c0_205 = arith.constant 0 : index
    %c0_206 = arith.constant 0 : index
    %c0_207 = arith.constant 0 : index
    %458 = vector.load %arg23[%c0_205, %c0_206, %c0_207] : memref<2x32x32xf32, #tpu.memory_space<vmem>>, vector<1x32x32xf32>
    %459 = vector.shape_cast %458 : vector<1x32x32xf32> to vector<32x32xf32>
    %c0_208 = arith.constant 0 : index
    %c0_209 = arith.constant 0 : index
    %c0_210 = arith.constant 0 : index
    %460 = vector.load %arg24[%c0_208, %c0_209, %c0_210] : memref<2x1x32xf32, #tpu.memory_space<vmem>>, vector<1x1x32xf32>
    %461 = vector.shape_cast %460 : vector<1x1x32xf32> to vector<1x32xf32>
    %c0_211 = arith.constant 0 : index
    %c0_212 = arith.constant 0 : index
    %c0_213 = arith.constant 0 : index
    %462 = vector.load %arg25[%c0_211, %c0_212, %c0_213] : memref<2x32x64xf32, #tpu.memory_space<vmem>>, vector<1x32x64xf32>
    %463 = vector.shape_cast %462 : vector<1x32x64xf32> to vector<32x64xf32>
    %c0_214 = arith.constant 0 : index
    %c0_215 = arith.constant 0 : index
    %c0_216 = arith.constant 0 : index
    %464 = vector.load %arg26[%c0_214, %c0_215, %c0_216] : memref<2x1x64xf32, #tpu.memory_space<vmem>>, vector<1x1x64xf32>
    %465 = vector.shape_cast %464 : vector<1x1x64xf32> to vector<1x64xf32>
    %c0_217 = arith.constant 0 : index
    %c0_218 = arith.constant 0 : index
    %c0_219 = arith.constant 0 : index
    %466 = vector.load %arg27[%c0_217, %c0_218, %c0_219] : memref<2x32x32xf32, #tpu.memory_space<vmem>>, vector<1x32x32xf32>
    %467 = vector.shape_cast %466 : vector<1x32x32xf32> to vector<32x32xf32>
    %c0_220 = arith.constant 0 : index
    %c0_221 = arith.constant 0 : index
    %c0_222 = arith.constant 0 : index
    %468 = vector.load %arg28[%c0_220, %c0_221, %c0_222] : memref<2x1x32xf32, #tpu.memory_space<vmem>>, vector<1x1x32xf32>
    %469 = vector.shape_cast %468 : vector<1x1x32xf32> to vector<1x32xf32>
    %cst_223 = arith.constant dense<0.000000e+00> : vector<8x32xf32>
    %470 = tpu.matmul %457, %459, %cst_223 {dimension_numbers = #tpu.dot_dimension_numbers<[1], [0], [0], [1], [0, 0, 1, 1], [], []>} : vector<8x32xf32>, vector<32x32xf32>, vector<8x32xf32> -> vector<8x32xf32>
    %471 = vector.broadcast %461 : vector<1x32xf32> to vector<8x32xf32>
    %472 = arith.addf %470, %471 : vector<8x32xf32>
    %cst_224 = arith.constant dense<0.000000e+00> : vector<8x64xf32>
    %473 = tpu.matmul %335, %463, %cst_224 {dimension_numbers = #tpu.dot_dimension_numbers<[1], [0], [0], [1], [0, 0, 1, 1], [], []>} : vector<8x32xf32>, vector<32x64xf32>, vector<8x64xf32> -> vector<8x64xf32>
    %474 = vector.broadcast %465 : vector<1x64xf32> to vector<8x64xf32>
    %475 = arith.addf %473, %474 : vector<8x64xf32>
    %476 = vector.extract_strided_slice %475 {offsets = [0, 0], sizes = [8, 32], strides = [1, 1]} : vector<8x64xf32> to vector<8x32xf32>
    %477 = vector.extract_strided_slice %475 {offsets = [0, 32], sizes = [8, 32], strides = [1, 1]} : vector<8x64xf32> to vector<8x32xf32>
    %478 = vector.extract_strided_slice %472 {offsets = [0, 0], sizes = [8, 8], strides = [1, 1]} : vector<8x32xf32> to vector<8x8xf32>
    %479 = vector.extract_strided_slice %476 {offsets = [0, 0], sizes = [8, 8], strides = [1, 1]} : vector<8x32xf32> to vector<8x8xf32>
    %480 = vector.extract_strided_slice %477 {offsets = [0, 0], sizes = [8, 8], strides = [1, 1]} : vector<8x32xf32> to vector<8x8xf32>
    %cst_225 = arith.constant dense<0.000000e+00> : vector<8x8xf32>
    %481 = tpu.matmul %478, %479, %cst_225 {dimension_numbers = #tpu.dot_dimension_numbers<[1], [1], [0], [0], [0, 0, 1, 0], [], []>} : vector<8x8xf32>, vector<8x8xf32>, vector<8x8xf32> -> vector<8x8xf32>
    %cst_226 = arith.constant 0.353553385 : f32
    %482 = vector.broadcast %cst_226 : f32 to vector<8x8xf32>
    %483 = arith.mulf %481, %482 : vector<8x8xf32>
    %484 = vector.broadcast %3 : vector<1x8xf32> to vector<8x8xf32>
    %485 = arith.addf %483, %484 : vector<8x8xf32>
    %cst_227 = arith.constant dense<0xFF800000> : vector<8xf32>
    %486 = vector.multi_reduction <maximumf>, %485, %cst_227 [1] : vector<8x8xf32> to vector<8xf32>
    %487 = vector.shape_cast %486 : vector<8xf32> to vector<8x1xf32>
    %488 = vector.broadcast %487 : vector<8x1xf32> to vector<8x8xf32>
    %489 = arith.subf %485, %488 : vector<8x8xf32>
    %490 = math.exp %489 : vector<8x8xf32>
    %cst_228 = arith.constant dense<0.000000e+00> : vector<8xf32>
    %491 = vector.multi_reduction <add>, %490, %cst_228 [1] : vector<8x8xf32> to vector<8xf32>
    %492 = vector.shape_cast %491 : vector<8xf32> to vector<8x1xf32>
    %493 = vector.broadcast %492 : vector<8x1xf32> to vector<8x8xf32>
    %494 = arith.divf %490, %493 : vector<8x8xf32>
    %cst_229 = arith.constant dense<0.000000e+00> : vector<8x8xf32>
    %495 = tpu.matmul %494, %480, %cst_229 {dimension_numbers = #tpu.dot_dimension_numbers<[1], [0], [0], [1], [0, 0, 1, 1], [], []>} : vector<8x8xf32>, vector<8x8xf32>, vector<8x8xf32> -> vector<8x8xf32>
    %496 = vector.extract_strided_slice %467 {offsets = [0, 0], sizes = [8, 32], strides = [1, 1]} : vector<32x32xf32> to vector<8x32xf32>
    %cst_230 = arith.constant dense<0.000000e+00> : vector<8x32xf32>
    %497 = tpu.matmul %495, %496, %cst_230 {dimension_numbers = #tpu.dot_dimension_numbers<[1], [0], [0], [1], [0, 0, 1, 1], [], []>} : vector<8x8xf32>, vector<8x32xf32>, vector<8x32xf32> -> vector<8x32xf32>
    %498 = vector.broadcast %469 : vector<1x32xf32> to vector<8x32xf32>
    %499 = arith.addf %498, %497 : vector<8x32xf32>
    %500 = vector.extract_strided_slice %472 {offsets = [0, 8], sizes = [8, 8], strides = [1, 1]} : vector<8x32xf32> to vector<8x8xf32>
    %501 = vector.extract_strided_slice %476 {offsets = [0, 8], sizes = [8, 8], strides = [1, 1]} : vector<8x32xf32> to vector<8x8xf32>
    %502 = vector.extract_strided_slice %477 {offsets = [0, 8], sizes = [8, 8], strides = [1, 1]} : vector<8x32xf32> to vector<8x8xf32>
    %cst_231 = arith.constant dense<0.000000e+00> : vector<8x8xf32>
    %503 = tpu.matmul %500, %501, %cst_231 {dimension_numbers = #tpu.dot_dimension_numbers<[1], [1], [0], [0], [0, 0, 1, 0], [], []>} : vector<8x8xf32>, vector<8x8xf32>, vector<8x8xf32> -> vector<8x8xf32>
    %cst_232 = arith.constant 0.353553385 : f32
    %504 = vector.broadcast %cst_232 : f32 to vector<8x8xf32>
    %505 = arith.mulf %503, %504 : vector<8x8xf32>
    %506 = vector.broadcast %3 : vector<1x8xf32> to vector<8x8xf32>
    %507 = arith.addf %505, %506 : vector<8x8xf32>
    %cst_233 = arith.constant dense<0xFF800000> : vector<8xf32>
    %508 = vector.multi_reduction <maximumf>, %507, %cst_233 [1] : vector<8x8xf32> to vector<8xf32>
    %509 = vector.shape_cast %508 : vector<8xf32> to vector<8x1xf32>
    %510 = vector.broadcast %509 : vector<8x1xf32> to vector<8x8xf32>
    %511 = arith.subf %507, %510 : vector<8x8xf32>
    %512 = math.exp %511 : vector<8x8xf32>
    %cst_234 = arith.constant dense<0.000000e+00> : vector<8xf32>
    %513 = vector.multi_reduction <add>, %512, %cst_234 [1] : vector<8x8xf32> to vector<8xf32>
    %514 = vector.shape_cast %513 : vector<8xf32> to vector<8x1xf32>
    %515 = vector.broadcast %514 : vector<8x1xf32> to vector<8x8xf32>
    %516 = arith.divf %512, %515 : vector<8x8xf32>
    %cst_235 = arith.constant dense<0.000000e+00> : vector<8x8xf32>
    %517 = tpu.matmul %516, %502, %cst_235 {dimension_numbers = #tpu.dot_dimension_numbers<[1], [0], [0], [1], [0, 0, 1, 1], [], []>} : vector<8x8xf32>, vector<8x8xf32>, vector<8x8xf32> -> vector<8x8xf32>
    %518 = vector.extract_strided_slice %467 {offsets = [8, 0], sizes = [8, 32], strides = [1, 1]} : vector<32x32xf32> to vector<8x32xf32>
    %cst_236 = arith.constant dense<0.000000e+00> : vector<8x32xf32>
    %519 = tpu.matmul %517, %518, %cst_236 {dimension_numbers = #tpu.dot_dimension_numbers<[1], [0], [0], [1], [0, 0, 1, 1], [], []>} : vector<8x8xf32>, vector<8x32xf32>, vector<8x32xf32> -> vector<8x32xf32>
    %520 = arith.addf %499, %519 : vector<8x32xf32>
    %521 = vector.extract_strided_slice %472 {offsets = [0, 16], sizes = [8, 8], strides = [1, 1]} : vector<8x32xf32> to vector<8x8xf32>
    %522 = vector.extract_strided_slice %476 {offsets = [0, 16], sizes = [8, 8], strides = [1, 1]} : vector<8x32xf32> to vector<8x8xf32>
    %523 = vector.extract_strided_slice %477 {offsets = [0, 16], sizes = [8, 8], strides = [1, 1]} : vector<8x32xf32> to vector<8x8xf32>
    %cst_237 = arith.constant dense<0.000000e+00> : vector<8x8xf32>
    %524 = tpu.matmul %521, %522, %cst_237 {dimension_numbers = #tpu.dot_dimension_numbers<[1], [1], [0], [0], [0, 0, 1, 0], [], []>} : vector<8x8xf32>, vector<8x8xf32>, vector<8x8xf32> -> vector<8x8xf32>
    %cst_238 = arith.constant 0.353553385 : f32
    %525 = vector.broadcast %cst_238 : f32 to vector<8x8xf32>
    %526 = arith.mulf %524, %525 : vector<8x8xf32>
    %527 = vector.broadcast %3 : vector<1x8xf32> to vector<8x8xf32>
    %528 = arith.addf %526, %527 : vector<8x8xf32>
    %cst_239 = arith.constant dense<0xFF800000> : vector<8xf32>
    %529 = vector.multi_reduction <maximumf>, %528, %cst_239 [1] : vector<8x8xf32> to vector<8xf32>
    %530 = vector.shape_cast %529 : vector<8xf32> to vector<8x1xf32>
    %531 = vector.broadcast %530 : vector<8x1xf32> to vector<8x8xf32>
    %532 = arith.subf %528, %531 : vector<8x8xf32>
    %533 = math.exp %532 : vector<8x8xf32>
    %cst_240 = arith.constant dense<0.000000e+00> : vector<8xf32>
    %534 = vector.multi_reduction <add>, %533, %cst_240 [1] : vector<8x8xf32> to vector<8xf32>
    %535 = vector.shape_cast %534 : vector<8xf32> to vector<8x1xf32>
    %536 = vector.broadcast %535 : vector<8x1xf32> to vector<8x8xf32>
    %537 = arith.divf %533, %536 : vector<8x8xf32>
    %cst_241 = arith.constant dense<0.000000e+00> : vector<8x8xf32>
    %538 = tpu.matmul %537, %523, %cst_241 {dimension_numbers = #tpu.dot_dimension_numbers<[1], [0], [0], [1], [0, 0, 1, 1], [], []>} : vector<8x8xf32>, vector<8x8xf32>, vector<8x8xf32> -> vector<8x8xf32>
    %539 = vector.extract_strided_slice %467 {offsets = [16, 0], sizes = [8, 32], strides = [1, 1]} : vector<32x32xf32> to vector<8x32xf32>
    %cst_242 = arith.constant dense<0.000000e+00> : vector<8x32xf32>
    %540 = tpu.matmul %538, %539, %cst_242 {dimension_numbers = #tpu.dot_dimension_numbers<[1], [0], [0], [1], [0, 0, 1, 1], [], []>} : vector<8x8xf32>, vector<8x32xf32>, vector<8x32xf32> -> vector<8x32xf32>
    %541 = arith.addf %520, %540 : vector<8x32xf32>
    %542 = vector.extract_strided_slice %472 {offsets = [0, 24], sizes = [8, 8], strides = [1, 1]} : vector<8x32xf32> to vector<8x8xf32>
    %543 = vector.extract_strided_slice %476 {offsets = [0, 24], sizes = [8, 8], strides = [1, 1]} : vector<8x32xf32> to vector<8x8xf32>
    %544 = vector.extract_strided_slice %477 {offsets = [0, 24], sizes = [8, 8], strides = [1, 1]} : vector<8x32xf32> to vector<8x8xf32>
    %cst_243 = arith.constant dense<0.000000e+00> : vector<8x8xf32>
    %545 = tpu.matmul %542, %543, %cst_243 {dimension_numbers = #tpu.dot_dimension_numbers<[1], [1], [0], [0], [0, 0, 1, 0], [], []>} : vector<8x8xf32>, vector<8x8xf32>, vector<8x8xf32> -> vector<8x8xf32>
    %cst_244 = arith.constant 0.353553385 : f32
    %546 = vector.broadcast %cst_244 : f32 to vector<8x8xf32>
    %547 = arith.mulf %545, %546 : vector<8x8xf32>
    %548 = vector.broadcast %3 : vector<1x8xf32> to vector<8x8xf32>
    %549 = arith.addf %547, %548 : vector<8x8xf32>
    %cst_245 = arith.constant dense<0xFF800000> : vector<8xf32>
    %550 = vector.multi_reduction <maximumf>, %549, %cst_245 [1] : vector<8x8xf32> to vector<8xf32>
    %551 = vector.shape_cast %550 : vector<8xf32> to vector<8x1xf32>
    %552 = vector.broadcast %551 : vector<8x1xf32> to vector<8x8xf32>
    %553 = arith.subf %549, %552 : vector<8x8xf32>
    %554 = math.exp %553 : vector<8x8xf32>
    %cst_246 = arith.constant dense<0.000000e+00> : vector<8xf32>
    %555 = vector.multi_reduction <add>, %554, %cst_246 [1] : vector<8x8xf32> to vector<8xf32>
    %556 = vector.shape_cast %555 : vector<8xf32> to vector<8x1xf32>
    %557 = vector.broadcast %556 : vector<8x1xf32> to vector<8x8xf32>
    %558 = arith.divf %554, %557 : vector<8x8xf32>
    %cst_247 = arith.constant dense<0.000000e+00> : vector<8x8xf32>
    %559 = tpu.matmul %558, %544, %cst_247 {dimension_numbers = #tpu.dot_dimension_numbers<[1], [0], [0], [1], [0, 0, 1, 1], [], []>} : vector<8x8xf32>, vector<8x8xf32>, vector<8x8xf32> -> vector<8x8xf32>
    %560 = vector.extract_strided_slice %467 {offsets = [24, 0], sizes = [8, 32], strides = [1, 1]} : vector<32x32xf32> to vector<8x32xf32>
    %cst_248 = arith.constant dense<0.000000e+00> : vector<8x32xf32>
    %561 = tpu.matmul %559, %560, %cst_248 {dimension_numbers = #tpu.dot_dimension_numbers<[1], [0], [0], [1], [0, 0, 1, 1], [], []>} : vector<8x8xf32>, vector<8x32xf32>, vector<8x32xf32> -> vector<8x32xf32>
    %562 = arith.addf %541, %561 : vector<8x32xf32>
    %563 = arith.addf %457, %562 : vector<8x32xf32>
    %c0_249 = arith.constant 0 : index
    %c0_250 = arith.constant 0 : index
    %c0_251 = arith.constant 0 : index
    %564 = vector.load %arg29[%c0_249, %c0_250, %c0_251] : memref<2x1x32xf32, #tpu.memory_space<vmem>>, vector<1x1x32xf32>
    %565 = vector.shape_cast %564 : vector<1x1x32xf32> to vector<1x32xf32>
    %c0_252 = arith.constant 0 : index
    %c0_253 = arith.constant 0 : index
    %c0_254 = arith.constant 0 : index
    %566 = vector.load %arg30[%c0_252, %c0_253, %c0_254] : memref<2x1x32xf32, #tpu.memory_space<vmem>>, vector<1x1x32xf32>
    %567 = vector.shape_cast %566 : vector<1x1x32xf32> to vector<1x32xf32>
    %cst_255 = arith.constant dense<0.000000e+00> : vector<8xf32>
    %568 = vector.multi_reduction <add>, %563, %cst_255 [1] : vector<8x32xf32> to vector<8xf32>
    %569 = vector.shape_cast %568 : vector<8xf32> to vector<8x1xf32>
    %cst_256 = arith.constant 3.200000e+01 : f32
    %570 = vector.broadcast %cst_256 : f32 to vector<8x1xf32>
    %571 = arith.divf %569, %570 : vector<8x1xf32>
    %572 = vector.broadcast %571 : vector<8x1xf32> to vector<8x32xf32>
    %573 = arith.subf %563, %572 : vector<8x32xf32>
    %574 = arith.mulf %573, %573 : vector<8x32xf32>
    %cst_257 = arith.constant dense<0.000000e+00> : vector<8xf32>
    %575 = vector.multi_reduction <add>, %574, %cst_257 [1] : vector<8x32xf32> to vector<8xf32>
    %576 = vector.shape_cast %575 : vector<8xf32> to vector<8x1xf32>
    %cst_258 = arith.constant 3.200000e+01 : f32
    %577 = vector.broadcast %cst_258 : f32 to vector<8x1xf32>
    %578 = arith.divf %576, %577 : vector<8x1xf32>
    %cst_259 = arith.constant 9.99999974E-6 : f32
    %579 = vector.broadcast %cst_259 : f32 to vector<8x1xf32>
    %580 = arith.addf %578, %579 : vector<8x1xf32>
    %581 = math.rsqrt %580 : vector<8x1xf32>
    %582 = vector.broadcast %581 : vector<8x1xf32> to vector<8x32xf32>
    %583 = arith.mulf %573, %582 : vector<8x32xf32>
    %584 = vector.broadcast %565 : vector<1x32xf32> to vector<8x32xf32>
    %585 = arith.mulf %583, %584 : vector<8x32xf32>
    %586 = vector.broadcast %567 : vector<1x32xf32> to vector<8x32xf32>
    %587 = arith.addf %585, %586 : vector<8x32xf32>
    %c0_260 = arith.constant 0 : index
    %c0_261 = arith.constant 0 : index
    %c0_262 = arith.constant 0 : index
    %588 = vector.load %arg31[%c0_260, %c0_261, %c0_262] : memref<2x32x64xf32, #tpu.memory_space<vmem>>, vector<1x32x64xf32>
    %589 = vector.shape_cast %588 : vector<1x32x64xf32> to vector<32x64xf32>
    %c0_263 = arith.constant 0 : index
    %c0_264 = arith.constant 0 : index
    %c0_265 = arith.constant 0 : index
    %590 = vector.load %arg32[%c0_263, %c0_264, %c0_265] : memref<2x1x64xf32, #tpu.memory_space<vmem>>, vector<1x1x64xf32>
    %591 = vector.shape_cast %590 : vector<1x1x64xf32> to vector<1x64xf32>
    %c0_266 = arith.constant 0 : index
    %c0_267 = arith.constant 0 : index
    %c0_268 = arith.constant 0 : index
    %592 = vector.load %arg33[%c0_266, %c0_267, %c0_268] : memref<2x64x32xf32, #tpu.memory_space<vmem>>, vector<1x64x32xf32>
    %593 = vector.shape_cast %592 : vector<1x64x32xf32> to vector<64x32xf32>
    %c0_269 = arith.constant 0 : index
    %c0_270 = arith.constant 0 : index
    %c0_271 = arith.constant 0 : index
    %594 = vector.load %arg34[%c0_269, %c0_270, %c0_271] : memref<2x1x32xf32, #tpu.memory_space<vmem>>, vector<1x1x32xf32>
    %595 = vector.shape_cast %594 : vector<1x1x32xf32> to vector<1x32xf32>
    %cst_272 = arith.constant dense<0.000000e+00> : vector<8x64xf32>
    %596 = tpu.matmul %587, %589, %cst_272 {dimension_numbers = #tpu.dot_dimension_numbers<[1], [0], [0], [1], [0, 0, 1, 1], [], []>} : vector<8x32xf32>, vector<32x64xf32>, vector<8x64xf32> -> vector<8x64xf32>
    %597 = vector.broadcast %591 : vector<1x64xf32> to vector<8x64xf32>
    %598 = arith.addf %596, %597 : vector<8x64xf32>
    %cst_273 = arith.constant 0.000000e+00 : f32
    %599 = vector.broadcast %cst_273 : f32 to vector<8x64xf32>
    %600 = arith.maximumf %598, %599 : vector<8x64xf32>
    %cst_274 = arith.constant dense<0.000000e+00> : vector<8x32xf32>
    %601 = tpu.matmul %600, %593, %cst_274 {dimension_numbers = #tpu.dot_dimension_numbers<[1], [0], [0], [1], [0, 0, 1, 1], [], []>} : vector<8x64xf32>, vector<64x32xf32>, vector<8x32xf32> -> vector<8x32xf32>
    %602 = vector.broadcast %595 : vector<1x32xf32> to vector<8x32xf32>
    %603 = arith.addf %601, %602 : vector<8x32xf32>
    %604 = arith.addf %587, %603 : vector<8x32xf32>
    %c0_275 = arith.constant 0 : index
    %c0_276 = arith.constant 0 : index
    %c0_277 = arith.constant 0 : index
    %605 = vector.load %arg35[%c0_275, %c0_276, %c0_277] : memref<2x1x32xf32, #tpu.memory_space<vmem>>, vector<1x1x32xf32>
    %606 = vector.shape_cast %605 : vector<1x1x32xf32> to vector<1x32xf32>
    %c0_278 = arith.constant 0 : index
    %c0_279 = arith.constant 0 : index
    %c0_280 = arith.constant 0 : index
    %607 = vector.load %arg36[%c0_278, %c0_279, %c0_280] : memref<2x1x32xf32, #tpu.memory_space<vmem>>, vector<1x1x32xf32>
    %608 = vector.shape_cast %607 : vector<1x1x32xf32> to vector<1x32xf32>
    %cst_281 = arith.constant dense<0.000000e+00> : vector<8xf32>
    %609 = vector.multi_reduction <add>, %604, %cst_281 [1] : vector<8x32xf32> to vector<8xf32>
    %610 = vector.shape_cast %609 : vector<8xf32> to vector<8x1xf32>
    %cst_282 = arith.constant 3.200000e+01 : f32
    %611 = vector.broadcast %cst_282 : f32 to vector<8x1xf32>
    %612 = arith.divf %610, %611 : vector<8x1xf32>
    %613 = vector.broadcast %612 : vector<8x1xf32> to vector<8x32xf32>
    %614 = arith.subf %604, %613 : vector<8x32xf32>
    %615 = arith.mulf %614, %614 : vector<8x32xf32>
    %cst_283 = arith.constant dense<0.000000e+00> : vector<8xf32>
    %616 = vector.multi_reduction <add>, %615, %cst_283 [1] : vector<8x32xf32> to vector<8xf32>
    %617 = vector.shape_cast %616 : vector<8xf32> to vector<8x1xf32>
    %cst_284 = arith.constant 3.200000e+01 : f32
    %618 = vector.broadcast %cst_284 : f32 to vector<8x1xf32>
    %619 = arith.divf %617, %618 : vector<8x1xf32>
    %cst_285 = arith.constant 9.99999974E-6 : f32
    %620 = vector.broadcast %cst_285 : f32 to vector<8x1xf32>
    %621 = arith.addf %619, %620 : vector<8x1xf32>
    %622 = math.rsqrt %621 : vector<8x1xf32>
    %623 = vector.broadcast %622 : vector<8x1xf32> to vector<8x32xf32>
    %624 = arith.mulf %614, %623 : vector<8x32xf32>
    %625 = vector.broadcast %606 : vector<1x32xf32> to vector<8x32xf32>
    %626 = arith.mulf %624, %625 : vector<8x32xf32>
    %627 = vector.broadcast %608 : vector<1x32xf32> to vector<8x32xf32>
    %628 = arith.addf %626, %627 : vector<8x32xf32>
    %c1_286 = arith.constant 1 : index
    %c0_287 = arith.constant 0 : index
    %c0_288 = arith.constant 0 : index
    %629 = vector.load %arg17[%c1_286, %c0_287, %c0_288] : memref<2x32x96xf32, #tpu.memory_space<vmem>>, vector<1x32x96xf32>
    %630 = vector.shape_cast %629 : vector<1x32x96xf32> to vector<32x96xf32>
    %c1_289 = arith.constant 1 : index
    %c0_290 = arith.constant 0 : index
    %c0_291 = arith.constant 0 : index
    %631 = vector.load %arg18[%c1_289, %c0_290, %c0_291] : memref<2x1x96xf32, #tpu.memory_space<vmem>>, vector<1x1x96xf32>
    %632 = vector.shape_cast %631 : vector<1x1x96xf32> to vector<1x96xf32>
    %c1_292 = arith.constant 1 : index
    %c0_293 = arith.constant 0 : index
    %c0_294 = arith.constant 0 : index
    %633 = vector.load %arg19[%c1_292, %c0_293, %c0_294] : memref<2x32x32xf32, #tpu.memory_space<vmem>>, vector<1x32x32xf32>
    %634 = vector.shape_cast %633 : vector<1x32x32xf32> to vector<32x32xf32>
    %c1_295 = arith.constant 1 : index
    %c0_296 = arith.constant 0 : index
    %c0_297 = arith.constant 0 : index
    %635 = vector.load %arg20[%c1_295, %c0_296, %c0_297] : memref<2x1x32xf32, #tpu.memory_space<vmem>>, vector<1x1x32xf32>
    %636 = vector.shape_cast %635 : vector<1x1x32xf32> to vector<1x32xf32>
    %cst_298 = arith.constant dense<0.000000e+00> : vector<8x96xf32>
    %637 = tpu.matmul %628, %630, %cst_298 {dimension_numbers = #tpu.dot_dimension_numbers<[1], [0], [0], [1], [0, 0, 1, 1], [], []>} : vector<8x32xf32>, vector<32x96xf32>, vector<8x96xf32> -> vector<8x96xf32>
    %638 = vector.broadcast %632 : vector<1x96xf32> to vector<8x96xf32>
    %639 = arith.addf %637, %638 : vector<8x96xf32>
    %640 = vector.extract_strided_slice %639 {offsets = [0, 0], sizes = [8, 32], strides = [1, 1]} : vector<8x96xf32> to vector<8x32xf32>
    %641 = vector.extract_strided_slice %639 {offsets = [0, 32], sizes = [8, 32], strides = [1, 1]} : vector<8x96xf32> to vector<8x32xf32>
    %642 = vector.extract_strided_slice %639 {offsets = [0, 64], sizes = [8, 32], strides = [1, 1]} : vector<8x96xf32> to vector<8x32xf32>
    %643 = vector.extract_strided_slice %640 {offsets = [0, 0], sizes = [8, 8], strides = [1, 1]} : vector<8x32xf32> to vector<8x8xf32>
    %644 = vector.extract_strided_slice %641 {offsets = [0, 0], sizes = [8, 8], strides = [1, 1]} : vector<8x32xf32> to vector<8x8xf32>
    %645 = vector.extract_strided_slice %642 {offsets = [0, 0], sizes = [8, 8], strides = [1, 1]} : vector<8x32xf32> to vector<8x8xf32>
    %cst_299 = arith.constant dense<0.000000e+00> : vector<8x8xf32>
    %646 = tpu.matmul %643, %644, %cst_299 {dimension_numbers = #tpu.dot_dimension_numbers<[1], [1], [0], [0], [0, 0, 1, 0], [], []>} : vector<8x8xf32>, vector<8x8xf32>, vector<8x8xf32> -> vector<8x8xf32>
    %cst_300 = arith.constant 0.353553385 : f32
    %647 = vector.broadcast %cst_300 : f32 to vector<8x8xf32>
    %648 = arith.mulf %646, %647 : vector<8x8xf32>
    %649 = arith.addf %648, %5 : vector<8x8xf32>
    %cst_301 = arith.constant dense<0xFF800000> : vector<8xf32>
    %650 = vector.multi_reduction <maximumf>, %649, %cst_301 [1] : vector<8x8xf32> to vector<8xf32>
    %651 = vector.shape_cast %650 : vector<8xf32> to vector<8x1xf32>
    %652 = vector.broadcast %651 : vector<8x1xf32> to vector<8x8xf32>
    %653 = arith.subf %649, %652 : vector<8x8xf32>
    %654 = math.exp %653 : vector<8x8xf32>
    %cst_302 = arith.constant dense<0.000000e+00> : vector<8xf32>
    %655 = vector.multi_reduction <add>, %654, %cst_302 [1] : vector<8x8xf32> to vector<8xf32>
    %656 = vector.shape_cast %655 : vector<8xf32> to vector<8x1xf32>
    %657 = vector.broadcast %656 : vector<8x1xf32> to vector<8x8xf32>
    %658 = arith.divf %654, %657 : vector<8x8xf32>
    %cst_303 = arith.constant dense<0.000000e+00> : vector<8x8xf32>
    %659 = tpu.matmul %658, %645, %cst_303 {dimension_numbers = #tpu.dot_dimension_numbers<[1], [0], [0], [1], [0, 0, 1, 1], [], []>} : vector<8x8xf32>, vector<8x8xf32>, vector<8x8xf32> -> vector<8x8xf32>
    %660 = vector.extract_strided_slice %634 {offsets = [0, 0], sizes = [8, 32], strides = [1, 1]} : vector<32x32xf32> to vector<8x32xf32>
    %cst_304 = arith.constant dense<0.000000e+00> : vector<8x32xf32>
    %661 = tpu.matmul %659, %660, %cst_304 {dimension_numbers = #tpu.dot_dimension_numbers<[1], [0], [0], [1], [0, 0, 1, 1], [], []>} : vector<8x8xf32>, vector<8x32xf32>, vector<8x32xf32> -> vector<8x32xf32>
    %662 = vector.broadcast %636 : vector<1x32xf32> to vector<8x32xf32>
    %663 = arith.addf %662, %661 : vector<8x32xf32>
    %664 = vector.extract_strided_slice %640 {offsets = [0, 8], sizes = [8, 8], strides = [1, 1]} : vector<8x32xf32> to vector<8x8xf32>
    %665 = vector.extract_strided_slice %641 {offsets = [0, 8], sizes = [8, 8], strides = [1, 1]} : vector<8x32xf32> to vector<8x8xf32>
    %666 = vector.extract_strided_slice %642 {offsets = [0, 8], sizes = [8, 8], strides = [1, 1]} : vector<8x32xf32> to vector<8x8xf32>
    %cst_305 = arith.constant dense<0.000000e+00> : vector<8x8xf32>
    %667 = tpu.matmul %664, %665, %cst_305 {dimension_numbers = #tpu.dot_dimension_numbers<[1], [1], [0], [0], [0, 0, 1, 0], [], []>} : vector<8x8xf32>, vector<8x8xf32>, vector<8x8xf32> -> vector<8x8xf32>
    %cst_306 = arith.constant 0.353553385 : f32
    %668 = vector.broadcast %cst_306 : f32 to vector<8x8xf32>
    %669 = arith.mulf %667, %668 : vector<8x8xf32>
    %670 = arith.addf %669, %5 : vector<8x8xf32>
    %cst_307 = arith.constant dense<0xFF800000> : vector<8xf32>
    %671 = vector.multi_reduction <maximumf>, %670, %cst_307 [1] : vector<8x8xf32> to vector<8xf32>
    %672 = vector.shape_cast %671 : vector<8xf32> to vector<8x1xf32>
    %673 = vector.broadcast %672 : vector<8x1xf32> to vector<8x8xf32>
    %674 = arith.subf %670, %673 : vector<8x8xf32>
    %675 = math.exp %674 : vector<8x8xf32>
    %cst_308 = arith.constant dense<0.000000e+00> : vector<8xf32>
    %676 = vector.multi_reduction <add>, %675, %cst_308 [1] : vector<8x8xf32> to vector<8xf32>
    %677 = vector.shape_cast %676 : vector<8xf32> to vector<8x1xf32>
    %678 = vector.broadcast %677 : vector<8x1xf32> to vector<8x8xf32>
    %679 = arith.divf %675, %678 : vector<8x8xf32>
    %cst_309 = arith.constant dense<0.000000e+00> : vector<8x8xf32>
    %680 = tpu.matmul %679, %666, %cst_309 {dimension_numbers = #tpu.dot_dimension_numbers<[1], [0], [0], [1], [0, 0, 1, 1], [], []>} : vector<8x8xf32>, vector<8x8xf32>, vector<8x8xf32> -> vector<8x8xf32>
    %681 = vector.extract_strided_slice %634 {offsets = [8, 0], sizes = [8, 32], strides = [1, 1]} : vector<32x32xf32> to vector<8x32xf32>
    %cst_310 = arith.constant dense<0.000000e+00> : vector<8x32xf32>
    %682 = tpu.matmul %680, %681, %cst_310 {dimension_numbers = #tpu.dot_dimension_numbers<[1], [0], [0], [1], [0, 0, 1, 1], [], []>} : vector<8x8xf32>, vector<8x32xf32>, vector<8x32xf32> -> vector<8x32xf32>
    %683 = arith.addf %663, %682 : vector<8x32xf32>
    %684 = vector.extract_strided_slice %640 {offsets = [0, 16], sizes = [8, 8], strides = [1, 1]} : vector<8x32xf32> to vector<8x8xf32>
    %685 = vector.extract_strided_slice %641 {offsets = [0, 16], sizes = [8, 8], strides = [1, 1]} : vector<8x32xf32> to vector<8x8xf32>
    %686 = vector.extract_strided_slice %642 {offsets = [0, 16], sizes = [8, 8], strides = [1, 1]} : vector<8x32xf32> to vector<8x8xf32>
    %cst_311 = arith.constant dense<0.000000e+00> : vector<8x8xf32>
    %687 = tpu.matmul %684, %685, %cst_311 {dimension_numbers = #tpu.dot_dimension_numbers<[1], [1], [0], [0], [0, 0, 1, 0], [], []>} : vector<8x8xf32>, vector<8x8xf32>, vector<8x8xf32> -> vector<8x8xf32>
    %cst_312 = arith.constant 0.353553385 : f32
    %688 = vector.broadcast %cst_312 : f32 to vector<8x8xf32>
    %689 = arith.mulf %687, %688 : vector<8x8xf32>
    %690 = arith.addf %689, %5 : vector<8x8xf32>
    %cst_313 = arith.constant dense<0xFF800000> : vector<8xf32>
    %691 = vector.multi_reduction <maximumf>, %690, %cst_313 [1] : vector<8x8xf32> to vector<8xf32>
    %692 = vector.shape_cast %691 : vector<8xf32> to vector<8x1xf32>
    %693 = vector.broadcast %692 : vector<8x1xf32> to vector<8x8xf32>
    %694 = arith.subf %690, %693 : vector<8x8xf32>
    %695 = math.exp %694 : vector<8x8xf32>
    %cst_314 = arith.constant dense<0.000000e+00> : vector<8xf32>
    %696 = vector.multi_reduction <add>, %695, %cst_314 [1] : vector<8x8xf32> to vector<8xf32>
    %697 = vector.shape_cast %696 : vector<8xf32> to vector<8x1xf32>
    %698 = vector.broadcast %697 : vector<8x1xf32> to vector<8x8xf32>
    %699 = arith.divf %695, %698 : vector<8x8xf32>
    %cst_315 = arith.constant dense<0.000000e+00> : vector<8x8xf32>
    %700 = tpu.matmul %699, %686, %cst_315 {dimension_numbers = #tpu.dot_dimension_numbers<[1], [0], [0], [1], [0, 0, 1, 1], [], []>} : vector<8x8xf32>, vector<8x8xf32>, vector<8x8xf32> -> vector<8x8xf32>
    %701 = vector.extract_strided_slice %634 {offsets = [16, 0], sizes = [8, 32], strides = [1, 1]} : vector<32x32xf32> to vector<8x32xf32>
    %cst_316 = arith.constant dense<0.000000e+00> : vector<8x32xf32>
    %702 = tpu.matmul %700, %701, %cst_316 {dimension_numbers = #tpu.dot_dimension_numbers<[1], [0], [0], [1], [0, 0, 1, 1], [], []>} : vector<8x8xf32>, vector<8x32xf32>, vector<8x32xf32> -> vector<8x32xf32>
    %703 = arith.addf %683, %702 : vector<8x32xf32>
    %704 = vector.extract_strided_slice %640 {offsets = [0, 24], sizes = [8, 8], strides = [1, 1]} : vector<8x32xf32> to vector<8x8xf32>
    %705 = vector.extract_strided_slice %641 {offsets = [0, 24], sizes = [8, 8], strides = [1, 1]} : vector<8x32xf32> to vector<8x8xf32>
    %706 = vector.extract_strided_slice %642 {offsets = [0, 24], sizes = [8, 8], strides = [1, 1]} : vector<8x32xf32> to vector<8x8xf32>
    %cst_317 = arith.constant dense<0.000000e+00> : vector<8x8xf32>
    %707 = tpu.matmul %704, %705, %cst_317 {dimension_numbers = #tpu.dot_dimension_numbers<[1], [1], [0], [0], [0, 0, 1, 0], [], []>} : vector<8x8xf32>, vector<8x8xf32>, vector<8x8xf32> -> vector<8x8xf32>
    %cst_318 = arith.constant 0.353553385 : f32
    %708 = vector.broadcast %cst_318 : f32 to vector<8x8xf32>
    %709 = arith.mulf %707, %708 : vector<8x8xf32>
    %710 = arith.addf %709, %5 : vector<8x8xf32>
    %cst_319 = arith.constant dense<0xFF800000> : vector<8xf32>
    %711 = vector.multi_reduction <maximumf>, %710, %cst_319 [1] : vector<8x8xf32> to vector<8xf32>
    %712 = vector.shape_cast %711 : vector<8xf32> to vector<8x1xf32>
    %713 = vector.broadcast %712 : vector<8x1xf32> to vector<8x8xf32>
    %714 = arith.subf %710, %713 : vector<8x8xf32>
    %715 = math.exp %714 : vector<8x8xf32>
    %cst_320 = arith.constant dense<0.000000e+00> : vector<8xf32>
    %716 = vector.multi_reduction <add>, %715, %cst_320 [1] : vector<8x8xf32> to vector<8xf32>
    %717 = vector.shape_cast %716 : vector<8xf32> to vector<8x1xf32>
    %718 = vector.broadcast %717 : vector<8x1xf32> to vector<8x8xf32>
    %719 = arith.divf %715, %718 : vector<8x8xf32>
    %cst_321 = arith.constant dense<0.000000e+00> : vector<8x8xf32>
    %720 = tpu.matmul %719, %706, %cst_321 {dimension_numbers = #tpu.dot_dimension_numbers<[1], [0], [0], [1], [0, 0, 1, 1], [], []>} : vector<8x8xf32>, vector<8x8xf32>, vector<8x8xf32> -> vector<8x8xf32>
    %721 = vector.extract_strided_slice %634 {offsets = [24, 0], sizes = [8, 32], strides = [1, 1]} : vector<32x32xf32> to vector<8x32xf32>
    %cst_322 = arith.constant dense<0.000000e+00> : vector<8x32xf32>
    %722 = tpu.matmul %720, %721, %cst_322 {dimension_numbers = #tpu.dot_dimension_numbers<[1], [0], [0], [1], [0, 0, 1, 1], [], []>} : vector<8x8xf32>, vector<8x32xf32>, vector<8x32xf32> -> vector<8x32xf32>
    %723 = arith.addf %703, %722 : vector<8x32xf32>
    %724 = arith.addf %628, %723 : vector<8x32xf32>
    %c1_323 = arith.constant 1 : index
    %c0_324 = arith.constant 0 : index
    %c0_325 = arith.constant 0 : index
    %725 = vector.load %arg21[%c1_323, %c0_324, %c0_325] : memref<2x1x32xf32, #tpu.memory_space<vmem>>, vector<1x1x32xf32>
    %726 = vector.shape_cast %725 : vector<1x1x32xf32> to vector<1x32xf32>
    %c1_326 = arith.constant 1 : index
    %c0_327 = arith.constant 0 : index
    %c0_328 = arith.constant 0 : index
    %727 = vector.load %arg22[%c1_326, %c0_327, %c0_328] : memref<2x1x32xf32, #tpu.memory_space<vmem>>, vector<1x1x32xf32>
    %728 = vector.shape_cast %727 : vector<1x1x32xf32> to vector<1x32xf32>
    %cst_329 = arith.constant dense<0.000000e+00> : vector<8xf32>
    %729 = vector.multi_reduction <add>, %724, %cst_329 [1] : vector<8x32xf32> to vector<8xf32>
    %730 = vector.shape_cast %729 : vector<8xf32> to vector<8x1xf32>
    %cst_330 = arith.constant 3.200000e+01 : f32
    %731 = vector.broadcast %cst_330 : f32 to vector<8x1xf32>
    %732 = arith.divf %730, %731 : vector<8x1xf32>
    %733 = vector.broadcast %732 : vector<8x1xf32> to vector<8x32xf32>
    %734 = arith.subf %724, %733 : vector<8x32xf32>
    %735 = arith.mulf %734, %734 : vector<8x32xf32>
    %cst_331 = arith.constant dense<0.000000e+00> : vector<8xf32>
    %736 = vector.multi_reduction <add>, %735, %cst_331 [1] : vector<8x32xf32> to vector<8xf32>
    %737 = vector.shape_cast %736 : vector<8xf32> to vector<8x1xf32>
    %cst_332 = arith.constant 3.200000e+01 : f32
    %738 = vector.broadcast %cst_332 : f32 to vector<8x1xf32>
    %739 = arith.divf %737, %738 : vector<8x1xf32>
    %cst_333 = arith.constant 9.99999974E-6 : f32
    %740 = vector.broadcast %cst_333 : f32 to vector<8x1xf32>
    %741 = arith.addf %739, %740 : vector<8x1xf32>
    %742 = math.rsqrt %741 : vector<8x1xf32>
    %743 = vector.broadcast %742 : vector<8x1xf32> to vector<8x32xf32>
    %744 = arith.mulf %734, %743 : vector<8x32xf32>
    %745 = vector.broadcast %726 : vector<1x32xf32> to vector<8x32xf32>
    %746 = arith.mulf %744, %745 : vector<8x32xf32>
    %747 = vector.broadcast %728 : vector<1x32xf32> to vector<8x32xf32>
    %748 = arith.addf %746, %747 : vector<8x32xf32>
    %c1_334 = arith.constant 1 : index
    %c0_335 = arith.constant 0 : index
    %c0_336 = arith.constant 0 : index
    %749 = vector.load %arg23[%c1_334, %c0_335, %c0_336] : memref<2x32x32xf32, #tpu.memory_space<vmem>>, vector<1x32x32xf32>
    %750 = vector.shape_cast %749 : vector<1x32x32xf32> to vector<32x32xf32>
    %c1_337 = arith.constant 1 : index
    %c0_338 = arith.constant 0 : index
    %c0_339 = arith.constant 0 : index
    %751 = vector.load %arg24[%c1_337, %c0_338, %c0_339] : memref<2x1x32xf32, #tpu.memory_space<vmem>>, vector<1x1x32xf32>
    %752 = vector.shape_cast %751 : vector<1x1x32xf32> to vector<1x32xf32>
    %c1_340 = arith.constant 1 : index
    %c0_341 = arith.constant 0 : index
    %c0_342 = arith.constant 0 : index
    %753 = vector.load %arg25[%c1_340, %c0_341, %c0_342] : memref<2x32x64xf32, #tpu.memory_space<vmem>>, vector<1x32x64xf32>
    %754 = vector.shape_cast %753 : vector<1x32x64xf32> to vector<32x64xf32>
    %c1_343 = arith.constant 1 : index
    %c0_344 = arith.constant 0 : index
    %c0_345 = arith.constant 0 : index
    %755 = vector.load %arg26[%c1_343, %c0_344, %c0_345] : memref<2x1x64xf32, #tpu.memory_space<vmem>>, vector<1x1x64xf32>
    %756 = vector.shape_cast %755 : vector<1x1x64xf32> to vector<1x64xf32>
    %c1_346 = arith.constant 1 : index
    %c0_347 = arith.constant 0 : index
    %c0_348 = arith.constant 0 : index
    %757 = vector.load %arg27[%c1_346, %c0_347, %c0_348] : memref<2x32x32xf32, #tpu.memory_space<vmem>>, vector<1x32x32xf32>
    %758 = vector.shape_cast %757 : vector<1x32x32xf32> to vector<32x32xf32>
    %c1_349 = arith.constant 1 : index
    %c0_350 = arith.constant 0 : index
    %c0_351 = arith.constant 0 : index
    %759 = vector.load %arg28[%c1_349, %c0_350, %c0_351] : memref<2x1x32xf32, #tpu.memory_space<vmem>>, vector<1x1x32xf32>
    %760 = vector.shape_cast %759 : vector<1x1x32xf32> to vector<1x32xf32>
    %cst_352 = arith.constant dense<0.000000e+00> : vector<8x32xf32>
    %761 = tpu.matmul %748, %750, %cst_352 {dimension_numbers = #tpu.dot_dimension_numbers<[1], [0], [0], [1], [0, 0, 1, 1], [], []>} : vector<8x32xf32>, vector<32x32xf32>, vector<8x32xf32> -> vector<8x32xf32>
    %762 = vector.broadcast %752 : vector<1x32xf32> to vector<8x32xf32>
    %763 = arith.addf %761, %762 : vector<8x32xf32>
    %cst_353 = arith.constant dense<0.000000e+00> : vector<8x64xf32>
    %764 = tpu.matmul %335, %754, %cst_353 {dimension_numbers = #tpu.dot_dimension_numbers<[1], [0], [0], [1], [0, 0, 1, 1], [], []>} : vector<8x32xf32>, vector<32x64xf32>, vector<8x64xf32> -> vector<8x64xf32>
    %765 = vector.broadcast %756 : vector<1x64xf32> to vector<8x64xf32>
    %766 = arith.addf %764, %765 : vector<8x64xf32>
    %767 = vector.extract_strided_slice %766 {offsets = [0, 0], sizes = [8, 32], strides = [1, 1]} : vector<8x64xf32> to vector<8x32xf32>
    %768 = vector.extract_strided_slice %766 {offsets = [0, 32], sizes = [8, 32], strides = [1, 1]} : vector<8x64xf32> to vector<8x32xf32>
    %769 = vector.extract_strided_slice %763 {offsets = [0, 0], sizes = [8, 8], strides = [1, 1]} : vector<8x32xf32> to vector<8x8xf32>
    %770 = vector.extract_strided_slice %767 {offsets = [0, 0], sizes = [8, 8], strides = [1, 1]} : vector<8x32xf32> to vector<8x8xf32>
    %771 = vector.extract_strided_slice %768 {offsets = [0, 0], sizes = [8, 8], strides = [1, 1]} : vector<8x32xf32> to vector<8x8xf32>
    %cst_354 = arith.constant dense<0.000000e+00> : vector<8x8xf32>
    %772 = tpu.matmul %769, %770, %cst_354 {dimension_numbers = #tpu.dot_dimension_numbers<[1], [1], [0], [0], [0, 0, 1, 0], [], []>} : vector<8x8xf32>, vector<8x8xf32>, vector<8x8xf32> -> vector<8x8xf32>
    %cst_355 = arith.constant 0.353553385 : f32
    %773 = vector.broadcast %cst_355 : f32 to vector<8x8xf32>
    %774 = arith.mulf %772, %773 : vector<8x8xf32>
    %775 = vector.broadcast %3 : vector<1x8xf32> to vector<8x8xf32>
    %776 = arith.addf %774, %775 : vector<8x8xf32>
    %cst_356 = arith.constant dense<0xFF800000> : vector<8xf32>
    %777 = vector.multi_reduction <maximumf>, %776, %cst_356 [1] : vector<8x8xf32> to vector<8xf32>
    %778 = vector.shape_cast %777 : vector<8xf32> to vector<8x1xf32>
    %779 = vector.broadcast %778 : vector<8x1xf32> to vector<8x8xf32>
    %780 = arith.subf %776, %779 : vector<8x8xf32>
    %781 = math.exp %780 : vector<8x8xf32>
    %cst_357 = arith.constant dense<0.000000e+00> : vector<8xf32>
    %782 = vector.multi_reduction <add>, %781, %cst_357 [1] : vector<8x8xf32> to vector<8xf32>
    %783 = vector.shape_cast %782 : vector<8xf32> to vector<8x1xf32>
    %784 = vector.broadcast %783 : vector<8x1xf32> to vector<8x8xf32>
    %785 = arith.divf %781, %784 : vector<8x8xf32>
    %cst_358 = arith.constant dense<0.000000e+00> : vector<8x8xf32>
    %786 = tpu.matmul %785, %771, %cst_358 {dimension_numbers = #tpu.dot_dimension_numbers<[1], [0], [0], [1], [0, 0, 1, 1], [], []>} : vector<8x8xf32>, vector<8x8xf32>, vector<8x8xf32> -> vector<8x8xf32>
    %787 = vector.extract_strided_slice %758 {offsets = [0, 0], sizes = [8, 32], strides = [1, 1]} : vector<32x32xf32> to vector<8x32xf32>
    %cst_359 = arith.constant dense<0.000000e+00> : vector<8x32xf32>
    %788 = tpu.matmul %786, %787, %cst_359 {dimension_numbers = #tpu.dot_dimension_numbers<[1], [0], [0], [1], [0, 0, 1, 1], [], []>} : vector<8x8xf32>, vector<8x32xf32>, vector<8x32xf32> -> vector<8x32xf32>
    %789 = vector.broadcast %760 : vector<1x32xf32> to vector<8x32xf32>
    %790 = arith.addf %789, %788 : vector<8x32xf32>
    %791 = vector.extract_strided_slice %763 {offsets = [0, 8], sizes = [8, 8], strides = [1, 1]} : vector<8x32xf32> to vector<8x8xf32>
    %792 = vector.extract_strided_slice %767 {offsets = [0, 8], sizes = [8, 8], strides = [1, 1]} : vector<8x32xf32> to vector<8x8xf32>
    %793 = vector.extract_strided_slice %768 {offsets = [0, 8], sizes = [8, 8], strides = [1, 1]} : vector<8x32xf32> to vector<8x8xf32>
    %cst_360 = arith.constant dense<0.000000e+00> : vector<8x8xf32>
    %794 = tpu.matmul %791, %792, %cst_360 {dimension_numbers = #tpu.dot_dimension_numbers<[1], [1], [0], [0], [0, 0, 1, 0], [], []>} : vector<8x8xf32>, vector<8x8xf32>, vector<8x8xf32> -> vector<8x8xf32>
    %cst_361 = arith.constant 0.353553385 : f32
    %795 = vector.broadcast %cst_361 : f32 to vector<8x8xf32>
    %796 = arith.mulf %794, %795 : vector<8x8xf32>
    %797 = vector.broadcast %3 : vector<1x8xf32> to vector<8x8xf32>
    %798 = arith.addf %796, %797 : vector<8x8xf32>
    %cst_362 = arith.constant dense<0xFF800000> : vector<8xf32>
    %799 = vector.multi_reduction <maximumf>, %798, %cst_362 [1] : vector<8x8xf32> to vector<8xf32>
    %800 = vector.shape_cast %799 : vector<8xf32> to vector<8x1xf32>
    %801 = vector.broadcast %800 : vector<8x1xf32> to vector<8x8xf32>
    %802 = arith.subf %798, %801 : vector<8x8xf32>
    %803 = math.exp %802 : vector<8x8xf32>
    %cst_363 = arith.constant dense<0.000000e+00> : vector<8xf32>
    %804 = vector.multi_reduction <add>, %803, %cst_363 [1] : vector<8x8xf32> to vector<8xf32>
    %805 = vector.shape_cast %804 : vector<8xf32> to vector<8x1xf32>
    %806 = vector.broadcast %805 : vector<8x1xf32> to vector<8x8xf32>
    %807 = arith.divf %803, %806 : vector<8x8xf32>
    %cst_364 = arith.constant dense<0.000000e+00> : vector<8x8xf32>
    %808 = tpu.matmul %807, %793, %cst_364 {dimension_numbers = #tpu.dot_dimension_numbers<[1], [0], [0], [1], [0, 0, 1, 1], [], []>} : vector<8x8xf32>, vector<8x8xf32>, vector<8x8xf32> -> vector<8x8xf32>
    %809 = vector.extract_strided_slice %758 {offsets = [8, 0], sizes = [8, 32], strides = [1, 1]} : vector<32x32xf32> to vector<8x32xf32>
    %cst_365 = arith.constant dense<0.000000e+00> : vector<8x32xf32>
    %810 = tpu.matmul %808, %809, %cst_365 {dimension_numbers = #tpu.dot_dimension_numbers<[1], [0], [0], [1], [0, 0, 1, 1], [], []>} : vector<8x8xf32>, vector<8x32xf32>, vector<8x32xf32> -> vector<8x32xf32>
    %811 = arith.addf %790, %810 : vector<8x32xf32>
    %812 = arith.addf %785, %807 : vector<8x8xf32>
    %813 = vector.extract_strided_slice %763 {offsets = [0, 16], sizes = [8, 8], strides = [1, 1]} : vector<8x32xf32> to vector<8x8xf32>
    %814 = vector.extract_strided_slice %767 {offsets = [0, 16], sizes = [8, 8], strides = [1, 1]} : vector<8x32xf32> to vector<8x8xf32>
    %815 = vector.extract_strided_slice %768 {offsets = [0, 16], sizes = [8, 8], strides = [1, 1]} : vector<8x32xf32> to vector<8x8xf32>
    %cst_366 = arith.constant dense<0.000000e+00> : vector<8x8xf32>
    %816 = tpu.matmul %813, %814, %cst_366 {dimension_numbers = #tpu.dot_dimension_numbers<[1], [1], [0], [0], [0, 0, 1, 0], [], []>} : vector<8x8xf32>, vector<8x8xf32>, vector<8x8xf32> -> vector<8x8xf32>
    %cst_367 = arith.constant 0.353553385 : f32
    %817 = vector.broadcast %cst_367 : f32 to vector<8x8xf32>
    %818 = arith.mulf %816, %817 : vector<8x8xf32>
    %819 = vector.broadcast %3 : vector<1x8xf32> to vector<8x8xf32>
    %820 = arith.addf %818, %819 : vector<8x8xf32>
    %cst_368 = arith.constant dense<0xFF800000> : vector<8xf32>
    %821 = vector.multi_reduction <maximumf>, %820, %cst_368 [1] : vector<8x8xf32> to vector<8xf32>
    %822 = vector.shape_cast %821 : vector<8xf32> to vector<8x1xf32>
    %823 = vector.broadcast %822 : vector<8x1xf32> to vector<8x8xf32>
    %824 = arith.subf %820, %823 : vector<8x8xf32>
    %825 = math.exp %824 : vector<8x8xf32>
    %cst_369 = arith.constant dense<0.000000e+00> : vector<8xf32>
    %826 = vector.multi_reduction <add>, %825, %cst_369 [1] : vector<8x8xf32> to vector<8xf32>
    %827 = vector.shape_cast %826 : vector<8xf32> to vector<8x1xf32>
    %828 = vector.broadcast %827 : vector<8x1xf32> to vector<8x8xf32>
    %829 = arith.divf %825, %828 : vector<8x8xf32>
    %cst_370 = arith.constant dense<0.000000e+00> : vector<8x8xf32>
    %830 = tpu.matmul %829, %815, %cst_370 {dimension_numbers = #tpu.dot_dimension_numbers<[1], [0], [0], [1], [0, 0, 1, 1], [], []>} : vector<8x8xf32>, vector<8x8xf32>, vector<8x8xf32> -> vector<8x8xf32>
    %831 = vector.extract_strided_slice %758 {offsets = [16, 0], sizes = [8, 32], strides = [1, 1]} : vector<32x32xf32> to vector<8x32xf32>
    %cst_371 = arith.constant dense<0.000000e+00> : vector<8x32xf32>
    %832 = tpu.matmul %830, %831, %cst_371 {dimension_numbers = #tpu.dot_dimension_numbers<[1], [0], [0], [1], [0, 0, 1, 1], [], []>} : vector<8x8xf32>, vector<8x32xf32>, vector<8x32xf32> -> vector<8x32xf32>
    %833 = arith.addf %811, %832 : vector<8x32xf32>
    %834 = arith.addf %812, %829 : vector<8x8xf32>
    %835 = vector.extract_strided_slice %763 {offsets = [0, 24], sizes = [8, 8], strides = [1, 1]} : vector<8x32xf32> to vector<8x8xf32>
    %836 = vector.extract_strided_slice %767 {offsets = [0, 24], sizes = [8, 8], strides = [1, 1]} : vector<8x32xf32> to vector<8x8xf32>
    %837 = vector.extract_strided_slice %768 {offsets = [0, 24], sizes = [8, 8], strides = [1, 1]} : vector<8x32xf32> to vector<8x8xf32>
    %cst_372 = arith.constant dense<0.000000e+00> : vector<8x8xf32>
    %838 = tpu.matmul %835, %836, %cst_372 {dimension_numbers = #tpu.dot_dimension_numbers<[1], [1], [0], [0], [0, 0, 1, 0], [], []>} : vector<8x8xf32>, vector<8x8xf32>, vector<8x8xf32> -> vector<8x8xf32>
    %cst_373 = arith.constant 0.353553385 : f32
    %839 = vector.broadcast %cst_373 : f32 to vector<8x8xf32>
    %840 = arith.mulf %838, %839 : vector<8x8xf32>
    %841 = vector.broadcast %3 : vector<1x8xf32> to vector<8x8xf32>
    %842 = arith.addf %840, %841 : vector<8x8xf32>
    %cst_374 = arith.constant dense<0xFF800000> : vector<8xf32>
    %843 = vector.multi_reduction <maximumf>, %842, %cst_374 [1] : vector<8x8xf32> to vector<8xf32>
    %844 = vector.shape_cast %843 : vector<8xf32> to vector<8x1xf32>
    %845 = vector.broadcast %844 : vector<8x1xf32> to vector<8x8xf32>
    %846 = arith.subf %842, %845 : vector<8x8xf32>
    %847 = math.exp %846 : vector<8x8xf32>
    %cst_375 = arith.constant dense<0.000000e+00> : vector<8xf32>
    %848 = vector.multi_reduction <add>, %847, %cst_375 [1] : vector<8x8xf32> to vector<8xf32>
    %849 = vector.shape_cast %848 : vector<8xf32> to vector<8x1xf32>
    %850 = vector.broadcast %849 : vector<8x1xf32> to vector<8x8xf32>
    %851 = arith.divf %847, %850 : vector<8x8xf32>
    %cst_376 = arith.constant dense<0.000000e+00> : vector<8x8xf32>
    %852 = tpu.matmul %851, %837, %cst_376 {dimension_numbers = #tpu.dot_dimension_numbers<[1], [0], [0], [1], [0, 0, 1, 1], [], []>} : vector<8x8xf32>, vector<8x8xf32>, vector<8x8xf32> -> vector<8x8xf32>
    %853 = vector.extract_strided_slice %758 {offsets = [24, 0], sizes = [8, 32], strides = [1, 1]} : vector<32x32xf32> to vector<8x32xf32>
    %cst_377 = arith.constant dense<0.000000e+00> : vector<8x32xf32>
    %854 = tpu.matmul %852, %853, %cst_377 {dimension_numbers = #tpu.dot_dimension_numbers<[1], [0], [0], [1], [0, 0, 1, 1], [], []>} : vector<8x8xf32>, vector<8x32xf32>, vector<8x32xf32> -> vector<8x32xf32>
    %855 = arith.addf %833, %854 : vector<8x32xf32>
    %856 = arith.addf %834, %851 : vector<8x8xf32>
    %cst_378 = arith.constant 2.500000e-01 : f32
    %857 = vector.broadcast %cst_378 : f32 to vector<8x8xf32>
    %858 = arith.mulf %856, %857 : vector<8x8xf32>
    %859 = arith.addf %748, %855 : vector<8x32xf32>
    %c1_379 = arith.constant 1 : index
    %c0_380 = arith.constant 0 : index
    %c0_381 = arith.constant 0 : index
    %860 = vector.load %arg29[%c1_379, %c0_380, %c0_381] : memref<2x1x32xf32, #tpu.memory_space<vmem>>, vector<1x1x32xf32>
    %861 = vector.shape_cast %860 : vector<1x1x32xf32> to vector<1x32xf32>
    %c1_382 = arith.constant 1 : index
    %c0_383 = arith.constant 0 : index
    %c0_384 = arith.constant 0 : index
    %862 = vector.load %arg30[%c1_382, %c0_383, %c0_384] : memref<2x1x32xf32, #tpu.memory_space<vmem>>, vector<1x1x32xf32>
    %863 = vector.shape_cast %862 : vector<1x1x32xf32> to vector<1x32xf32>
    %cst_385 = arith.constant dense<0.000000e+00> : vector<8xf32>
    %864 = vector.multi_reduction <add>, %859, %cst_385 [1] : vector<8x32xf32> to vector<8xf32>
    %865 = vector.shape_cast %864 : vector<8xf32> to vector<8x1xf32>
    %cst_386 = arith.constant 3.200000e+01 : f32
    %866 = vector.broadcast %cst_386 : f32 to vector<8x1xf32>
    %867 = arith.divf %865, %866 : vector<8x1xf32>
    %868 = vector.broadcast %867 : vector<8x1xf32> to vector<8x32xf32>
    %869 = arith.subf %859, %868 : vector<8x32xf32>
    %870 = arith.mulf %869, %869 : vector<8x32xf32>
    %cst_387 = arith.constant dense<0.000000e+00> : vector<8xf32>
    %871 = vector.multi_reduction <add>, %870, %cst_387 [1] : vector<8x32xf32> to vector<8xf32>
    %872 = vector.shape_cast %871 : vector<8xf32> to vector<8x1xf32>
    %cst_388 = arith.constant 3.200000e+01 : f32
    %873 = vector.broadcast %cst_388 : f32 to vector<8x1xf32>
    %874 = arith.divf %872, %873 : vector<8x1xf32>
    %cst_389 = arith.constant 9.99999974E-6 : f32
    %875 = vector.broadcast %cst_389 : f32 to vector<8x1xf32>
    %876 = arith.addf %874, %875 : vector<8x1xf32>
    %877 = math.rsqrt %876 : vector<8x1xf32>
    %878 = vector.broadcast %877 : vector<8x1xf32> to vector<8x32xf32>
    %879 = arith.mulf %869, %878 : vector<8x32xf32>
    %880 = vector.broadcast %861 : vector<1x32xf32> to vector<8x32xf32>
    %881 = arith.mulf %879, %880 : vector<8x32xf32>
    %882 = vector.broadcast %863 : vector<1x32xf32> to vector<8x32xf32>
    %883 = arith.addf %881, %882 : vector<8x32xf32>
    %c1_390 = arith.constant 1 : index
    %c0_391 = arith.constant 0 : index
    %c0_392 = arith.constant 0 : index
    %884 = vector.load %arg31[%c1_390, %c0_391, %c0_392] : memref<2x32x64xf32, #tpu.memory_space<vmem>>, vector<1x32x64xf32>
    %885 = vector.shape_cast %884 : vector<1x32x64xf32> to vector<32x64xf32>
    %c1_393 = arith.constant 1 : index
    %c0_394 = arith.constant 0 : index
    %c0_395 = arith.constant 0 : index
    %886 = vector.load %arg32[%c1_393, %c0_394, %c0_395] : memref<2x1x64xf32, #tpu.memory_space<vmem>>, vector<1x1x64xf32>
    %887 = vector.shape_cast %886 : vector<1x1x64xf32> to vector<1x64xf32>
    %c1_396 = arith.constant 1 : index
    %c0_397 = arith.constant 0 : index
    %c0_398 = arith.constant 0 : index
    %888 = vector.load %arg33[%c1_396, %c0_397, %c0_398] : memref<2x64x32xf32, #tpu.memory_space<vmem>>, vector<1x64x32xf32>
    %889 = vector.shape_cast %888 : vector<1x64x32xf32> to vector<64x32xf32>
    %c1_399 = arith.constant 1 : index
    %c0_400 = arith.constant 0 : index
    %c0_401 = arith.constant 0 : index
    %890 = vector.load %arg34[%c1_399, %c0_400, %c0_401] : memref<2x1x32xf32, #tpu.memory_space<vmem>>, vector<1x1x32xf32>
    %891 = vector.shape_cast %890 : vector<1x1x32xf32> to vector<1x32xf32>
    %cst_402 = arith.constant dense<0.000000e+00> : vector<8x64xf32>
    %892 = tpu.matmul %883, %885, %cst_402 {dimension_numbers = #tpu.dot_dimension_numbers<[1], [0], [0], [1], [0, 0, 1, 1], [], []>} : vector<8x32xf32>, vector<32x64xf32>, vector<8x64xf32> -> vector<8x64xf32>
    %893 = vector.broadcast %887 : vector<1x64xf32> to vector<8x64xf32>
    %894 = arith.addf %892, %893 : vector<8x64xf32>
    %cst_403 = arith.constant 0.000000e+00 : f32
    %895 = vector.broadcast %cst_403 : f32 to vector<8x64xf32>
    %896 = arith.maximumf %894, %895 : vector<8x64xf32>
    %cst_404 = arith.constant dense<0.000000e+00> : vector<8x32xf32>
    %897 = tpu.matmul %896, %889, %cst_404 {dimension_numbers = #tpu.dot_dimension_numbers<[1], [0], [0], [1], [0, 0, 1, 1], [], []>} : vector<8x64xf32>, vector<64x32xf32>, vector<8x32xf32> -> vector<8x32xf32>
    %898 = vector.broadcast %891 : vector<1x32xf32> to vector<8x32xf32>
    %899 = arith.addf %897, %898 : vector<8x32xf32>
    %900 = arith.addf %883, %899 : vector<8x32xf32>
    %c1_405 = arith.constant 1 : index
    %c0_406 = arith.constant 0 : index
    %c0_407 = arith.constant 0 : index
    %901 = vector.load %arg35[%c1_405, %c0_406, %c0_407] : memref<2x1x32xf32, #tpu.memory_space<vmem>>, vector<1x1x32xf32>
    %902 = vector.shape_cast %901 : vector<1x1x32xf32> to vector<1x32xf32>
    %c1_408 = arith.constant 1 : index
    %c0_409 = arith.constant 0 : index
    %c0_410 = arith.constant 0 : index
    %903 = vector.load %arg36[%c1_408, %c0_409, %c0_410] : memref<2x1x32xf32, #tpu.memory_space<vmem>>, vector<1x1x32xf32>
    %904 = vector.shape_cast %903 : vector<1x1x32xf32> to vector<1x32xf32>
    %cst_411 = arith.constant dense<0.000000e+00> : vector<8xf32>
    %905 = vector.multi_reduction <add>, %900, %cst_411 [1] : vector<8x32xf32> to vector<8xf32>
    %906 = vector.shape_cast %905 : vector<8xf32> to vector<8x1xf32>
    %cst_412 = arith.constant 3.200000e+01 : f32
    %907 = vector.broadcast %cst_412 : f32 to vector<8x1xf32>
    %908 = arith.divf %906, %907 : vector<8x1xf32>
    %909 = vector.broadcast %908 : vector<8x1xf32> to vector<8x32xf32>
    %910 = arith.subf %900, %909 : vector<8x32xf32>
    %911 = arith.mulf %910, %910 : vector<8x32xf32>
    %cst_413 = arith.constant dense<0.000000e+00> : vector<8xf32>
    %912 = vector.multi_reduction <add>, %911, %cst_413 [1] : vector<8x32xf32> to vector<8xf32>
    %913 = vector.shape_cast %912 : vector<8xf32> to vector<8x1xf32>
    %cst_414 = arith.constant 3.200000e+01 : f32
    %914 = vector.broadcast %cst_414 : f32 to vector<8x1xf32>
    %915 = arith.divf %913, %914 : vector<8x1xf32>
    %cst_415 = arith.constant 9.99999974E-6 : f32
    %916 = vector.broadcast %cst_415 : f32 to vector<8x1xf32>
    %917 = arith.addf %915, %916 : vector<8x1xf32>
    %918 = math.rsqrt %917 : vector<8x1xf32>
    %919 = vector.broadcast %918 : vector<8x1xf32> to vector<8x32xf32>
    %920 = arith.mulf %910, %919 : vector<8x32xf32>
    %921 = vector.broadcast %902 : vector<1x32xf32> to vector<8x32xf32>
    %922 = arith.mulf %920, %921 : vector<8x32xf32>
    %923 = vector.broadcast %904 : vector<1x32xf32> to vector<8x32xf32>
    %924 = arith.addf %922, %923 : vector<8x32xf32>
    %c0_416 = arith.constant 0 : index
    %c0_417 = arith.constant 0 : index
    %925 = vector.load %arg37[%c0_416, %c0_417] : memref<32x128xf32, #tpu.memory_space<vmem>>, vector<32x128xf32>
    %cst_418 = arith.constant dense<0.000000e+00> : vector<8x128xf32>
    %926 = tpu.matmul %924, %925, %cst_418 {dimension_numbers = #tpu.dot_dimension_numbers<[1], [0], [0], [1], [0, 0, 1, 1], [], []>} : vector<8x32xf32>, vector<32x128xf32>, vector<8x128xf32> -> vector<8x128xf32>
    %927 = tpu.iota {dimensions = array<i32: 1>} : vector<8x128xi32>
    %c16_i32 = arith.constant 16 : i32
    %928 = vector.broadcast %c16_i32 : i32 to vector<8x128xi32>
    %929 = arith.cmpi slt, %927, %928 : vector<8x128xi32>
    %cst_419 = arith.constant -1.000000e+30 : f32
    %930 = vector.broadcast %cst_419 : f32 to vector<8x128xf32>
    %931 = arith.select %929, %926, %930 : vector<8x128xi1>, vector<8x128xf32>
    %cst_420 = arith.constant dense<0xFF800000> : vector<8xf32>
    %932 = vector.multi_reduction <maximumf>, %931, %cst_420 [1] : vector<8x128xf32> to vector<8xf32>
    %933 = vector.shape_cast %932 : vector<8xf32> to vector<8x1xf32>
    %934 = vector.broadcast %933 : vector<8x1xf32> to vector<8x128xf32>
    %935 = arith.subf %931, %934 : vector<8x128xf32>
    %936 = math.exp %935 : vector<8x128xf32>
    %cst_421 = arith.constant dense<0.000000e+00> : vector<8xf32>
    %937 = vector.multi_reduction <add>, %936, %cst_421 [1] : vector<8x128xf32> to vector<8xf32>
    %938 = vector.shape_cast %937 : vector<8xf32> to vector<8x1xf32>
    %939 = math.log %938 : vector<8x1xf32>
    %940 = vector.broadcast %939 : vector<8x1xf32> to vector<8x128xf32>
    %941 = arith.subf %935, %940 : vector<8x128xf32>
    %c0_422 = arith.constant 0 : index
    %c0_423 = arith.constant 0 : index
    %c0_424 = arith.constant 0 : index
    %942 = vector.load %arg38[%c0_422, %c0_423, %c0_424] : memref<1x8x128xf32, #tpu.memory_space<vmem>>, vector<1x8x128xf32>
    %943 = vector.shape_cast %942 : vector<1x8x128xf32> to vector<8x128xf32>
    %944 = vector.shape_cast %941 : vector<8x128xf32> to vector<1x8x128xf32>
    tpu.vector_store %arg38[%c0_422, %c0_423, %c0_424], %944 {strides = array<i32>} : memref<1x8x128xf32, #tpu.memory_space<vmem>>, vector<1x8x128xf32>,
    %c0_425 = arith.constant 0 : index
    %c0_426 = arith.constant 0 : index
    %c0_427 = arith.constant 0 : index
    %945 = vector.load %arg39[%c0_425, %c0_426, %c0_427] : memref<1x8x8xf32, #tpu.memory_space<vmem>>, vector<1x8x8xf32>
    %946 = vector.shape_cast %945 : vector<1x8x8xf32> to vector<8x8xf32>
    %947 = vector.shape_cast %858 : vector<8x8xf32> to vector<1x8x8xf32>
    tpu.vector_store %arg39[%c0_425, %c0_426, %c0_427], %947 {strides = array<i32>} : memref<1x8x8xf32, #tpu.memory_space<vmem>>, vector<1x8x8xf32>,
    return
  }
  func.func @transform_0(%arg0: i32) -> (i32, i32, i32) {
    %c0_i32 = arith.constant 0 : i32
    %c0_i32_0 = arith.constant 0 : i32
    %c0_i32_1 = arith.constant 0 : i32
    return %arg0, %c0_i32, %c0_i32_0 : i32, i32, i32
  }
  func.func @transform_1(%arg0: i32) -> (i32, i32, i32) {
    %c0_i32 = arith.constant 0 : i32
    %c0_i32_0 = arith.constant 0 : i32
    %c0_i32_1 = arith.constant 0 : i32
    return %arg0, %c0_i32, %c0_i32_0 : i32, i32, i32
  }
  func.func @transform_2(%arg0: i32) -> (i32, i32, i32) {
    %c0_i32 = arith.constant 0 : i32
    %c0_i32_0 = arith.constant 0 : i32
    %c0_i32_1 = arith.constant 0 : i32
    return %arg0, %c0_i32, %c0_i32_0 : i32, i32, i32
  }
  func.func @transform_3(%arg0: i32) -> (i32, i32, i32) {
    %c0_i32 = arith.constant 0 : i32
    %c0_i32_0 = arith.constant 0 : i32
    %c0_i32_1 = arith.constant 0 : i32
    return %arg0, %c0_i32, %c0_i32_0 : i32, i32, i32
  }
  func.func @transform_4(%arg0: i32) -> (i32, i32, i32) {
    %c0_i32 = arith.constant 0 : i32
    %c0_i32_0 = arith.constant 0 : i32
    %c0_i32_1 = arith.constant 0 : i32
    %c0_i32_2 = arith.constant 0 : i32
    return %c0_i32, %c0_i32_0, %c0_i32_1 : i32, i32, i32
  }
  func.func @transform_5(%arg0: i32) -> (i32, i32, i32) {
    %c0_i32 = arith.constant 0 : i32
    %c0_i32_0 = arith.constant 0 : i32
    %c0_i32_1 = arith.constant 0 : i32
    %c0_i32_2 = arith.constant 0 : i32
    return %c0_i32, %c0_i32_0, %c0_i32_1 : i32, i32, i32
  }
  func.func @transform_6(%arg0: i32) -> (i32, i32, i32) {
    %c0_i32 = arith.constant 0 : i32
    %c0_i32_0 = arith.constant 0 : i32
    %c0_i32_1 = arith.constant 0 : i32
    %c0_i32_2 = arith.constant 0 : i32
    return %c0_i32, %c0_i32_0, %c0_i32_1 : i32, i32, i32
  }
  func.func @transform_7(%arg0: i32) -> (i32, i32, i32) {
    %c0_i32 = arith.constant 0 : i32
    %c0_i32_0 = arith.constant 0 : i32
    %c0_i32_1 = arith.constant 0 : i32
    %c0_i32_2 = arith.constant 0 : i32
    return %c0_i32, %c0_i32_0, %c0_i32_1 : i32, i32, i32
  }
  func.func @transform_8(%arg0: i32) -> (i32, i32, i32) {
    %c0_i32 = arith.constant 0 : i32
    %c0_i32_0 = arith.constant 0 : i32
    %c0_i32_1 = arith.constant 0 : i32
    %c0_i32_2 = arith.constant 0 : i32
    return %c0_i32, %c0_i32_0, %c0_i32_1 : i32, i32, i32
  }
  func.func @transform_9(%arg0: i32) -> (i32, i32, i32) {
    %c0_i32 = arith.constant 0 : i32
    %c0_i32_0 = arith.constant 0 : i32
    %c0_i32_1 = arith.constant 0 : i32
    %c0_i32_2 = arith.constant 0 : i32
    return %c0_i32, %c0_i32_0, %c0_i32_1 : i32, i32, i32
  }
  func.func @transform_10(%arg0: i32) -> (i32, i32, i32) {
    %c0_i32 = arith.constant 0 : i32
    %c0_i32_0 = arith.constant 0 : i32
    %c0_i32_1 = arith.constant 0 : i32
    %c0_i32_2 = arith.constant 0 : i32
    return %c0_i32, %c0_i32_0, %c0_i32_1 : i32, i32, i32
  }
  func.func @transform_11(%arg0: i32) -> (i32, i32, i32) {
    %c0_i32 = arith.constant 0 : i32
    %c0_i32_0 = arith.constant 0 : i32
    %c0_i32_1 = arith.constant 0 : i32
    %c0_i32_2 = arith.constant 0 : i32
    return %c0_i32, %c0_i32_0, %c0_i32_1 : i32, i32, i32
  }
  func.func @transform_12(%arg0: i32) -> (i32, i32, i32) {
    %c0_i32 = arith.constant 0 : i32
    %c0_i32_0 = arith.constant 0 : i32
    %c0_i32_1 = arith.constant 0 : i32
    %c0_i32_2 = arith.constant 0 : i32
    return %c0_i32, %c0_i32_0, %c0_i32_1 : i32, i32, i32
  }
  func.func @transform_13(%arg0: i32) -> (i32, i32, i32) {
    %c0_i32 = arith.constant 0 : i32
    %c0_i32_0 = arith.constant 0 : i32
    %c0_i32_1 = arith.constant 0 : i32
    %c0_i32_2 = arith.constant 0 : i32
    return %c0_i32, %c0_i32_0, %c0_i32_1 : i32, i32, i32
  }
  func.func @transform_14(%arg0: i32) -> (i32, i32, i32) {
    %c0_i32 = arith.constant 0 : i32
    %c0_i32_0 = arith.constant 0 : i32
    %c0_i32_1 = arith.constant 0 : i32
    %c0_i32_2 = arith.constant 0 : i32
    return %c0_i32, %c0_i32_0, %c0_i32_1 : i32, i32, i32
  }
  func.func @transform_15(%arg0: i32) -> (i32, i32, i32) {
    %c0_i32 = arith.constant 0 : i32
    %c0_i32_0 = arith.constant 0 : i32
    %c0_i32_1 = arith.constant 0 : i32
    %c0_i32_2 = arith.constant 0 : i32
    return %c0_i32, %c0_i32_0, %c0_i32_1 : i32, i32, i32
  }
  func.func @transform_16(%arg0: i32) -> (i32, i32, i32) {
    %c0_i32 = arith.constant 0 : i32
    %c0_i32_0 = arith.constant 0 : i32
    %c0_i32_1 = arith.constant 0 : i32
    %c0_i32_2 = arith.constant 0 : i32
    return %c0_i32, %c0_i32_0, %c0_i32_1 : i32, i32, i32
  }
  func.func @transform_17(%arg0: i32) -> (i32, i32, i32) {
    %c0_i32 = arith.constant 0 : i32
    %c0_i32_0 = arith.constant 0 : i32
    %c0_i32_1 = arith.constant 0 : i32
    %c0_i32_2 = arith.constant 0 : i32
    return %c0_i32, %c0_i32_0, %c0_i32_1 : i32, i32, i32
  }
  func.func @transform_18(%arg0: i32) -> (i32, i32, i32) {
    %c0_i32 = arith.constant 0 : i32
    %c0_i32_0 = arith.constant 0 : i32
    %c0_i32_1 = arith.constant 0 : i32
    %c0_i32_2 = arith.constant 0 : i32
    return %c0_i32, %c0_i32_0, %c0_i32_1 : i32, i32, i32
  }
  func.func @transform_19(%arg0: i32) -> (i32, i32, i32) {
    %c0_i32 = arith.constant 0 : i32
    %c0_i32_0 = arith.constant 0 : i32
    %c0_i32_1 = arith.constant 0 : i32
    %c0_i32_2 = arith.constant 0 : i32
    return %c0_i32, %c0_i32_0, %c0_i32_1 : i32, i32, i32
  }
  func.func @transform_20(%arg0: i32) -> (i32, i32, i32) {
    %c0_i32 = arith.constant 0 : i32
    %c0_i32_0 = arith.constant 0 : i32
    %c0_i32_1 = arith.constant 0 : i32
    %c0_i32_2 = arith.constant 0 : i32
    return %c0_i32, %c0_i32_0, %c0_i32_1 : i32, i32, i32
  }
  func.func @transform_21(%arg0: i32) -> (i32, i32, i32) {
    %c0_i32 = arith.constant 0 : i32
    %c0_i32_0 = arith.constant 0 : i32
    %c0_i32_1 = arith.constant 0 : i32
    %c0_i32_2 = arith.constant 0 : i32
    return %c0_i32, %c0_i32_0, %c0_i32_1 : i32, i32, i32
  }
  func.func @transform_22(%arg0: i32) -> (i32, i32, i32) {
    %c0_i32 = arith.constant 0 : i32
    %c0_i32_0 = arith.constant 0 : i32
    %c0_i32_1 = arith.constant 0 : i32
    %c0_i32_2 = arith.constant 0 : i32
    return %c0_i32, %c0_i32_0, %c0_i32_1 : i32, i32, i32
  }
  func.func @transform_23(%arg0: i32) -> (i32, i32, i32) {
    %c0_i32 = arith.constant 0 : i32
    %c0_i32_0 = arith.constant 0 : i32
    %c0_i32_1 = arith.constant 0 : i32
    %c0_i32_2 = arith.constant 0 : i32
    return %c0_i32, %c0_i32_0, %c0_i32_1 : i32, i32, i32
  }
  func.func @transform_24(%arg0: i32) -> (i32, i32, i32) {
    %c0_i32 = arith.constant 0 : i32
    %c0_i32_0 = arith.constant 0 : i32
    %c0_i32_1 = arith.constant 0 : i32
    %c0_i32_2 = arith.constant 0 : i32
    return %c0_i32, %c0_i32_0, %c0_i32_1 : i32, i32, i32
  }
  func.func @transform_25(%arg0: i32) -> (i32, i32, i32) {
    %c0_i32 = arith.constant 0 : i32
    %c0_i32_0 = arith.constant 0 : i32
    %c0_i32_1 = arith.constant 0 : i32
    %c0_i32_2 = arith.constant 0 : i32
    return %c0_i32, %c0_i32_0, %c0_i32_1 : i32, i32, i32
  }
  func.func @transform_26(%arg0: i32) -> (i32, i32, i32) {
    %c0_i32 = arith.constant 0 : i32
    %c0_i32_0 = arith.constant 0 : i32
    %c0_i32_1 = arith.constant 0 : i32
    %c0_i32_2 = arith.constant 0 : i32
    return %c0_i32, %c0_i32_0, %c0_i32_1 : i32, i32, i32
  }
  func.func @transform_27(%arg0: i32) -> (i32, i32, i32) {
    %c0_i32 = arith.constant 0 : i32
    %c0_i32_0 = arith.constant 0 : i32
    %c0_i32_1 = arith.constant 0 : i32
    %c0_i32_2 = arith.constant 0 : i32
    return %c0_i32, %c0_i32_0, %c0_i32_1 : i32, i32, i32
  }
  func.func @transform_28(%arg0: i32) -> (i32, i32, i32) {
    %c0_i32 = arith.constant 0 : i32
    %c0_i32_0 = arith.constant 0 : i32
    %c0_i32_1 = arith.constant 0 : i32
    %c0_i32_2 = arith.constant 0 : i32
    return %c0_i32, %c0_i32_0, %c0_i32_1 : i32, i32, i32
  }
  func.func @transform_29(%arg0: i32) -> (i32, i32, i32) {
    %c0_i32 = arith.constant 0 : i32
    %c0_i32_0 = arith.constant 0 : i32
    %c0_i32_1 = arith.constant 0 : i32
    %c0_i32_2 = arith.constant 0 : i32
    return %c0_i32, %c0_i32_0, %c0_i32_1 : i32, i32, i32
  }
  func.func @transform_30(%arg0: i32) -> (i32, i32, i32) {
    %c0_i32 = arith.constant 0 : i32
    %c0_i32_0 = arith.constant 0 : i32
    %c0_i32_1 = arith.constant 0 : i32
    %c0_i32_2 = arith.constant 0 : i32
    return %c0_i32, %c0_i32_0, %c0_i32_1 : i32, i32, i32
  }
  func.func @transform_31(%arg0: i32) -> (i32, i32, i32) {
    %c0_i32 = arith.constant 0 : i32
    %c0_i32_0 = arith.constant 0 : i32
    %c0_i32_1 = arith.constant 0 : i32
    %c0_i32_2 = arith.constant 0 : i32
    return %c0_i32, %c0_i32_0, %c0_i32_1 : i32, i32, i32
  }
  func.func @transform_32(%arg0: i32) -> (i32, i32, i32) {
    %c0_i32 = arith.constant 0 : i32
    %c0_i32_0 = arith.constant 0 : i32
    %c0_i32_1 = arith.constant 0 : i32
    %c0_i32_2 = arith.constant 0 : i32
    return %c0_i32, %c0_i32_0, %c0_i32_1 : i32, i32, i32
  }
  func.func @transform_33(%arg0: i32) -> (i32, i32, i32) {
    %c0_i32 = arith.constant 0 : i32
    %c0_i32_0 = arith.constant 0 : i32
    %c0_i32_1 = arith.constant 0 : i32
    %c0_i32_2 = arith.constant 0 : i32
    return %c0_i32, %c0_i32_0, %c0_i32_1 : i32, i32, i32
  }
  func.func @transform_34(%arg0: i32) -> (i32, i32, i32) {
    %c0_i32 = arith.constant 0 : i32
    %c0_i32_0 = arith.constant 0 : i32
    %c0_i32_1 = arith.constant 0 : i32
    %c0_i32_2 = arith.constant 0 : i32
    return %c0_i32, %c0_i32_0, %c0_i32_1 : i32, i32, i32
  }
  func.func @transform_35(%arg0: i32) -> (i32, i32, i32) {
    %c0_i32 = arith.constant 0 : i32
    %c0_i32_0 = arith.constant 0 : i32
    %c0_i32_1 = arith.constant 0 : i32
    %c0_i32_2 = arith.constant 0 : i32
    return %c0_i32, %c0_i32_0, %c0_i32_1 : i32, i32, i32
  }
  func.func @transform_36(%arg0: i32) -> (i32, i32) {
    %c0_i32 = arith.constant 0 : i32
    %c0_i32_0 = arith.constant 0 : i32
    %c0_i32_1 = arith.constant 0 : i32
    return %c0_i32, %c0_i32_0 : i32, i32
  }
  func.func @transform_37(%arg0: i32) -> (i32, i32, i32) {
    %c0_i32 = arith.constant 0 : i32
    %c0_i32_0 = arith.constant 0 : i32
    %c0_i32_1 = arith.constant 0 : i32
    return %arg0, %c0_i32, %c0_i32_0 : i32, i32, i32
  }
  func.func @transform_38(%arg0: i32) -> (i32, i32, i32) {
    %c0_i32 = arith.constant 0 : i32
    %c0_i32_0 = arith.constant 0 : i32
    %c0_i32_1 = arith.constant 0 : i32
    return %arg0, %c0_i32, %c0_i32_0 : i32, i32, i32
  }
}

</mosaic_0001>

<bundles_post_ra>
// kernel: transformer_forward.1
= control target key start
LH: loop header
LB: loop body
LE: loop exit
PB: predicated region body
PF: predicated region fallthrough
CT: control target
= control target key end

     0   :  { %s5441_s6 = smov 1   ;;  %s5442_s10 = smov 2   ;;  %s6403_s0 = inlined_call_operand.smem [shape: u32[39], index: -1, kind: input, shape index: {}] }
   0x1   :  { %s5499_s5 = sld [smem:[%s6403_s0]]   ;;  %s5443_s14 = smov 3  }
   0x2   :  { %s5504_s9 = sld [smem:[%s6403_s0 + %s5441_s6]]   ;;  %s5444_s18 = smov 4  }
   0x3   :  { %s5509_s13 = sld [smem:[%s6403_s0 + %s5442_s10]]   ;;  %s5445_s22 = smov 5  }
   0x4   :  { %s5514_s17 = sld [smem:[%s6403_s0 + %s5443_s14]]   ;;  %s5446_s26 = smov 6  }
   0x5   :  { %s5519_s21 = sld [smem:[%s6403_s0 + %s5444_s18]]   ;;  %s5447_s30 = smov 7  }
   0x6   :  { %s5524_s25 = sld [smem:[%s6403_s0 + %s5445_s22]]   ;;  %s5448_s4 = smov 8  }
   0x7   :  { %6475 = sst [smem:[#allocation8_spill]] %s5499_s5  ;;  %s5449_s10 = smov 9  }
   0x8   :  { %6476 = sst [smem:[#allocation9_spill]] %s5504_s9  ;;  %s5450_s15 = smov 10  }
   0x9   :  { %6477 = sst [smem:[#allocation10_spill]] %s5509_s13  ;;  %s5451_s20 = smov 11  }
   0xa   :  { %6478 = sst [smem:[#allocation11_spill]] %s5514_s17  ;;  %s5453_s1 = smov 13  }
   0xb   :  { %6479 = sst [smem:[#allocation12_spill]] %s5519_s21  ;;  %s5454_s7 = smov 14  }
   0xc   :  { %6480 = sst [smem:[#allocation13_spill]] %s5524_s25  ;;  %s5456_s22 = smov 16  }
   0xd   :  { %s5529_s29 = sld [smem:[%s6403_s0 + %s5446_s26]]   ;;  %s5452_s26 = smov 12  }
   0xe   :  { %s5534_s3 = sld [smem:[%s6403_s0 + %s5447_s30]]   ;;  %s5457_s28 = smov 17  }
   0xf   :  { %s5539_s8 = sld [smem:[%s6403_s0 + %s5448_s4]]  }
  0x10   :  { %s5544_s14 = sld [smem:[%s6403_s0 + %s5449_s10]]  }
  0x11   :  { %s5549_s19 = sld [smem:[%s6403_s0 + %s5450_s15]]   ;;  %s5455_s15 = smov 15  }
  0x12   :  { %s5554_s24 = sld [smem:[%s6403_s0 + %s5451_s20]]  }
  0x13   :  { %6481 = sst [smem:[#allocation14_spill]] %s5529_s29 }
  0x14   :  { %6482 = sst [smem:[#allocation15_spill]] %s5534_s3 }
  0x15   :  { %6483 = sst [smem:[#allocation16_spill]] %s5539_s8 }
  0x16   :  { %6484 = sst [smem:[#allocation17_spill]] %s5544_s14 }
  0x17   :  { %6485 = sst [smem:[#allocation18_spill]] %s5549_s19 }
  0x18   :  { %6486 = sst [smem:[#allocation19_spill]] %s5554_s24 }
  0x19   :  { %s5559_s30 = sld [smem:[%s6403_s0 + %s5452_s26]]  }
  0x1a   :  { %s5564_s6 = sld [smem:[%s6403_s0 + %s5453_s1]]  }
  0x1b   :  { %s5569_s12 = sld [smem:[%s6403_s0 + %s5454_s7]]   ;;  %s5458_s7 = smov 18  }
  0x1c   :  { %s5574_s20 = sld [smem:[%s6403_s0 + %s5455_s15]]   ;;  %s5459_s15 = smov 19  }
  0x1d   :  { %s5579_s27 = sld [smem:[%s6403_s0 + %s5456_s22]]   ;;  %s5460_s22 = smov 20  }
  0x1e   :  { %s5584_s4 = sld [smem:[%s6403_s0 + %s5457_s28]]   ;;  %s5461_s28 = smov 21  }
  0x1f   :  { %6487 = sst [smem:[#allocation20_spill]] %s5559_s30 }
  0x20   :  { %6488 = sst [smem:[#allocation21_spill]] %s5564_s6 }
  0x21   :  { %6489 = sst [smem:[#allocation22_spill]] %s5569_s12 }
  0x22   :  { %6490 = sst [smem:[#allocation23_spill]] %s5574_s20 }
  0x23   :  { %6491 = sst [smem:[#allocation24_spill]] %s5579_s27 }
  0x24   :  { %6492 = sst [smem:[#allocation25_spill]] %s5584_s4 }
  0x25   :  { %s5589_s17 = sld [smem:[%s6403_s0 + %s5458_s7]]   ;;  %s5462_s7 = smov 22  }
  0x26   :  { %s5594_s9 = sld [smem:[%s6403_s0 + %s5459_s15]]   ;;  %s5463_s15 = smov 23  }
  0x27   :  { %s5599_s27 = sld [smem:[%s6403_s0 + %s5460_s22]]   ;;  %s5464_s22 = smov 24  }
  0x28   :  { %s5604_s4 = sld [smem:[%s6403_s0 + %s5461_s28]]   ;;  %s5465_s28 = smov 25  }
  0x2b   :  { %6493 = sst [smem:[#allocation26_spill]] %s5589_s17 }
  0x2c   :  { %6494 = sst [smem:[#allocation27_spill]] %s5594_s9 }
  0x2d   :  { %6495 = sst [smem:[#allocation28_spill]] %s5599_s27 }
  0x2e   :  { %6496 = sst [smem:[#allocation29_spill]] %s5604_s4 }
  0x2f   :  { %s5609_s17 = sld [smem:[%s6403_s0 + %s5462_s7]]   ;;  %s5466_s7 = smov 26  }
  0x30   :  { %s5614_s9 = sld [smem:[%s6403_s0 + %s5463_s15]]   ;;  %s5467_s15 = smov 27  }
  0x31   :  { %s5619_s27 = sld [smem:[%s6403_s0 + %s5464_s22]]   ;;  %s5468_s22 = smov 28  }
  0x32   :  { %s5624_s4 = sld [smem:[%s6403_s0 + %s5465_s28]]   ;;  %s5469_s28 = smov 29  }
  0x35   :  { %6497 = sst [smem:[#allocation30_spill]] %s5609_s17 }
  0x36   :  { %6498 = sst [smem:[#allocation31_spill]] %s5614_s9 }
  0x37   :  { %6499 = sst [smem:[#allocation32_spill]] %s5619_s27 }
  0x38   :  { %6500 = sst [smem:[#allocation33_spill]] %s5624_s4 }
  0x39   :  { %s5629_s17 = sld [smem:[%s6403_s0 + %s5466_s7]]   ;;  %s5470_s7 = smov 30  }
  0x3a   :  { %s5634_s9 = sld [smem:[%s6403_s0 + %s5467_s15]]   ;;  %s5471_s15 = smov 31  }
  0x3b   :  { %s5639_s27 = sld [smem:[%s6403_s0 + %s5468_s22]]   ;;  %s5472_s22 = smov 32  }
  0x3c   :  { %s5644_s4 = sld [smem:[%s6403_s0 + %s5469_s28]]   ;;  %s5473_s28 = smov 33  }
  0x3f   :  { %6501 = sst [smem:[#allocation34_spill]] %s5629_s17 }
  0x40   :  { %6502 = sst [smem:[#allocation35_spill]] %s5634_s9 }
  0x41   :  { %6503 = sst [smem:[#allocation36_spill]] %s5639_s27 }
  0x42   :  { %6504 = sst [smem:[#allocation37_spill]] %s5644_s4 }
  0x43   :  { %s5649_s17 = sld [smem:[%s6403_s0 + %s5470_s7]]   ;;  %s5474_s7 = smov 34  }
  0x44   :  { %s5654_s9 = sld [smem:[%s6403_s0 + %s5471_s15]]   ;;  %s5475_s15 = smov 35  }
  0x45   :  { %s5659_s27 = sld [smem:[%s6403_s0 + %s5472_s22]]   ;;  %s5476_s22 = smov 36  }
  0x46   :  { %s5664_s4 = sld [smem:[%s6403_s0 + %s5473_s28]]   ;;  %s5477_s28 = smov 37  }
  0x49   :  { %6505 = sst [smem:[#allocation38_spill]] %s5649_s17 }
  0x4a   :  { %6506 = sst [smem:[#allocation39_spill]] %s5654_s9 }
  0x4b   :  { %6507 = sst [smem:[#allocation40_spill]] %s5659_s27 }
  0x4c   :  { %6508 = sst [smem:[#allocation41_spill]] %s5664_s4 }
  0x4d   :  { %s5669_s17 = sld [smem:[%s6403_s0 + %s5474_s7]]   ;;  %s5478_s7 = smov 38  }
  0x4e   :  { %s5674_s9 = sld [smem:[%s6403_s0 + %s5475_s15]]  }
  0x4f   :  { %s5679_s27 = sld [smem:[%s6403_s0 + %s5476_s22]]  }
  0x50   :  { %s5684_s4 = sld [smem:[%s6403_s0 + %s5477_s28]]  }
  0x53   :  { %6509 = sst [smem:[#allocation42_spill]] %s5669_s17 }
  0x54   :  { %s5689_s17 = sld [smem:[%s6403_s0 + %s5478_s7]]  }
  0x55   :  { %6510 = sst [smem:[#allocation43_spill]] %s5679_s27 }
  0x56   :  { %6511 = sst [smem:[#allocation44_spill]] %s5684_s4 }
  0x5a   :  { %6512 = sst [smem:[#allocation45_spill]] %s5689_s17 }
  0x5b   :  { %83 = vsyncpa [#allocation3], 0 }
  0x5c   :  { %85 = vsyncpa [#allocation3 + $0x1], 0 }
  0x5d   :  { %86 = vsyncpa [#allocation5], 0 }
  0x5e   :  { %88 = vsyncpa [#allocation5 + $0x1], 0  ;;  %s5691_s15 = smov 0   ;;  %s5693_s16 = smov 0  }
  0x5f   :  { %s5695_s18 = smov 0   ;;  %s5697_s22 = smov 0  }
  0x60 LB: > { %s6513_s20 = sld [smem:[#allocation23_spill]]  ;;  %s5712_s0 = sadd.s32 4294967295, %s5439_s22   ;;  %s5439_s22 = sphi %s5697_s22, %s6587_s22   ;;  %s5435_s18 = sphi %s5695_s18, %s6589_s18   ;;  %s5431_s16 = sphi %s5693_s16, %s6591_s16   ;;  %s5427_s15 = sphi %s5691_s15, %s6590_s15  }
  0x61   : > { %s6514_s12 = sld [smem:[#allocation22_spill]]  ;;  %s4882_s23 = sadd.s32 4294967294, %s5439_s22  }
  0x62   : > { %s6515_s30 = sld [smem:[#allocation20_spill]]  ;;  %s5716_s26 = sadd.s32 1, %s5439_s22  }
  0x63   : > { %s6516_s24 = sld [smem:[#allocation19_spill]]  ;;  %s898_s28 = sadd.s32 1, %s5435_s18 }
  0x64   : > { %s6517_s6 = sld [smem:[#allocation21_spill]]  ;;  %s895_s1 = ssub.s32 %s5439_s22, %s5716_s26 }
  0x65   : > { %s6518_s19 = sld [smem:[#allocation18_spill]]  ;;  %p908_p0 = scmp.ne.s32.totalorder %s5435_s18, %s5431_s16 }
  0x66   : > { %s6519_s14 = sld [smem:[#allocation17_spill]]  ;;  %p896_p1 = scmp.eq.s32.totalorder %s895_s1, 0 }
  0x67   : > { %s6520_s8 = sld [smem:[#allocation16_spill]]  ;;  %p909_p2 = scmp.eq.s32.totalorder %s5712_s0, 1 }
  0x68   : > { %s6521_s29 = sld [smem:[#allocation14_spill]]  ;;  %p914_p3 = scmp.ne.s32.totalorder %s5431_s16, %s5427_s15 }
  0x69   : > { %s6522_s25 = sld [smem:[#allocation13_spill]]  ;;  %p915_p4 = scmp.eq.s32.totalorder %s4882_s23, 1 }
  0x6a   : > { %s6523_s21 = sld [smem:[#allocation12_spill]]  ;;  %p5729_p5 = por %p909_p2, %p908_p0 }
  0x6b   : > { %s6524_s3 = sld [smem:[#allocation15_spill]]  ;;  %p5733_p6 = por %p915_p4, %p914_p3 }
  0x6c   : > { %6525 = sst [smem:[#allocation46_spill]] %s5427_s15  ;;  %p4885_p7 = scmp.ge.s32.totalorder %s5439_s22, 1 }
  0x6d   : > { %6526 = sst [smem:[#allocation47_spill]] %s5435_s18  ;;  %p1085_p8 = scmp.lt.s32.totalorder %s5439_s22, 3 }
  0x6e   : > { %6527 = sst [smem:[#allocation48_spill]] %s5439_s22 }
  0x6f   : > { %6528 = sst [smem:[#allocation49_spill]] %s5712_s0  ;;  %p1086_p9 = pnand %p4885_p7, %p1085_p8 }
  0x70   : > { %6529 = sst [smem:[#allocation50_spill]] %s5716_s26  ;;  %p1194_p10 = scmp.lt.s32.totalorder (!%p1086_p9), %s5712_s0, 1 }
  0x71   : > { %s5727_s2 = scalar_select %p896_p1, %s5435_s18, %s898_s28  }
  0x72   : > { %s6531_s7 = scalar_select %p5729_p5, 1, 0 }
  0x73   : > { %6530 = sst [smem:[#allocation51_spill]] %s5727_s2  ;;  %1089 = sbr.rel (%p1086_p9) target bundleno = 11908 (0x2e84), region = 168 }
  0x74   : > { %6532 = sst [smem:[#allocation52_spill]] %s6531_s7  ;;  %s6440_s2 = smov (!%p1086_p9), 88  }
  0x75   : > { %s6533_s10 = scalar_select %p5733_p6, 1, 0 }
  0x76   : > { %s6535_s13 = sld [smem:[#allocation10_spill]] (!%p1086_p9)  ;;  %s6436_s18 = smov (!%p1086_p9), 96  }
  0x77   : > { %6534 = sst [smem:[#allocation53_spill]] %s6533_s10  ;;  %s6548_s10 = smov (!%p1086_p9), 120  }
  0x78   : > { %s6536_s5 = sld [smem:[#allocation8_spill]]  ;;  %v1215_v0 = vld [vmem:[%s6523_s21 + $0x18] sm:$0xff]  ;;  %v1214_v1 = vld [vmem:[%s6523_s21 + $0x10] sm:$0xff]  ;;  %v1213_v2 = vld [vmem:[%s6523_s21 + $0x8] sm:$0xff]  ;;  %vm1225_vm0 = vcmask 261120   ;;  %vm1252_vm1 = vcmask 64512  }
  0x79   : > { %1241 = vmatpush.msra.mxu0 %v1215_v0  ;;  %s1195_s11 = scalar_select %p1194_p10, %s5712_s0, 1  ;;  %v1212_v3 = vld [vmem:[%s6523_s21] sm:$0xff] }
  0x7a   : > { %v5178_v5 = vld [vmem:[%s6522_s25] ss:$0 sm:$0xff]  ;;  %s6558_s22 = sld [smem:[#allocation31_spill]] }
  0x7b   : > { %1242 = vmatpush.msra.mxu0 %v1214_v1  ;;  %s5745_s23 = sshll.u32 %s1195_s11, 3  ;;  %v1217_v23 = vld [vmem:[%s6521_s29] sm:$0xff]  ;;  %s6560_s7 = sld [smem:[#allocation33_spill]] }
  0x7c   : > { %s5748_s28 = scalar_lea.vmem %s6535_s13, %s1195_s11  ;;  %s6434_s11 = smov 120   ;;  %1350 = vmatpush.msra.mxu3 %v1217_v23 }
  0x7d   : > { %1243 = vmatpush.msra.mxu0 %v1213_v2  ;;  %s6432_s13 = smov 72   ;;  %v5778_v15 = vld [vmem:[%s5748_s28] ss:$0 sm:$0xff]  ;;  %s6565_s0 = sld [smem:[#allocation40_spill]] }
  0x7e   : > { %s1197_s1 = scalar_lea.vmem %s6536_s5, %s5745_s23  ;;  %s6424_s5 = smov 112  }
  0x7f   : > { %v5752_v4 = vld [vmem:[%s1197_s1] sm:$0xff]  ;;  %1244 = vmatpush.msra.mxu0 %v1212_v3  ;;  %s6428_s1 = smov 80   ;;  %s6566_s27 = sld [smem:[#allocation36_spill]] }
  0x80   : > { %4891 = vmatmul.msk.f32.vlgmr.msra.gmra.mxu0 %vm1225_vm0, %v5752_v4  ;;  %s6559_s4 = smov %s6558_s22 }
  0xfd   : > { %v1246_v6 = vpop.f32.mrf.mxu0 }
  0xfe   : > { %v5757_v7 = vadd.f32 %v5178_v5, %v1246_v6  ;;  %v1218_v5 = vld [vmem:[%s6521_s29 + $0x8] sm:$0xff] }
 0x100   : > { %1361 = vrot.lane.b32.xlu2 %v5757_v7, %s6440_s2  ;;  %1250 = vrot.lane.b32.xlu0 %v5757_v7, %s6436_s18 }
 0x108   : > { %1359 = vrot.lane.b32.xlu2 %v5757_v7, %s6434_s11 }
 0x110   : > { %1465 = vrot.lane.b32.xlu2 %v5757_v7, %s6428_s1  ;;  %s6430_s1 = smov 104  }
 0x118   : > { %1463 = vrot.lane.b32.xlu2 %v5757_v7, %s6424_s5  ;;  %s6426_s5 = smov 56  }
 0x120   : > { %1569 = vrot.lane.b32.xlu2 %v5757_v7, %s6432_s13  ;;  %s6442_s13 = smov 48  }
 0x15a   : > { %v1362_v8 = vpop.permute.xlu2 %1361 }
 0x162   : > { %v1360_v9 = vpop.permute.xlu2 %1359 }
 0x16a   : > { %v1466_v10 = vpop.permute.xlu2 %1465 }
 0x16b   : > { %4900 = vmatpush.xpose.msk.msrb.mxu0 %vm1252_vm1, %v1466_v10 }
 0x172   : > { %v1464_v11 = vpop.permute.xlu2 %1463  ;;  %v1251_v12 = vpop.permute.xlu0 %1250 }
 0x173   : > { %4892 = vmatpush.xpose.msk.msra.mxu1 %vm1252_vm1, %v1251_v12  ;;  %4901 = vmatmul.msk.f32.vlgmr.msrb.gmra.mxu0 %vm1252_vm1, %v1464_v11 }
 0x176   : > { %4893 = vmatmul.msk.f32.vlgmr.msra.gmra.mxu1 %vm1252_vm1, %v5757_v7 }
 0x17a   : > { %v1570_v13 = vpop.permute.xlu2 %1569 }
 0x17b   : > { %4904 = vmatpush.xpose.msk.msrb.mxu1 %vm1252_vm1, %v1570_v13 }
 0x1f0   : > { %v1488_v19 = vpop.f32.mrf.mxu0 }
 0x1f1   : > { %v1491_v20 = vmul.f32 0.35355338, %v1488_v19 }
 0x1f3   : > { %v1274_v14 = vpop.f32.mrf.mxu1  ;;  %v1492_v21 = vadd.f32 %v5778_v15, %v1491_v20 }
 0x1f4   : > { %v1277_v16 = vmul.f32 0.35355338, %v1274_v14 }
 0x1f5   : > { %v1493_v22 = vsel %vm1252_vm1, %v1492_v21, -inf }
 0x1f6   : > { %v1281_v17 = vadd.f32 %v5778_v15, %v1277_v16 }
 0x1f8   : > { %v1282_v18 = vsel %vm1252_vm1, %v1281_v17, -inf }
 0x1f9   : > { %1283 = vmax.xlane.f32.xlu0 %v1282_v18 }
 0x20d   : > { %1413 = vrot.lane.b32.xlu0 %v5757_v7, %s6426_s5  ;;  %s6438_s5 = smov 64  }
 0x237   : > { %1494 = vmax.xlane.f32.xlu0 %v1493_v22 }
 0x26c   : > { %v1284_v24 = vpop.xlane.xlu0 %1283 }
 0x26d   : > { %v1285_v25 = vsub.f32 %v1281_v17, %v1284_v24 }
 0x26f   : > { %v1286_v26 = vmul.f32 1.442695, %v1285_v25 }
 0x271   : > { %5220 = vpow2.f32 %v1286_v26 }
 0x277   : > { %v5221_v27 = vpop.eup %5220 }
 0x278   : > { %v1288_v28 = vsel %vm1252_vm1, %v5221_v27, 0.0 }
 0x279   : > { %1289 = vadd.xlane.f32.xlu1 %v1288_v28 }
 0x27f   : > { %v1414_v29 = vpop.permute.xlu0 %1413 }
 0x280   : > { %1434 = vmatpush.msrb.mxu3 %v1414_v29 }
 0x292   : > { %1306 = vrot.lane.b32.xlu1 %v5757_v7, %s6438_s5 }
 0x29a   : > { %1567 = vrot.lane.b32.xlu1 %v5757_v7, %s6430_s1  ;;  %s6445_s1 = smov 40  }
 0x2aa   : > { %v1495_v53 = vpop.xlane.xlu0 %1494 }
 0x2ab   : > { %v1496_v56 = vsub.f32 %v1492_v21, %v1495_v53 }
 0x2ad   : > { %v1497_v58 = vmul.f32 1.442695, %v1496_v56 }
 0x2ec   : > { %v1290_v30 = vpop.xlane.xlu1 %1289 }
 0x2ed   : > { %5222 = vrcp.f32 %v1290_v30  ;;  %v1302_v36 = vand.u32 2147483648, %v1290_v30  ;;  %vm1296_vm3 = vweird.f32 %v1290_v30  ;;  %v1300_v37 = vand.u32 2147483647, %v1290_v30 }
 0x2ef   : > { %v1303_v39 = vor.u32 1.1754944e-38, %v1302_v36  ;;  %vm1301_vm5 = vcmp.eq.f32.partialorder %v1300_v37, 8.507059e+37 }
 0x2f3   : > { %v5223_v31 = vpop.eup %5222 }
 0x2f4   : > { %v1292_v32 = vmul.f32 %v5223_v31, %v1290_v30  ;;  %vm1297_vm2 = vweird.f32 %v5223_v31 }
 0x2f5   : > { %vm1298_vm4 = vmor %vm1296_vm3, %vm1297_vm2 }
 0x2f6   : > { %v1293_v33 = vsub.f32 1.0, %v1292_v32 }
 0x2f8   : > { %v1294_v34 = vmul.f32 %v5223_v31, %v1293_v33 }
 0x2fa   : > { %v1295_v35 = vadd.f32 %v5223_v31, %v1294_v34 }
 0x2fc   : > { %v1299_v38 = vsel %vm1298_vm4, %v5223_v31, %v1295_v35 }
 0x2fd   : > { %v1304_v40 = vsel %vm1301_vm5, %v1303_v39, %v1299_v38 }
 0x2fe   : > { %v1305_v42 = vmul.f32 %v5221_v27, %v1304_v40 }
 0x304   : > { %v1307_v41 = vpop.permute.xlu1 %1306 }
 0x305   : > { %1327 = vmatpush.msra.mxu2 %v1307_v41 }
 0x306   : > { %4894 = vmatmul.msk.f32.vlgmr.msra.gmra.mxu2 %vm1252_vm1, %v1305_v42  ;;  %v1220_v42 = vld [vmem:[%s6521_s29 + $0x18] sm:$0xff] }
 0x307   : > { %4896 = vmatpush.xpose.msk.msrb.mxu2 %vm1252_vm1, %v1362_v8 }
 0x30b   : > { %1457 = vmatpush.msra.mxu2 %v1218_v5 }
 0x30c   : > { %v1568_v43 = vpop.permute.xlu1 %1567 }
 0x30d   : > { %4905 = vmatmul.msk.f32.vlgmr.msrb.gmra.mxu1 %vm1252_vm1, %v1568_v43 }
 0x30e   : > { %4897 = vmatmul.msk.f32.vlgmr.msrb.gmra.mxu2 %vm1252_vm1, %v1360_v9 }
 0x389   : > { %v1329_v44 = vpop.f32.mrf.mxu2 }
 0x38a   : > { %4895 = vmatmul.msk.f32.vlgmr.msra.gmra.mxu3 %vm1252_vm1, %v1329_v44  ;;  %v1592_v47 = vpop.f32.mrf.mxu1 }
 0x38b   : > { %v1595_v49 = vmul.f32 0.35355338, %v1592_v47 }
 0x38d   : > { %v1596_v51 = vadd.f32 %v5778_v15, %v1595_v49  ;;  %v1219_v49 = vld [vmem:[%s6521_s29 + $0x10] sm:$0xff] }
 0x38e   : > { %1561 = vmatpush.msra.mxu3 %v1219_v49 }
 0x38f   : > { %v1597_v52 = vsel %vm1252_vm1, %v1596_v51, -inf }
 0x391   : > { %v1384_v45 = vpop.f32.mrf.mxu2 }
 0x392   : > { %v1387_v46 = vmul.f32 0.35355338, %v1384_v45 }
 0x394   : > { %v1388_v48 = vadd.f32 %v5778_v15, %v1387_v46 }
 0x396   : > { %v1389_v50 = vsel %vm1252_vm1, %v1388_v48, -inf }
 0x397   : > { %1390 = vmax.xlane.f32.xlu2 %v1389_v50 }
 0x39f   : > { %1598 = vmax.xlane.f32.xlu2 %v1597_v52  ;;  %v5179_v52 = vld [vmem:[%s6524_s3] ss:$0 sm:$0xff] }
 0x40a   : > { %v1391_v54 = vpop.xlane.xlu2 %1390 }
 0x40b   : > { %v1392_v55 = vsub.f32 %v1388_v48, %v1391_v54 }
 0x40d   : > { %v1393_v57 = vmul.f32 1.442695, %v1392_v55  ;;  %v1352_v37 = vpop.f32.mrf.mxu3 }
 0x40e   : > { %v1358_v53 = vadd.f32 %v5179_v52, %v1352_v37  ;;  %v5182_v37 = vld [vmem:[%s6516_s24] ss:$0 sm:$0xff]  ;;  %v4912_v52 = vld [vmem:[%s6523_s21 + $0x30] sm:$0xff] }
 0x40f   : > { %5224 = vpow2.f32 %v1393_v57 }
 0x410   : > { %5226 = vpow2.f32 %v1497_v58 }
 0x412   : > { %v1599_v59 = vpop.xlane.xlu2 %1598 }
 0x413   : > { %v1600_v60 = vsub.f32 %v1596_v51, %v1599_v59 }
 0x415   : > { %v5225_v61 = vpop.eup %5224  ;;  %v1601_v62 = vmul.f32 1.442695, %v1600_v60 }
 0x416   : > { %v1395_v63 = vsel %vm1252_vm1, %v5225_v61, 0.0  ;;  %v5802_v0 = vpop.eup %5226 }
 0x417   : > { %5228 = vpow2.f32 %v1601_v62  ;;  %1396 = vadd.xlane.f32.xlu1 %v1395_v63  ;;  %v1499_v3 = vsel %vm1252_vm1, %v5802_v0, 0.0 }
 0x41d   : > { %v5229_v1 = vpop.eup %5228 }
 0x41e   : > { %v1603_v2 = vsel %vm1252_vm1, %v5229_v1, 0.0 }
 0x41f   : > { %1604 = vadd.xlane.f32.xlu2 %v1603_v2  ;;  %1500 = vadd.xlane.f32.xlu1 %v1499_v3 }
 0x437   : > { %1621 = vrot.lane.b32.xlu2 %v5757_v7, %s6445_s1 }
 0x438   : > { %1517 = vrot.lane.b32.xlu1 %v5757_v7, %s6442_s13  ;;  %s6541_s13 = smov 104  }
 0x48a   : > { %v1397_v6 = vpop.xlane.xlu1 %1396 }
 0x48b   : > { %5230 = vrcp.f32 %v1397_v6  ;;  %v1409_v12 = vand.u32 2147483648, %v1397_v6  ;;  %v1407_v14 = vand.u32 2147483647, %v1397_v6  ;;  %vm1403_vm7 = vweird.f32 %v1397_v6 }
 0x48d   : > { %v1410_v18 = vor.u32 1.1754944e-38, %v1409_v12  ;;  %vm1408_vm9 = vcmp.eq.f32.partialorder %v1407_v14, 8.507059e+37  ;;  %v1712_v12 = vld [vmem:[%s6518_s19 + $0x8] sm:$0xff]  ;;  %v1723_v14 = vld [vmem:[%s6515_s30 + $0x38] sm:$0xff] }
 0x48e   : > { %1767 = vmatpush.msra.mxu1 %v1723_v14 }
 0x491   : > { %v5231_v8 = vpop.eup %5230 }
 0x492   : > { %v1399_v9 = vmul.f32 %v5231_v8, %v1397_v6  ;;  %v1605_v10 = vpop.xlane.xlu2 %1604  ;;  %vm1404_vm6 = vweird.f32 %v5231_v8  ;;  %v1501_v30 = vpop.xlane.xlu1 %1500 }
 0x493   : > { %5232 = vrcp.f32 %v1605_v10  ;;  %vm1405_vm8 = vmor %vm1403_vm7, %vm1404_vm6  ;;  %v1617_v24 = vand.u32 2147483648, %v1605_v10  ;;  %v1615_v26 = vand.u32 2147483647, %v1605_v10  ;;  %vm1611_vm11 = vweird.f32 %v1605_v10 }
 0x494   : > { %v1400_v11 = vsub.f32 1.0, %v1399_v9  ;;  %5234 = vrcp.f32 %v1501_v30  ;;  %v1513_v40 = vand.u32 2147483648, %v1501_v30  ;;  %vm1507_vm15 = vweird.f32 %v1501_v30 }
 0x495   : > { %v1618_v28 = vor.u32 1.1754944e-38, %v1617_v24  ;;  %vm1616_vm13 = vcmp.eq.f32.partialorder %v1615_v26, 8.507059e+37  ;;  %v1511_v41 = vand.u32 2147483647, %v1501_v30 }
 0x496   : > { %v1401_v13 = vmul.f32 %v5231_v8, %v1400_v11  ;;  %v1514_v45 = vor.u32 1.1754944e-38, %v1513_v40  ;;  %v1713_v11 = vld [vmem:[%s6518_s19 + $0x10] sm:$0xff] }
 0x497   : > { %vm1512_vm3 = vcmp.eq.f32.partialorder %v1511_v41, 8.507059e+37  ;;  %v5183_v41 = vld [vmem:[%s6517_s6] ss:$0 sm:$0xff] }
 0x498   : > { %v1402_v16 = vadd.f32 %v5231_v8, %v1401_v13  ;;  %v1711_v13 = vld [vmem:[%s6518_s19] sm:$0xff] }
 0x499   : > { %v5233_v17 = vpop.eup %5232 }
 0x49a   : > { %v1607_v7 = vmul.f32 %v5233_v17, %v1605_v10  ;;  %v1622_v19 = vpop.permute.xlu2 %1621  ;;  %v1406_v20 = vsel %vm1405_vm8, %v5231_v8, %v1402_v16  ;;  %vm1612_vm10 = vweird.f32 %v5233_v17  ;;  %v5235_v34 = vpop.eup %5234  ;;  %v1714_v10 = vld [vmem:[%s6518_s19 + $0x18] sm:$0xff]  ;;  %v1722_v16 = vld [vmem:[%s6515_s30 + $0x30] sm:$0xff]  ;;  %vm1755_vm8 = vcmask 523264  }
 0x49b   : > { %1642 = vmatpush.msra.mxu0 %v1622_v19  ;;  %v1411_v21 = vsel %vm1408_vm9, %v1410_v18, %v1406_v20  ;;  %vm1613_vm12 = vmor %vm1611_vm11, %vm1612_vm10  ;;  %v1503_v35 = vmul.f32 %v5235_v34, %v1501_v30  ;;  %vm1508_vm14 = vweird.f32 %v5235_v34  ;;  %1768 = vmatpush.msra.mxu1 %v1722_v16  ;;  %v1720_v19 = vld [vmem:[%s6515_s30 + $0x20] sm:$0xff] }
 0x49c   : > { %v1608_v22 = vsub.f32 1.0, %v1607_v7  ;;  %v1412_v23 = vmul.f32 %v5225_v61, %v1411_v21  ;;  %vm1509_vm2 = vmor %vm1507_vm15, %vm1508_vm14  ;;  %v5490_v61 = vmov 32.0   ;;  %v1719_v21 = vld [vmem:[%s6515_s30 + $0x18] sm:$0xff] }
 0x49d   : > { %v1504_v36 = vsub.f32 1.0, %v1503_v35  ;;  %5236 = vrcp.f32 %v5490_v61  ;;  %v1717_v35 = vld [vmem:[%s6515_s30 + $0x8] sm:$0xff] }
 0x49e   : > { %v1609_v25 = vmul.f32 %v5233_v17, %v1608_v22  ;;  %4898 = vmatmul.msk.f32.vlgmr.msrb.gmra.mxu3 %vm1252_vm1, %v1412_v23 }
 0x49f   : > { %v1505_v38 = vmul.f32 %v5235_v34, %v1504_v36  ;;  %1743 = vmatpush.msrb.mxu3 %v1714_v10  ;;  %v1716_v36 = vld [vmem:[%s6515_s30] sm:$0xff] }
 0x4a0   : > { %v1610_v27 = vadd.f32 %v5233_v17, %v1609_v25 }
 0x4a1   : > { %v1506_v39 = vadd.f32 %v5235_v34, %v1505_v38  ;;  %1744 = vmatpush.msrb.mxu3 %v1713_v11 }
 0x4a2   : > { %v1614_v29 = vsel %vm1613_vm12, %v5233_v17, %v1610_v27  ;;  %v1721_v17 = vld [vmem:[%s6515_s30 + $0x28] sm:$0xff] }
 0x4a3   : > { %v1619_v31 = vsel %vm1616_vm13, %v1618_v28, %v1614_v29  ;;  %v1510_v44 = vsel %vm1509_vm2, %v5235_v34, %v1506_v39  ;;  %v5237_v62 = vpop.eup %5236  ;;  %1745 = vmatpush.msrb.mxu3 %v1712_v12  ;;  %1769 = vmatpush.msra.mxu1 %v1721_v17  ;;  %v5180_v28 = vld [vmem:[%s6520_s8] ss:$0 sm:$0xff]  ;;  %v1718_v34 = vld [vmem:[%s6515_s30 + $0x10] sm:$0xff] }
 0x4a4   : > { %v1620_v32 = vmul.f32 %v5229_v1, %v1619_v31  ;;  %v1515_v46 = vsel %vm1512_vm3, %v1514_v45, %v1510_v44  ;;  %v1678_v63 = vmul.f32 32.0, %v5237_v62  ;;  %vm1682_vm4 = vweird.f32 %v5237_v62  ;;  %v5181_v31 = vld [vmem:[%s6519_s14] ss:$0 sm:$0xff] }
 0x4a5   : > { %v1516_v47 = vmul.f32 %v5802_v0, %v1515_v46  ;;  %1746 = vmatpush.msrb.mxu3 %v1711_v13  ;;  %1770 = vmatpush.msra.mxu1 %v1720_v19 }
 0x4a6   : > { %4906 = vmatmul.msk.f32.vlgmr.msra.gmra.mxu0 %vm1252_vm1, %v1620_v32  ;;  %v1679_v0 = vsub.f32 1.0, %v1678_v63 }
 0x4a7   : > { %1771 = vmatpush.msra.mxu1 %v1719_v21 }
 0x4a8   : > { %v1680_v1 = vmul.f32 %v5237_v62, %v1679_v0  ;;  %v5184_v0 = vld [vmem:[%s6514_s12] ss:$0 sm:$0xff] }
 0x4a9   : > { %1772 = vmatpush.msra.mxu1 %v1718_v34 }
 0x4aa   : > { %v1518_v33 = vpop.permute.xlu1 %1517  ;;  %v1681_v2 = vadd.f32 %v5237_v62, %v1680_v1 }
 0x4ab   : > { %1538 = vmatpush.msrb.mxu2 %v1518_v33  ;;  %1773 = vmatpush.msra.mxu1 %v1717_v35 }
 0x4ac   : > { %v5824_v3 = vsel %vm1682_vm4, %v5237_v62, %v1681_v2 }
 0x4ad   : > { %1774 = vmatpush.msra.mxu1 %v1716_v36 }
 0x521   : > { %v1436_v43 = vpop.f32.mrf.mxu3 }
 0x522   : > { %4899 = vmatmul.msk.f32.vlgmr.msra.gmra.mxu2 %vm1252_vm1, %v1436_v43 }
 0x523   : > { %1665 = vmatpush.msra.mxu2 %v1220_v42  ;;  %v1644_v48 = vpop.f32.mrf.mxu0 }
 0x52a   : > { %4902 = vmatmul.msk.f32.vlgmr.msrb.gmra.mxu2 %vm1252_vm1, %v1516_v47 }
 0x532   : > { %4907 = vmatmul.msk.f32.vlgmr.msra.gmra.mxu2 %vm1252_vm1, %v1644_v48 }
 0x5a5   : > { %v1459_v50 = vpop.f32.mrf.mxu2 }
 0x5a6   : > { %v1462_v54 = vadd.f32 %v1459_v50, %v1358_v53  ;;  %v4911_v53 = vld [vmem:[%s6523_s21 + $0x28] sm:$0xff] }
 0x5ad   : > { %v1540_v51 = vpop.f32.mrf.mxu2 }
 0x5ae   : > { %4903 = vmatmul.msk.f32.vlgmr.msra.gmra.mxu3 %vm1252_vm1, %v1540_v51  ;;  %v4913_v51 = vld [vmem:[%s6523_s21 + $0x38] sm:$0xff] }
 0x5af   : > { %1844 = vmatpush.msrb.mxu0 %v4913_v51 }
 0x5b1   : > { %1845 = vmatpush.msrb.mxu0 %v4912_v52 }
 0x5b3   : > { %1846 = vmatpush.msrb.mxu0 %v4911_v53 }
 0x5b5   : > { %v1667_v57 = vpop.f32.mrf.mxu2 }
 0x631   : > { %v1563_v55 = vpop.f32.mrf.mxu3 }
 0x632   : > { %v1566_v56 = vadd.f32 %v1563_v55, %v1462_v54  ;;  %v4910_v54 = vld [vmem:[%s6523_s21 + $0x20] sm:$0xff]  ;;  %s6544_s21 = sld [smem:[#allocation9_spill]] }
 0x633   : > { %1847 = vmatpush.msrb.mxu0 %v4910_v54 }
 0x634   : > { %v1670_v58 = vadd.f32 %v1667_v57, %v1566_v56 }
 0x636   : > { %v1671_v59 = vadd.f32 %v1670_v58, %v5752_v4 }
 0x638   : > { %v1674_v60 = vsel %vm1225_vm0, %v1671_v59, 0.0  ;;  %s1201_s26 = scalar_lea.vmem %s6544_s21, %s5745_s23  ;;  %s6546_s21 = smov 88  }
 0x639   : > { %1675 = vadd.xlane.f32.xlu0 %v1674_v60 }
 0x6ac   : > { %v1676_v4 = vpop.xlane.xlu0 %1675 }
 0x6ad   : > { %v1684_v5 = vmul.f32 %v5824_v3, %v1676_v4  ;;  %v5185_v4 = vld [vmem:[%s6513_s20] ss:$0 sm:$0xff] }
 0x6af   : > { %v1685_v6 = vsub.f32 %v1671_v59, %v1684_v5 }
 0x6b1   : > { %v1686_v8 = vmul.f32 %v1685_v6, %v1685_v6 }
 0x6b3   : > { %v1687_v9 = vsel %vm1225_vm0, %v1686_v8, 0.0  ;;  %v5186_v8 = vld [vmem:[%s6522_s25 + $0x1] ss:$0 sm:$0xff]  ;;  %s6545_s25 = sld [smem:[#allocation25_spill]] }
 0x6b4   : > { %1688 = vadd.xlane.f32.xlu1 %v1687_v9 }
 0x727   : > { %v1689_v18 = vpop.xlane.xlu1 %1688 }
 0x728   : > { %v1690_v7 = vmul.f32 %v1689_v18, %v5824_v3 }
 0x72a   : > { %v1691_v20 = vadd.f32 1e-05, %v1690_v7 }
 0x72c   : > { %5238 = vrsqrt.f32 %v1691_v20  ;;  %vm1698_vm6 = vweird.f32 %v1691_v20 }
 0x732   : > { %v5239_v22 = vpop.eup %5238 }
 0x733   : > { %v1693_v23 = vmul.f32 %v5239_v22, %v1691_v20  ;;  %vm1699_vm5 = vweird.f32 %v5239_v22 }
 0x734   : > { %vm1700_vm7 = vmor %vm1698_vm6, %vm1699_vm5 }
 0x735   : > { %v1694_v24 = vmul.f32 %v5239_v22, %v1693_v23 }
 0x737   : > { %v1695_v25 = vmul.f32 0.5, %v1694_v24 }
 0x739   : > { %v1696_v26 = vsub.f32 1.5, %v1695_v25  ;;  %v4915_v25 = vld [vmem:[%s6521_s29 + $0x20] sm:$0xff] }
 0x73a   : > { %1949 = vmatpush.msra.mxu0 %v4915_v25 }
 0x73b   : > { %v1697_v27 = vmul.f32 %v5239_v22, %v1696_v26 }
 0x73d   : > { %v1701_v29 = vsel %vm1700_vm7, %v5239_v22, %v1697_v27  ;;  %v4916_v22 = vld [vmem:[%s6521_s29 + $0x28] sm:$0xff] }
 0x73e   : > { %v1702_v30 = vmul.f32 %v1701_v29, %v1685_v6  ;;  %2056 = vmatpush.msrb.mxu1 %v4916_v22 }
 0x740   : > { %v1706_v32 = vmul.f32 %v5180_v28, %v1702_v30 }
 0x742   : > { %v1710_v33 = vadd.f32 %v5181_v31, %v1706_v32 }
 0x744   : > { %4908 = vmatmul.msk.f32.vlgmr.msrb.gmra.mxu3 %vm1225_vm0, %v1710_v33 }
 0x7c7   : > { %v1748_v38 = vpop.f32.mrf.mxu3 }
 0x7c8   : > { %v1749_v39 = vadd.f32 %v5182_v37, %v1748_v38 }
 0x7ca   : > { %v1751_v40 = vmax.f32 %v1749_v39, 0.0 }
 0x7cc   : > { %4909 = vmatmul.msk.f32.vlgmr.msra.gmra.mxu1 %vm1755_vm8, %v1751_v40 }
 0x849   : > { %v1776_v42 = vpop.f32.mrf.mxu1 }
 0x84a   : > { %v1777_v43 = vadd.f32 %v5183_v41, %v1776_v42 }
 0x84c   : > { %v1779_v44 = vadd.f32 %v1777_v43, %v1710_v33 }
 0x84e   : > { %v1782_v45 = vsel %vm1225_vm0, %v1779_v44, 0.0 }
 0x84f   : > { %1783 = vadd.xlane.f32.xlu0 %v1782_v45 }
 0x8c2   : > { %v1784_v46 = vpop.xlane.xlu0 %1783 }
 0x8c3   : > { %v1785_v47 = vmul.f32 %v1784_v46, %v5824_v3 }
 0x8c5   : > { %v1786_v48 = vsub.f32 %v1779_v44, %v1785_v47 }
 0x8c7   : > { %v1787_v49 = vmul.f32 %v1786_v48, %v1786_v48 }
 0x8c9   : > { %v1788_v50 = vsel %vm1225_vm0, %v1787_v49, 0.0 }
 0x8ca   : > { %1789 = vadd.xlane.f32.xlu2 %v1788_v50 }
 0x93d   : > { %v1790_v55 = vpop.xlane.xlu2 %1789 }
 0x93e   : > { %v1791_v56 = vmul.f32 %v1790_v55, %v5824_v3 }
 0x940   : > { %v1792_v57 = vadd.f32 1e-05, %v1791_v56 }
 0x942   : > { %5240 = vrsqrt.f32 %v1792_v57  ;;  %vm1799_vm10 = vweird.f32 %v1792_v57 }
 0x948   : > { %v5241_v58 = vpop.eup %5240 }
 0x949   : > { %v1794_v59 = vmul.f32 %v5241_v58, %v1792_v57  ;;  %vm1800_vm9 = vweird.f32 %v5241_v58 }
 0x94a   : > { %vm1801_vm11 = vmor %vm1799_vm10, %vm1800_vm9 }
 0x94b   : > { %v1795_v60 = vmul.f32 %v5241_v58, %v1794_v59 }
 0x94d   : > { %v1796_v61 = vmul.f32 0.5, %v1795_v60 }
 0x94f   : > { %v1797_v62 = vsub.f32 1.5, %v1796_v61 }
 0x951   : > { %v1798_v63 = vmul.f32 %v5241_v58, %v1797_v62 }
 0x953   : > { %v1802_v1 = vsel %vm1801_vm11, %v5241_v58, %v1798_v63 }
 0x954   : > { %v1803_v2 = vmul.f32 %v1802_v1, %v1786_v48 }
 0x956   : > { %v1807_v5 = vmul.f32 %v5184_v0, %v1803_v2 }
 0x958   : > { %v5857_v6 = vadd.f32 %v5185_v4, %v1807_v5 }
 0x95a   : > { %4920 = vmatmul.msk.f32.vlgmr.msrb.gmra.mxu0 %vm1225_vm0, %v5857_v6 }
 0x9d7   : > { %v1849_v9 = vpop.f32.mrf.mxu0 }
 0x9d8   : > { %v5862_v10 = vadd.f32 %v5186_v8, %v1849_v9 }
 0x9da   : > { %1853 = vrot.lane.b32.xlu0 %v5862_v10, %s6436_s18  ;;  %s6538_s18 = smov 80  }
 0x9e2   : > { %1960 = vrot.lane.b32.xlu0 %v5862_v10, %s6440_s2  ;;  %s6540_s2 = smov 56  }
 0x9ea   : > { %1958 = vrot.lane.b32.xlu0 %v5862_v10, %s6434_s11  ;;  %s6537_s11 = smov 72  }
 0xa4c   : > { %v1854_v11 = vpop.permute.xlu0 %1853 }
 0xa4d   : > { %4921 = vmatpush.xpose.msk.msrb.mxu2 %vm1252_vm1, %v1854_v11  ;;  %v5187_v11 = vld [vmem:[%s6524_s3 + $0x1] ss:$0 sm:$0xff]  ;;  %s6542_s3 = sld [smem:[#allocation24_spill]] }
 0xa50   : > { %4922 = vmatmul.msk.f32.vlgmr.msrb.gmra.mxu2 %vm1252_vm1, %v5862_v10 }
 0xa54   : > { %v1961_v12 = vpop.permute.xlu0 %1960 }
 0xa55   : > { %4925 = vmatpush.xpose.msk.msra.mxu2 %vm1252_vm1, %v1961_v12 }
 0xa5c   : > { %v1959_v13 = vpop.permute.xlu0 %1958 }
 0xa5d   : > { %4926 = vmatmul.msk.f32.vlgmr.msra.gmra.mxu2 %vm1252_vm1, %v1959_v13 }
 0xad3   : > { %v1876_v14 = vpop.f32.mrf.mxu2 }
 0xad4   : > { %v1879_v16 = vmul.f32 0.35355338, %v1876_v14 }
 0xad6   : > { %v1880_v17 = vadd.f32 %v5778_v15, %v1879_v16 }
 0xad8   : > { %v1881_v18 = vsel %vm1252_vm1, %v1880_v17, -inf }
 0xad9   : > { %1882 = vmax.xlane.f32.xlu1 %v1881_v18 }
 0xae0   : > { %v1983_v7 = vpop.f32.mrf.mxu2 }
 0xae1   : > { %v1986_v19 = vmul.f32 0.35355338, %v1983_v7 }
 0xae3   : > { %v1987_v20 = vadd.f32 %v5778_v15, %v1986_v19 }
 0xae5   : > { %v1988_v21 = vsel %vm1252_vm1, %v1987_v20, -inf }
 0xae6   : > { %1989 = vmax.xlane.f32.xlu2 %v1988_v21 }
 0xafe   : > { %1905 = vrot.lane.b32.xlu2 %v5862_v10, %s6438_s5  ;;  %s6539_s5 = smov 112  }
 0xb06   : > { %2168 = vrot.lane.b32.xlu2 %v5862_v10, %s6537_s11 }
 0xb0e   : > { %2064 = vrot.lane.b32.xlu2 %v5862_v10, %s6538_s18 }
 0xb4c   : > { %v1883_v23 = vpop.xlane.xlu1 %1882 }
 0xb4d   : > { %v1884_v24 = vsub.f32 %v1880_v17, %v1883_v23 }
 0xb4f   : > { %v1885_v26 = vmul.f32 1.442695, %v1884_v24 }
 0xb51   : > { %5242 = vpow2.f32 %v1885_v26 }
 0xb57   : > { %v5243_v27 = vpop.eup %5242 }
 0xb58   : > { %v1887_v28 = vsel %vm1252_vm1, %v5243_v27, 0.0 }
 0xb59   : > { %1888 = vadd.xlane.f32.xlu0 %v1887_v28  ;;  %v1990_v29 = vpop.xlane.xlu2 %1989 }
 0xb5a   : > { %v1991_v30 = vsub.f32 %v1987_v20, %v1990_v29 }
 0xb5c   : > { %v1992_v31 = vmul.f32 1.442695, %v1991_v30 }
 0xb5e   : > { %5244 = vpow2.f32 %v1992_v31  ;;  %v2415_v31 = vld [vmem:[%s6542_s3 + $0x18] sm:$0xff] }
 0xb61   : > { %v1906_v32 = vpop.permute.xlu2 %1905 }
 0xb62   : > { %1926 = vmatpush.msra.mxu3 %v1906_v32  ;;  %v2414_v32 = vld [vmem:[%s6542_s3 + $0x10] sm:$0xff] }
 0xb64   : > { %v5245_v33 = vpop.eup %5244 }
 0xb65   : > { %v1994_v34 = vsel %vm1252_vm1, %v5245_v33, 0.0 }
 0xb66   : > { %1995 = vadd.xlane.f32.xlu1 %v1994_v34 }
 0xb69   : > { %v2169_v35 = vpop.permute.xlu2 %2168 }
 0xb6a   : > { %4933 = vmatpush.xpose.msk.msra.mxu1 %vm1252_vm1, %v2169_v35  ;;  %v2413_v35 = vld [vmem:[%s6542_s3 + $0x8] sm:$0xff] }
 0xb6d   : > { %2062 = vrot.lane.b32.xlu0 %v5862_v10, %s6539_s5 }
 0xb71   : > { %v2065_v36 = vpop.permute.xlu2 %2064 }
 0xb72   : > { %4929 = vmatpush.xpose.msk.msrb.mxu0 %vm1252_vm1, %v2065_v36 }
 0xb7f   : > { %2012 = vrot.lane.b32.xlu1 %v5862_v10, %s6540_s2 }
 0xb87   : > { %2166 = vrot.lane.b32.xlu1 %v5862_v10, %s6541_s13 }
 0xbcc   : > { %v1889_v37 = vpop.xlane.xlu0 %1888 }
 0xbcd   : > { %5246 = vrcp.f32 %v1889_v37  ;;  %v1901_v41 = vand.u32 2147483648, %v1889_v37  ;;  %v1899_v43 = vand.u32 2147483647, %v1889_v37  ;;  %vm1895_vm13 = vweird.f32 %v1889_v37 }
 0xbcf   : > { %v1902_v46 = vor.u32 1.1754944e-38, %v1901_v41  ;;  %vm1900_vm15 = vcmp.eq.f32.partialorder %v1899_v43, 8.507059e+37 }
 0xbd3   : > { %v5247_v38 = vpop.eup %5246 }
 0xbd4   : > { %v1891_v39 = vmul.f32 %v5247_v38, %v1889_v37  ;;  %vm1896_vm12 = vweird.f32 %v5247_v38 }
 0xbd5   : > { %vm1897_vm14 = vmor %vm1895_vm13, %vm1896_vm12 }
 0xbd6   : > { %v1892_v40 = vsub.f32 1.0, %v1891_v39 }
 0xbd8   : > { %v1893_v42 = vmul.f32 %v5247_v38, %v1892_v40 }
 0xbd9   : > { %v1996_v44 = vpop.xlane.xlu1 %1995 }
 0xbda   : > { %v1894_v45 = vadd.f32 %v5247_v38, %v1893_v42  ;;  %5248 = vrcp.f32 %v1996_v44  ;;  %v2008_v55 = vand.u32 2147483648, %v1996_v44  ;;  %vm2002_vm3 = vweird.f32 %v1996_v44 }
 0xbdb   : > { %v2006_v56 = vand.u32 2147483647, %v1996_v44 }
 0xbdc   : > { %v1898_v47 = vsel %vm1897_vm14, %v5247_v38, %v1894_v45  ;;  %v2009_v58 = vor.u32 1.1754944e-38, %v2008_v55  ;;  %v2412_v38 = vld [vmem:[%s6542_s3] sm:$0xff] }
 0xbdd   : > { %v1903_v48 = vsel %vm1900_vm15, %v1902_v46, %v1898_v47  ;;  %vm2007_vm5 = vcmp.eq.f32.partialorder %v2006_v56, 8.507059e+37 }
 0xbde   : > { %v1904_v49 = vmul.f32 %v5243_v27, %v1903_v48 }
 0xbdf   : > { %v2063_v63 = vpop.permute.xlu0 %2062 }
 0xbe0   : > { %v5249_v50 = vpop.eup %5248  ;;  %4923 = vmatmul.msk.f32.vlgmr.msra.gmra.mxu3 %vm1252_vm1, %v1904_v49 }
 0xbe1   : > { %v1998_v51 = vmul.f32 %v5249_v50, %v1996_v44  ;;  %vm2003_vm2 = vweird.f32 %v5249_v50 }
 0xbe2   : > { %vm2004_vm4 = vmor %vm2002_vm3, %vm2003_vm2 }
 0xbe3   : > { %v1999_v52 = vsub.f32 1.0, %v1998_v51 }
 0xbe5   : > { %v2000_v53 = vmul.f32 %v5249_v50, %v1999_v52 }
 0xbe7   : > { %v2001_v54 = vadd.f32 %v5249_v50, %v2000_v53 }
 0xbe9   : > { %v2005_v57 = vsel %vm2004_vm4, %v5249_v50, %v2001_v54 }
 0xbea   : > { %v2010_v59 = vsel %vm2007_vm5, %v2009_v58, %v2005_v57  ;;  %v5924_v57 = vld [vmem:[%s1201_s26] sm:$0xff]  ;;  %v4917_v58 = vld [vmem:[%s6521_s29 + $0x30] sm:$0xff]  ;;  %s6547_s26 = smov 96  }
 0xbeb   : > { %v2011_v61 = vmul.f32 %v5245_v33, %v2010_v59  ;;  %v4918_v59 = vld [vmem:[%s6521_s29 + $0x38] sm:$0xff]  ;;  %s6549_s29 = sld [smem:[#allocation11_spill]] }
 0xbf1   : > { %v2013_v60 = vpop.permute.xlu1 %2012  ;;  %s5952_s15 = scalar_lea.vmem %s6549_s29, %s5745_s23  ;;  %s6550_s29 = smov 64  }
 0xbf2   : > { %2033 = vmatpush.msrb.mxu3 %v2013_v60  ;;  %s6551_s23 = sld [smem:[#allocation26_spill]] }
 0xbf3   : > { %4927 = vmatmul.msk.f32.vlgmr.msrb.gmra.mxu3 %vm1252_vm1, %v2011_v61 }
 0xbf4   : > { %2160 = vmatpush.msra.mxu3 %v4917_v58  ;;  %v4949_v58 = vld [vmem:[%s6515_s30 + $0x68] sm:$0xff] }
 0xbf9   : > { %v2167_v1 = vpop.permute.xlu1 %2166 }
 0xc63   : > { %v1928_v62 = vpop.f32.mrf.mxu3 }
 0xc64   : > { %4924 = vmatmul.msk.f32.vlgmr.msra.gmra.mxu0 %vm1252_vm1, %v1928_v62  ;;  %v5188_v62 = vld [vmem:[%s6545_s25] ss:$0 sm:$0xff] }
 0xc6c   : > { %4930 = vmatmul.msk.f32.vlgmr.msrb.gmra.mxu0 %vm1252_vm1, %v2063_v63 }
 0xc76   : > { %v2035_v0 = vpop.f32.mrf.mxu3 }
 0xc77   : > { %4928 = vmatmul.msk.f32.vlgmr.msrb.gmra.mxu1 %vm1252_vm1, %v2035_v0 }
 0xc7f   : > { %4934 = vmatmul.msk.f32.vlgmr.msra.gmra.mxu1 %vm1252_vm1, %v2167_v1 }
 0xce1   : > { %v1951_v2 = vpop.f32.mrf.mxu0 }
 0xce2   : > { %v1957_v12 = vadd.f32 %v5187_v11, %v1951_v2 }
 0xce9   : > { %v2087_v4 = vpop.f32.mrf.mxu0 }
 0xcea   : > { %v2090_v5 = vmul.f32 0.35355338, %v2087_v4 }
 0xcec   : > { %v2091_v8 = vadd.f32 %v5778_v15, %v2090_v5 }
 0xcee   : > { %v2092_v9 = vsel %vm1252_vm1, %v2091_v8, -inf }
 0xcef   : > { %2093 = vmax.xlane.f32.xlu2 %v2092_v9 }
 0xcf4   : > { %v2058_v13 = vpop.f32.mrf.mxu1 }
 0xcf5   : > { %v5906_v14 = vadd.f32 %v2058_v13, %v1957_v12 }
 0xcfc   : > { %v2191_v16 = vpop.f32.mrf.mxu1 }
 0xcfd   : > { %v2194_v17 = vmul.f32 0.35355338, %v2191_v16 }
 0xcff   : > { %v2195_v18 = vadd.f32 %v5778_v15, %v2194_v17 }
 0xd01   : > { %v2196_v7 = vsel %vm1252_vm1, %v2195_v18, -inf }
 0xd02   : > { %2197 = vmax.xlane.f32.xlu1 %v2196_v7 }
 0xd1b   : > { %2220 = vrot.lane.b32.xlu1 %v5862_v10, %s6445_s1  ;;  %s6543_s1 = smov 48  }
 0xd62   : > { %v2094_v19 = vpop.xlane.xlu2 %2093 }
 0xd63   : > { %v2095_v20 = vsub.f32 %v2091_v8, %v2094_v19  ;;  %v5955_v19 = vld [vmem:[%s5952_s15] sm:$0xff] }
 0xd65   : > { %v2096_v21 = vmul.f32 1.442695, %v2095_v20 }
 0xd67   : > { %5250 = vpow2.f32 %v2096_v21 }
 0xd6d   : > { %v5251_v22 = vpop.eup %5250 }
 0xd6e   : > { %v2098_v23 = vsel %vm1252_vm1, %v5251_v22, 0.0 }
 0xd6f   : > { %2099 = vadd.xlane.f32.xlu2 %v2098_v23 }
 0xd75   : > { %v2198_v24 = vpop.xlane.xlu1 %2197 }
 0xd76   : > { %v2199_v25 = vsub.f32 %v2195_v18, %v2198_v24 }
 0xd78   : > { %v2200_v26 = vmul.f32 1.442695, %v2199_v25 }
 0xd7a   : > { %5252 = vpow2.f32 %v2200_v26 }
 0xd80   : > { %v5253_v15 = vpop.eup %5252 }
 0xd81   : > { %v2202_v27 = vsel %vm1252_vm1, %v5253_v15, 0.0 }
 0xd82   : > { %2203 = vadd.xlane.f32.xlu0 %v2202_v27  ;;  %v4941_v27 = vld [vmem:[%s6518_s19 + $0x30] sm:$0xff] }
 0xd87   : > { %2116 = vrot.lane.b32.xlu2 %v5862_v10, %s6543_s1 }
 0xd8d   : > { %v2221_v28 = vpop.permute.xlu1 %2220 }
 0xd8e   : > { %2241 = vmatpush.msra.mxu0 %v2221_v28  ;;  %v4940_v28 = vld [vmem:[%s6518_s19 + $0x28] sm:$0xff] }
 0xd90   : > { %2440 = vmatpush.msrb.mxu0 %v2415_v31 }
 0xd92   : > { %2441 = vmatpush.msrb.mxu0 %v2414_v32 }
 0xd94   : > { %2442 = vmatpush.msrb.mxu0 %v2413_v35 }
 0xd96   : > { %2443 = vmatpush.msrb.mxu0 %v2412_v38 }
 0xde2   : > { %v2100_v29 = vpop.xlane.xlu2 %2099 }
 0xde3   : > { %5254 = vrcp.f32 %v2100_v29  ;;  %v2112_v37 = vand.u32 2147483648, %v2100_v29  ;;  %v2110_v10 = vand.u32 2147483647, %v2100_v29  ;;  %vm2106_vm7 = vweird.f32 %v2100_v29 }
 0xde5   : > { %v2113_v41 = vor.u32 1.1754944e-38, %v2112_v37  ;;  %vm2111_vm10 = vcmp.eq.f32.partialorder %v2110_v10, 8.507059e+37 }
 0xde9   : > { %v5255_v30 = vpop.eup %5254 }
 0xdea   : > { %v2102_v33 = vmul.f32 %v5255_v30, %v2100_v29  ;;  %v2117_v34 = vpop.permute.xlu2 %2116  ;;  %vm2107_vm6 = vweird.f32 %v5255_v30  ;;  %v4939_v29 = vld [vmem:[%s6518_s19 + $0x20] sm:$0xff] }
 0xdeb   : > { %2137 = vmatpush.msrb.mxu2 %v2117_v34  ;;  %vm2108_vm9 = vmor %vm2106_vm7, %vm2107_vm6 }
 0xdec   : > { %v2103_v36 = vsub.f32 1.0, %v2102_v33 }
 0xded   : > { %2264 = vmatpush.msra.mxu2 %v4918_v59  ;;  %v4948_v59 = vld [vmem:[%s6515_s30 + $0x60] sm:$0xff] }
 0xdee   : > { %v2104_v39 = vmul.f32 %v5255_v30, %v2103_v36 }
 0xdf0   : > { %v2105_v40 = vadd.f32 %v5255_v30, %v2104_v39 }
 0xdf2   : > { %v2109_v42 = vsel %vm2108_vm9, %v5255_v30, %v2105_v40 }
 0xdf3   : > { %v2114_v43 = vsel %vm2111_vm10, %v2113_v41, %v2109_v42 }
 0xdf4   : > { %v2115_v44 = vmul.f32 %v5251_v22, %v2114_v43 }
 0xdf5   : > { %v2204_v45 = vpop.xlane.xlu0 %2203 }
 0xdf6   : > { %5256 = vrcp.f32 %v2204_v45  ;;  %4931 = vmatmul.msk.f32.vlgmr.msrb.gmra.mxu2 %vm1252_vm1, %v2115_v44  ;;  %v2216_v49 = vand.u32 2147483648, %v2204_v45  ;;  %v2214_v51 = vand.u32 2147483647, %v2204_v45  ;;  %vm2210_vm12 = vweird.f32 %v2204_v45 }
 0xdf8   : > { %v2217_v53 = vor.u32 1.1754944e-38, %v2216_v49  ;;  %vm2215_vm14 = vcmp.eq.f32.partialorder %v2214_v51, 8.507059e+37 }
 0xdfc   : > { %v5257_v46 = vpop.eup %5256 }
 0xdfd   : > { %v2206_v47 = vmul.f32 %v5257_v46, %v2204_v45  ;;  %vm2211_vm11 = vweird.f32 %v5257_v46 }
 0xdfe   : > { %vm2212_vm13 = vmor %vm2210_vm12, %vm2211_vm11 }
 0xdff   : > { %v2207_v48 = vsub.f32 1.0, %v2206_v47  ;;  %v5189_v47 = vld [vmem:[%s6520_s8 + $0x1] ss:$0 sm:$0xff]  ;;  %s6552_s8 = sld [smem:[#allocation27_spill]] }
 0xe01   : > { %v2208_v50 = vmul.f32 %v5257_v46, %v2207_v48 }
 0xe03   : > { %v2209_v52 = vadd.f32 %v5257_v46, %v2208_v50  ;;  %v5190_v50 = vld [vmem:[%s6519_s14 + $0x1] ss:$0 sm:$0xff]  ;;  %s6553_s14 = smov 40  }
 0xe05   : > { %v2213_v54 = vsel %vm2212_vm13, %v5257_v46, %v2209_v52 }
 0xe06   : > { %v2218_v55 = vsel %vm2215_vm14, %v2217_v53, %v2213_v54 }
 0xe07   : > { %v2219_v56 = vmul.f32 %v5253_v15, %v2218_v55  ;;  %v4942_v15 = vld [vmem:[%s6518_s19 + $0x38] sm:$0xff]  ;;  %s6554_s19 = sld [smem:[#allocation30_spill]] }
 0xe08   : > { %2341 = vmatpush.msrb.mxu3 %v4942_v15  ;;  %v4951_v55 = vld [vmem:[%s6515_s30 + $0x78] sm:$0xff] }
 0xe09   : > { %4935 = vmatmul.msk.f32.vlgmr.msra.gmra.mxu0 %vm1252_vm1, %v2219_v56  ;;  %2364 = vmatpush.msrb.mxu1 %v4951_v55  ;;  %v4950_v56 = vld [vmem:[%s6515_s30 + $0x70] sm:$0xff] }
 0xe0a   : > { %2342 = vmatpush.msrb.mxu3 %v4941_v27 }
 0xe0b   : > { %2365 = vmatpush.msrb.mxu1 %v4950_v56 }
 0xe0c   : > { %2343 = vmatpush.msrb.mxu3 %v4940_v28 }
 0xe0d   : > { %2366 = vmatpush.msrb.mxu1 %v4949_v58 }
 0xe0e   : > { %2344 = vmatpush.msrb.mxu3 %v4939_v29  ;;  %v5191_v29 = vld [vmem:[%s6516_s24 + $0x1] ss:$0 sm:$0xff]  ;;  %s6556_s24 = sld [smem:[#allocation28_spill]] }
 0xe0f   : > { %2367 = vmatpush.msrb.mxu1 %v4948_v59 }
 0xe11   : > { %4957 = vmatmul.msk.f32.vlgmr.msrb.gmra.mxu0 %vm1225_vm0, %v5924_v57 }
 0xe79   : > { %v2139_v60 = vpop.f32.mrf.mxu2 }
 0xe7a   : > { %4932 = vmatmul.msk.f32.vlgmr.msra.gmra.mxu3 %vm1252_vm1, %v2139_v60  ;;  %v4947_v60 = vld [vmem:[%s6515_s30 + $0x58] sm:$0xff] }
 0xe7b   : > { %2368 = vmatpush.msrb.mxu1 %v4947_v60 }
 0xe86   : > { %v2243_v61 = vpop.f32.mrf.mxu0 }
 0xe87   : > { %4936 = vmatmul.msk.f32.vlgmr.msra.gmra.mxu2 %vm1252_vm1, %v2243_v61  ;;  %v4946_v61 = vld [vmem:[%s6515_s30 + $0x50] sm:$0xff] }
 0xe88   : > { %2369 = vmatpush.msrb.mxu1 %v4946_v61 }
 0xe8e   : > { %v2445_v63 = vpop.f32.mrf.mxu0 }
 0xe8f   : > { %v5933_v0 = vadd.f32 %v5188_v62, %v2445_v63  ;;  %v4945_v62 = vld [vmem:[%s6515_s30 + $0x48] sm:$0xff]  ;;  %v4944_v63 = vld [vmem:[%s6515_s30 + $0x40] sm:$0xff]  ;;  %s6557_s30 = sld [smem:[#allocation29_spill]] }
 0xe90   : > { %2370 = vmatpush.msrb.mxu1 %v4945_v62 }
 0xe91   : > { %2556 = vrot.lane.b32.xlu1 %v5933_v0, %s6546_s21  ;;  %2449 = vrot.lane.b32.xlu0 %v5933_v0, %s6547_s26 }
 0xe92   : > { %2371 = vmatpush.msrb.mxu1 %v4944_v63 }
 0xe99   : > { %2554 = vrot.lane.b32.xlu1 %v5933_v0, %s6548_s10 }
 0xefd   : > { %v2162_v4 = vpop.f32.mrf.mxu3 }
 0xefe   : > { %v2165_v5 = vadd.f32 %v2162_v4, %v5906_v14 }
 0xf03   : > { %v2557_v1 = vpop.permute.xlu1 %2556  ;;  %v2450_v2 = vpop.permute.xlu0 %2449 }
 0xf04   : > { %4958 = vmatpush.xpose.msk.msrb.mxu2 %vm1252_vm1, %v2450_v2  ;;  %v2417_v2 = vld [vmem:[%s6551_s23] sm:$0xff] }
 0xf05   : > { %2545 = vmatpush.msra.mxu0 %v2417_v2 }
 0xf07   : > { %4959 = vmatmul.msk.f32.vlgmr.msrb.gmra.mxu2 %vm1252_vm1, %v5933_v0 }
 0xf08   : > { %4962 = vmatpush.xpose.msk.msra.mxu2 %vm1252_vm1, %v2557_v1  ;;  %v2418_v1 = vld [vmem:[%s6551_s23 + $0x8] sm:$0xff] }
 0xf09   : > { %2652 = vmatpush.msra.mxu1 %v2418_v1 }
 0xf0a   : > { %v2266_v8 = vpop.f32.mrf.mxu2 }
 0xf0b   : > { %v2269_v9 = vadd.f32 %v2266_v8, %v2165_v5  ;;  %v2555_v12 = vpop.permute.xlu1 %2554 }
 0xf0d   : > { %v2270_v11 = vadd.f32 %v2269_v9, %v5857_v6 }
 0xf0f   : > { %4963 = vmatmul.msk.f32.vlgmr.msra.gmra.mxu2 %vm1252_vm1, %v2555_v12  ;;  %v2275_v13 = vsel %vm1225_vm0, %v2270_v11, 0.0 }
 0xf10   : > { %2276 = vadd.xlane.f32.xlu2 %v2275_v13 }
 0xf83   : > { %v2277_v16 = vpop.xlane.xlu2 %2276 }
 0xf84   : > { %v2278_v17 = vmul.f32 %v2277_v16, %v5824_v3 }
 0xf86   : > { %v2279_v18 = vsub.f32 %v2270_v11, %v2278_v17 }
 0xf88   : > { %v2280_v7 = vmul.f32 %v2279_v18, %v2279_v18 }
 0xf8a   : > { %v2472_v14 = vpop.f32.mrf.mxu2  ;;  %v2281_v6 = vsel %vm1225_vm0, %v2280_v7, 0.0 }
 0xf8b   : > { %v2475_v20 = vmul.f32 0.35355338, %v2472_v14  ;;  %2282 = vadd.xlane.f32.xlu2 %v2281_v6 }
 0xf8d   : > { %v2476_v21 = vadd.f32 %v2475_v20, %v5955_v19 }
 0xf8f   : > { %v2477_v22 = vsel %vm1252_vm1, %v2476_v21, -inf }
 0xf90   : > { %2478 = vmax.xlane.f32.xlu0 %v2477_v22 }
 0xf92   : > { %v2579_v23 = vpop.f32.mrf.mxu2 }
 0xf93   : > { %v2582_v24 = vmul.f32 0.35355338, %v2579_v23 }
 0xf95   : > { %v2583_v25 = vadd.f32 %v2582_v24, %v5955_v19 }
 0xf97   : > { %v2584_v26 = vsel %vm1252_vm1, %v2583_v25, -inf }
 0xf98   : > { %2585 = vmax.xlane.f32.xlu1 %v2584_v26 }
 0xfa3   : > { %2501 = vrot.lane.b32.xlu2 %v5933_v0, %s6550_s29 }
 0xfab   : > { %2658 = vrot.lane.b32.xlu2 %v5933_v0, %s6539_s5 }
 0xfb3   : > { %2762 = vrot.lane.b32.xlu2 %v5933_v0, %s6541_s13 }
 0xffe   : > { %v2283_v30 = vpop.xlane.xlu2 %2282 }
 0xfff   : > { %v2284_v31 = vmul.f32 %v2283_v30, %v5824_v3 }
0x1001   : > { %v2285_v32 = vadd.f32 1e-05, %v2284_v31 }
0x1003   : > { %5258 = vrsqrt.f32 %v2285_v32  ;;  %v2479_v33 = vpop.xlane.xlu0 %2478  ;;  %vm2292_vm2 = vweird.f32 %v2285_v32 }
0x1004   : > { %v2480_v34 = vsub.f32 %v2476_v21, %v2479_v33 }
0x1006   : > { %v2481_v35 = vmul.f32 1.442695, %v2480_v34  ;;  %v2502_v36 = vpop.permute.xlu2 %2501 }
0x1007   : > { %2522 = vmatpush.msra.mxu3 %v2502_v36 }
0x1008   : > { %5260 = vpow2.f32 %v2481_v35 }
0x1009   : > { %v5259_v37 = vpop.eup %5258 }
0x100a   : > { %v2287_v38 = vmul.f32 %v5259_v37, %v2285_v32  ;;  %vm2293_vm15 = vweird.f32 %v5259_v37 }
0x100b   : > { %v2586_v39 = vpop.xlane.xlu1 %2585  ;;  %vm2294_vm3 = vmor %vm2292_vm2, %vm2293_vm15 }
0x100c   : > { %v2288_v10 = vmul.f32 %v5259_v37, %v2287_v38  ;;  %v2587_v40 = vsub.f32 %v2583_v25, %v2586_v39 }
0x100e   : > { %v5973_v41 = vpop.eup %5260  ;;  %v2289_v42 = vmul.f32 0.5, %v2288_v10  ;;  %v2588_v43 = vmul.f32 1.442695, %v2587_v40  ;;  %v2659_v38 = vpop.permute.xlu2 %2658 }
0x100f   : > { %v2483_v44 = vsel %vm1252_vm1, %v5973_v41, 0.0 }
0x1010   : > { %v2290_v45 = vsub.f32 1.5, %v2289_v42  ;;  %5262 = vpow2.f32 %v2588_v43  ;;  %2484 = vadd.xlane.f32.xlu0 %v2483_v44  ;;  %v5193_v42 = vld [vmem:[%s6552_s8] ss:$0 sm:$0xff] }
0x1012   : > { %v2291_v46 = vmul.f32 %v5259_v37, %v2290_v45 }
0x1014   : > { %v2295_v48 = vsel %vm2294_vm3, %v5259_v37, %v2291_v46 }
0x1015   : > { %v2296_v49 = vmul.f32 %v2295_v48, %v2279_v18 }
0x1016   : > { %v5979_v51 = vpop.eup %5262  ;;  %v2763_v10 = vpop.permute.xlu2 %2762 }
0x1017   : > { %v2300_v52 = vmul.f32 %v5189_v47, %v2296_v49  ;;  %v2590_v53 = vsel %vm1252_vm1, %v5979_v51, 0.0 }
0x1018   : > { %2591 = vadd.xlane.f32.xlu1 %v2590_v53 }
0x1019   : > { %v5983_v54 = vadd.f32 %v5190_v50, %v2300_v52 }
0x101b   : > { %4953 = vmatmul.msk.f32.vlgmr.msrb.gmra.mxu3 %vm1225_vm0, %v5983_v54 }
0x1024   : > { %2608 = vrot.lane.b32.xlu0 %v5933_v0, %s6540_s2 }
0x102c   : > { %2764 = vrot.lane.b32.xlu0 %v5933_v0, %s6537_s11 }
0x1031   : > { %2660 = vrot.lane.b32.xlu1 %v5933_v0, %s6538_s18 }
0x1083   : > { %v2485_v4 = vpop.xlane.xlu0 %2484 }
0x1084   : > { %5264 = vrcp.f32 %v2485_v4  ;;  %v2497_v12 = vand.u32 2147483648, %v2485_v4  ;;  %v2495_v16 = vand.u32 2147483647, %v2485_v4  ;;  %vm2491_vm5 = vweird.f32 %v2485_v4 }
0x1086   : > { %v2498_v7 = vor.u32 1.1754944e-38, %v2497_v12  ;;  %vm2496_vm7 = vcmp.eq.f32.partialorder %v2495_v16, 8.507059e+37 }
0x108a   : > { %v5265_v5 = vpop.eup %5264 }
0x108b   : > { %v2487_v8 = vmul.f32 %v5265_v5, %v2485_v4  ;;  %v2592_v9 = vpop.xlane.xlu1 %2591  ;;  %vm2492_vm4 = vweird.f32 %v5265_v5 }
0x108c   : > { %5266 = vrcp.f32 %v2592_v9  ;;  %vm2493_vm6 = vmor %vm2491_vm5, %vm2492_vm4  ;;  %v2604_v23 = vand.u32 2147483648, %v2592_v9  ;;  %v2602_v26 = vand.u32 2147483647, %v2592_v9  ;;  %vm2598_vm10 = vweird.f32 %v2592_v9 }
0x108d   : > { %v2488_v11 = vsub.f32 1.0, %v2487_v8 }
0x108e   : > { %v2605_v27 = vor.u32 1.1754944e-38, %v2604_v23  ;;  %vm2603_vm12 = vcmp.eq.f32.partialorder %v2602_v26, 8.507059e+37 }
0x108f   : > { %v2489_v13 = vmul.f32 %v5265_v5, %v2488_v11 }
0x1091   : > { %v2490_v17 = vadd.f32 %v5265_v5, %v2489_v13 }
0x1092   : > { %v5267_v18 = vpop.eup %5266 }
0x1093   : > { %v2494_v14 = vsel %vm2493_vm6, %v5265_v5, %v2490_v17  ;;  %v2594_v6 = vmul.f32 %v5267_v18, %v2592_v9  ;;  %vm2599_vm9 = vweird.f32 %v5267_v18 }
0x1094   : > { %v2499_v20 = vsel %vm2496_vm7, %v2498_v7, %v2494_v14  ;;  %vm2600_vm11 = vmor %vm2598_vm10, %vm2599_vm9 }
0x1095   : > { %v2595_v21 = vsub.f32 1.0, %v2594_v6  ;;  %v2500_v22 = vmul.f32 %v5973_v41, %v2499_v20 }
0x1096   : > { %v2609_v24 = vpop.permute.xlu0 %2608 }
0x1097   : > { %v2596_v25 = vmul.f32 %v5267_v18, %v2595_v21  ;;  %4960 = vmatmul.msk.f32.vlgmr.msra.gmra.mxu3 %vm1252_vm1, %v2500_v22 }
0x1098   : > { %2629 = vmatpush.msrb.mxu3 %v2609_v24 }
0x1099   : > { %v2597_v15 = vadd.f32 %v5267_v18, %v2596_v25 }
0x109b   : > { %v2601_v28 = vsel %vm2600_vm11, %v5267_v18, %v2597_v15 }
0x109c   : > { %v2606_v30 = vsel %vm2603_vm12, %v2605_v27, %v2601_v28 }
0x109d   : > { %v2607_v31 = vmul.f32 %v5979_v51, %v2606_v30  ;;  %v2419_v30 = vld [vmem:[%s6551_s23 + $0x10] sm:$0xff] }
0x109e   : > { %v2346_v32 = vpop.f32.mrf.mxu3  ;;  %v2765_v35 = vpop.permute.xlu0 %2764  ;;  %2756 = vmatpush.msra.mxu3 %v2419_v30  ;;  %v5199_v30 = vld [vmem:[%s6560_s7] ss:$0 sm:$0xff] }
0x109f   : > { %v2347_v33 = vadd.f32 %v5191_v29, %v2346_v32  ;;  %4964 = vmatmul.msk.f32.vlgmr.msrb.gmra.mxu3 %vm1252_vm1, %v2607_v31  ;;  %v2420_v31 = vld [vmem:[%s6551_s23 + $0x18] sm:$0xff] }
0x10a1   : > { %v2349_v34 = vmax.f32 %v2347_v33, 0.0 }
0x10a3   : > { %v2661_v36 = vpop.permute.xlu1 %2660  ;;  %4954 = vmatmul.msk.f32.vlgmr.msrb.gmra.mxu1 %vm1755_vm8, %v2349_v34 }
0x10a4   : > { %4970 = vmatpush.xpose.msk.msrb.mxu1 %vm1252_vm1, %v2765_v35  ;;  %4966 = vmatpush.xpose.msk.msrb.mxu0 %vm1252_vm1, %v2661_v36 }
0x111a   : > { %v2524_v37 = vpop.f32.mrf.mxu3 }
0x111b   : > { %4961 = vmatmul.msk.f32.vlgmr.msra.gmra.mxu0 %vm1252_vm1, %v2524_v37  ;;  %v5192_v37 = vld [vmem:[%s6517_s6 + $0x1] ss:$0 sm:$0xff]  ;;  %s6555_s6 = sld [smem:[#allocation32_spill]] }
0x1120   : > { %v6015_v40 = vpop.f32.mrf.mxu1 }
0x1122   : > { %v2631_v39 = vpop.f32.mrf.mxu3 }
0x1123   : > { %4965 = vmatmul.msk.f32.vlgmr.msra.gmra.mxu1 %vm1252_vm1, %v2631_v39  ;;  %4967 = vmatmul.msk.f32.vlgmr.msrb.gmra.mxu0 %vm1252_vm1, %v2659_v38 }
0x112b   : > { %4971 = vmatmul.msk.f32.vlgmr.msrb.gmra.mxu1 %vm1252_vm1, %v2763_v10  ;;  %v2374_v10 = vadd.f32 %v5192_v37, %v6015_v40 }
0x1198   : > { %v2547_v41 = vpop.f32.mrf.mxu0 }
0x1199   : > { %v2553_v43 = vadd.f32 %v5193_v42, %v2547_v41  ;;  %v2376_v42 = vadd.f32 %v2374_v10, %v5983_v54 }
0x11a0   : > { %v2654_v44 = vpop.f32.mrf.mxu1  ;;  %v2683_v45 = vpop.f32.mrf.mxu0 }
0x11a1   : > { %v6018_v46 = vadd.f32 %v2654_v44, %v2553_v43  ;;  %v2686_v47 = vmul.f32 0.35355338, %v2683_v45  ;;  %v2381_v43 = vsel %vm1225_vm0, %v2376_v42, 0.0 }
0x11a3   : > { %v2687_v48 = vadd.f32 %v2686_v47, %v5955_v19 }
0x11a5   : > { %v2688_v49 = vsel %vm1252_vm1, %v2687_v48, -inf }
0x11a6   : > { %2689 = vmax.xlane.f32.xlu1 %v2688_v49 }
0x11a8   : > { %v2787_v50 = vpop.f32.mrf.mxu1 }
0x11a9   : > { %v2790_v51 = vmul.f32 0.35355338, %v2787_v50 }
0x11ab   : > { %v2791_v52 = vadd.f32 %v2790_v51, %v5955_v19  ;;  %v2902_v51 = vld [vmem:[%s6554_s19 + $0x18] sm:$0xff] }
0x11ac   : > { %2932 = vmatpush.msrb.mxu3 %v2902_v51 }
0x11ad   : > { %v2792_v53 = vsel %vm1252_vm1, %v2791_v52, -inf }
0x11ae   : > { %2793 = vmax.xlane.f32.xlu0 %v2792_v53  ;;  %v2900_v53 = vld [vmem:[%s6554_s19 + $0x8] sm:$0xff] }
0x11c2   : > { %2712 = vrot.lane.b32.xlu0 %v5933_v0, %s6543_s1 }
0x1219   : > { %v2690_v55 = vpop.xlane.xlu1 %2689 }
0x121a   : > { %v2691_v56 = vsub.f32 %v2687_v48, %v2690_v55  ;;  %v2899_v55 = vld [vmem:[%s6554_s19] sm:$0xff] }
0x121c   : > { %v2692_v58 = vmul.f32 1.442695, %v2691_v56  ;;  %v2907_v56 = vld [vmem:[%s6555_s6 + $0x18] sm:$0xff] }
0x121d   : > { %2958 = vmatpush.msra.mxu1 %v2907_v56 }
0x121e   : > { %5268 = vpow2.f32 %v2692_v58 }
0x1221   : > { %v2794_v59 = vpop.xlane.xlu0 %2793 }
0x1222   : > { %v2795_v60 = vsub.f32 %v2791_v52, %v2794_v59  ;;  %v2901_v52 = vld [vmem:[%s6554_s19 + $0x10] sm:$0xff] }
0x1223   : > { %2933 = vmatpush.msrb.mxu3 %v2901_v52 }
0x1224   : > { %v5269_v61 = vpop.eup %5268  ;;  %v2796_v62 = vmul.f32 1.442695, %v2795_v60  ;;  %v2906_v60 = vld [vmem:[%s6555_s6 + $0x10] sm:$0xff] }
0x1225   : > { %v2694_v63 = vsel %vm1252_vm1, %v5269_v61, 0.0  ;;  %2934 = vmatpush.msrb.mxu3 %v2900_v53  ;;  %2959 = vmatpush.msra.mxu1 %v2906_v60 }
0x1226   : > { %5270 = vpow2.f32 %v2796_v62  ;;  %2695 = vadd.xlane.f32.xlu2 %v2694_v63  ;;  %v2904_v63 = vld [vmem:[%s6555_s6] sm:$0xff] }
0x1227   : > { %2935 = vmatpush.msrb.mxu3 %v2899_v55 }
0x122c   : > { %v5271_v1 = vpop.eup %5270 }
0x122d   : > { %v2798_v19 = vsel %vm1252_vm1, %v5271_v1, 0.0 }
0x122e   : > { %2799 = vadd.xlane.f32.xlu1 %v2798_v19 }
0x1234   : > { %v2713_v2 = vpop.permute.xlu0 %2712 }
0x1235   : > { %2733 = vmatpush.msrb.mxu2 %v2713_v2 }
0x1237   : > { %2860 = vmatpush.msra.mxu2 %v2420_v31 }
0x123e   : > { %2816 = vrot.lane.b32.xlu2 %v5933_v0, %s6553_s14 }
0x1299   : > { %v2696_v4 = vpop.xlane.xlu2 %2695 }
0x129a   : > { %5272 = vrcp.f32 %v2696_v4  ;;  %v2708_v13 = vand.u32 2147483648, %v2696_v4  ;;  %v2706_v17 = vand.u32 2147483647, %v2696_v4  ;;  %vm2702_vm14 = vweird.f32 %v2696_v4 }
0x129c   : > { %v2709_v14 = vor.u32 1.1754944e-38, %v2708_v13  ;;  %vm2707_vm2 = vcmp.eq.f32.partialorder %v2706_v17, 8.507059e+37  ;;  %v5194_v17 = vld [vmem:[%s6556_s24] ss:$0 sm:$0xff] }
0x12a0   : > { %v5273_v5 = vpop.eup %5272 }
0x12a1   : > { %v2698_v8 = vmul.f32 %v5273_v5, %v2696_v4  ;;  %v2800_v9 = vpop.xlane.xlu1 %2799  ;;  %v2817_v11 = vpop.permute.xlu2 %2816  ;;  %vm2703_vm13 = vweird.f32 %v5273_v5 }
0x12a2   : > { %5274 = vrcp.f32 %v2800_v9  ;;  %2837 = vmatpush.msra.mxu0 %v2817_v11  ;;  %vm2704_vm15 = vmor %vm2702_vm14, %vm2703_vm13  ;;  %v2812_v23 = vand.u32 2147483648, %v2800_v9  ;;  %v2810_v25 = vand.u32 2147483647, %v2800_v9  ;;  %vm2806_vm4 = vweird.f32 %v2800_v9 }
0x12a3   : > { %v2699_v12 = vsub.f32 1.0, %v2698_v8 }
0x12a4   : > { %v2813_v15 = vor.u32 1.1754944e-38, %v2812_v23  ;;  %vm2811_vm6 = vcmp.eq.f32.partialorder %v2810_v25, 8.507059e+37 }
0x12a5   : > { %v2700_v16 = vmul.f32 %v5273_v5, %v2699_v12 }
0x12a7   : > { %v2701_v18 = vadd.f32 %v5273_v5, %v2700_v16 }
0x12a8   : > { %v5275_v7 = vpop.eup %5274 }
0x12a9   : > { %v2705_v6 = vsel %vm2704_vm15, %v5273_v5, %v2701_v18  ;;  %v2802_v0 = vmul.f32 %v5275_v7, %v2800_v9  ;;  %vm2807_vm3 = vweird.f32 %v5275_v7 }
0x12aa   : > { %v2710_v20 = vsel %vm2707_vm2, %v2709_v14, %v2705_v6  ;;  %vm2808_vm5 = vmor %vm2806_vm4, %vm2807_vm3  ;;  %v5196_v6 = vld [vmem:[%s6557_s30] ss:$0 sm:$0xff] }
0x12ab   : > { %v2803_v21 = vsub.f32 1.0, %v2802_v0  ;;  %v2711_v22 = vmul.f32 %v5269_v61, %v2710_v20  ;;  %v2905_v61 = vld [vmem:[%s6555_s6 + $0x8] sm:$0xff] }
0x12ac   : > { %2960 = vmatpush.msra.mxu1 %v2905_v61 }
0x12ad   : > { %v2804_v24 = vmul.f32 %v5275_v7, %v2803_v21  ;;  %4968 = vmatmul.msk.f32.vlgmr.msrb.gmra.mxu2 %vm1252_vm1, %v2711_v22 }
0x12ae   : > { %2961 = vmatpush.msra.mxu1 %v2904_v63 }
0x12af   : > { %v2805_v26 = vadd.f32 %v5275_v7, %v2804_v24  ;;  %v5195_v24 = vld [vmem:[%s6514_s12 + $0x1] ss:$0 sm:$0xff]  ;;  %s6561_s12 = sld [smem:[#allocation34_spill]] }
0x12b1   : > { %v2809_v27 = vsel %vm2808_vm5, %v5275_v7, %v2805_v26 }
0x12b2   : > { %v2814_v28 = vsel %vm2811_vm6, %v2813_v15, %v2809_v27  ;;  %v5197_v15 = vld [vmem:[%s6513_s20 + $0x1] ss:$0 sm:$0xff]  ;;  %s6569_s20 = sld [smem:[#allocation41_spill]] }
0x12b3   : > { %v2815_v29 = vmul.f32 %v5271_v1, %v2814_v28 }
0x12b5   : > { %4972 = vmatmul.msk.f32.vlgmr.msra.gmra.mxu0 %vm1252_vm1, %v2815_v29  ;;  %v5198_v29 = vld [vmem:[%s6558_s22] ss:$0 sm:$0xff]  ;;  %s6562_s22 = sld [smem:[#allocation35_spill]] }
0x1330   : > { %v2735_v32 = vpop.f32.mrf.mxu2 }
0x1331   : > { %4969 = vmatmul.msk.f32.vlgmr.msra.gmra.mxu3 %vm1252_vm1, %v2735_v32 }
0x1332   : > { %v2839_v33 = vpop.f32.mrf.mxu0 }
0x1333   : > { %4973 = vmatmul.msk.f32.vlgmr.msra.gmra.mxu2 %vm1252_vm1, %v2839_v33 }
0x13b4   : > { %v2758_v34 = vpop.f32.mrf.mxu3 }
0x13b5   : > { %v2761_v35 = vadd.f32 %v2758_v34, %v6018_v46 }
0x13b6   : > { %v2862_v36 = vpop.f32.mrf.mxu2 }
0x13b7   : > { %v2865_v38 = vadd.f32 %v2862_v36, %v2761_v35 }
0x13b9   : > { %v2866_v39 = vadd.f32 %v2865_v38, %v5924_v57 }
0x13bb   : > { %v2869_v41 = vsel %vm1225_vm0, %v2866_v39, 0.0 }
0x13bc   : > { %2870 = vadd.xlane.f32.xlu1 %v2869_v41 }
0x13c4   : > { %2382 = vadd.xlane.f32.xlu1 %v2381_v43 }
0x142f   : > { %v2871_v44 = vpop.xlane.xlu1 %2870 }
0x1430   : > { %v2872_v45 = vmul.f32 %v2871_v44, %v5824_v3 }
0x1432   : > { %v2873_v46 = vsub.f32 %v2866_v39, %v2872_v45  ;;  %v6082_v39 = vld [vmem:[%s5748_s28] ss:$0 sm:$0xff] }
0x1434   : > { %v2874_v47 = vmul.f32 %v2873_v46, %v2873_v46 }
0x1436   : > { %v2875_v57 = vsel %vm1225_vm0, %v2874_v47, 0.0 }
0x1437   : > { %2876 = vadd.xlane.f32.xlu0 %v2875_v57  ;;  %v2383_v40 = vpop.xlane.xlu1 %2382 }
0x1438   : > { %v2384_v48 = vmul.f32 %v2383_v40, %v5824_v3 }
0x143a   : > { %v2385_v49 = vsub.f32 %v2376_v42, %v2384_v48  ;;  %v2909_v42 = vld [vmem:[%s6561_s12] sm:$0xff] }
0x143b   : > { %3062 = vmatpush.msra.mxu3 %v2909_v42 }
0x143c   : > { %v2386_v54 = vmul.f32 %v2385_v49, %v2385_v49 }
0x143e   : > { %v2387_v50 = vsel %vm1225_vm0, %v2386_v54, 0.0 }
0x143f   : > { %2388 = vadd.xlane.f32.xlu1 %v2387_v50 }
0x14aa   : > { %v2877_v58 = vpop.xlane.xlu0 %2876 }
0x14ab   : > { %v2878_v59 = vmul.f32 %v2877_v58, %v5824_v3 }
0x14ad   : > { %v2879_v62 = vadd.f32 1e-05, %v2878_v59 }
0x14af   : > { %5276 = vrsqrt.f32 %v2879_v62  ;;  %vm2886_vm9 = vweird.f32 %v2879_v62 }
0x14b2   : > { %v2389_v1 = vpop.xlane.xlu1 %2388 }
0x14b3   : > { %v2390_v19 = vmul.f32 %v2389_v1, %v5824_v3 }
0x14b5   : > { %v5277_v2 = vpop.eup %5276  ;;  %v2391_v4 = vadd.f32 1e-05, %v2390_v19 }
0x14b6   : > { %v2881_v5 = vmul.f32 %v5277_v2, %v2879_v62  ;;  %vm2887_vm7 = vweird.f32 %v5277_v2 }
0x14b7   : > { %5278 = vrsqrt.f32 %v2391_v4  ;;  %vm2888_vm10 = vmor %vm2886_vm9, %vm2887_vm7  ;;  %vm2398_vm12 = vweird.f32 %v2391_v4 }
0x14b8   : > { %v2882_v8 = vmul.f32 %v5277_v2, %v2881_v5 }
0x14ba   : > { %v2883_v9 = vmul.f32 0.5, %v2882_v8 }
0x14bc   : > { %v2884_v11 = vsub.f32 1.5, %v2883_v9 }
0x14bd   : > { %v5279_v12 = vpop.eup %5278 }
0x14be   : > { %v2885_v13 = vmul.f32 %v5277_v2, %v2884_v11  ;;  %v2393_v16 = vmul.f32 %v5279_v12, %v2391_v4  ;;  %vm2399_vm11 = vweird.f32 %v5279_v12 }
0x14bf   : > { %vm2400_vm13 = vmor %vm2398_vm12, %vm2399_vm11 }
0x14c0   : > { %v2889_v18 = vsel %vm2888_vm10, %v5277_v2, %v2885_v13  ;;  %v2394_v7 = vmul.f32 %v5279_v12, %v2393_v16 }
0x14c1   : > { %v2890_v14 = vmul.f32 %v2889_v18, %v2873_v46 }
0x14c2   : > { %v2395_v0 = vmul.f32 0.5, %v2394_v7 }
0x14c3   : > { %v2894_v20 = vmul.f32 %v5194_v17, %v2890_v14 }
0x14c4   : > { %v2396_v21 = vsub.f32 1.5, %v2395_v0 }
0x14c5   : > { %v6059_v22 = vadd.f32 %v5196_v6, %v2894_v20 }
0x14c6   : > { %v2397_v23 = vmul.f32 %v5279_v12, %v2396_v21 }
0x14c7   : > { %4974 = vmatmul.msk.f32.vlgmr.msrb.gmra.mxu3 %vm1225_vm0, %v6059_v22 }
0x14c8   : > { %v2401_v25 = vsel %vm2400_vm13, %v5279_v12, %v2397_v23  ;;  %v2910_v23 = vld [vmem:[%s6561_s12 + $0x8] sm:$0xff] }
0x14c9   : > { %v2402_v26 = vmul.f32 %v2401_v25, %v2385_v49 }
0x14cb   : > { %v2406_v27 = vmul.f32 %v5195_v24, %v2402_v26 }
0x14cd   : > { %v6065_v28 = vadd.f32 %v5197_v15, %v2406_v27 }
0x14cf   : > { %4975 = vmatmul.msk.f32.vlgmr.msra.gmra.mxu1 %vm1225_vm0, %v6065_v28 }
0x154a   : > { %v2937_v31 = vpop.f32.mrf.mxu3 }
0x154b   : > { %v2938_v32 = vadd.f32 %v5198_v29, %v2937_v31 }
0x154c   : > { %v2963_v33 = vpop.f32.mrf.mxu1 }
0x154d   : > { %v6071_v34 = vadd.f32 %v5199_v30, %v2963_v33  ;;  %3071 = vrot.lane.b32.xlu1 %v2938_v32, %s6548_s10  ;;  %v5200_v30 = vld [vmem:[%s6562_s22] ss:$0 sm:$0xff]  ;;  %s6563_s22 = sld [smem:[#allocation38_spill]] }
0x154f   : > { %3073 = vrot.lane.b32.xlu2 %v6071_v34, %s6548_s10  ;;  %4976 = vmatpush.xpose.msk.msrb.mxu0 %vm1252_vm1, %v6071_v34 }
0x1552   : > { %4977 = vmatmul.msk.f32.vlgmr.msrb.gmra.mxu0 %vm1252_vm1, %v2938_v32 }
0x1553   : > { %s6564_s17 = smov %s6563_s22 }
0x15a9   : > { %v3074_v35 = vpop.permute.xlu2 %3073 }
0x15aa   : > { %4980 = vmatpush.xpose.msk.msrb.mxu1 %vm1252_vm1, %v3074_v35 }
0x15bf   : > { %v3072_v36 = vpop.permute.xlu1 %3071 }
0x15c0   : > { %4981 = vmatmul.msk.f32.vlgmr.msrb.gmra.mxu1 %vm1252_vm1, %v3072_v36 }
0x15cf   : > { %v2989_v37 = vpop.f32.mrf.mxu0 }
0x15d0   : > { %v2992_v38 = vmul.f32 0.35355338, %v2989_v37 }
0x15d2   : > { %v2993_v10 = vadd.f32 %v6082_v39, %v2992_v38 }
0x15d4   : > { %v2994_v41 = vsel %vm1252_vm1, %v2993_v10, -inf }
0x15d5   : > { %2995 = vmax.xlane.f32.xlu2 %v2994_v41 }
0x15ed   : > { %3125 = vrot.lane.b32.xlu2 %v6071_v34, %s6546_s21 }
0x15f5   : > { %3177 = vrot.lane.b32.xlu2 %v6071_v34, %s6539_s5 }
0x163d   : > { %v3096_v43 = vpop.f32.mrf.mxu1 }
0x163e   : > { %v3099_v44 = vmul.f32 0.35355338, %v3096_v43 }
0x1640   : > { %v3100_v45 = vadd.f32 %v6082_v39, %v3099_v44 }
0x1642   : > { %v3101_v46 = vsel %vm1252_vm1, %v3100_v45, -inf }
0x1643   : > { %3102 = vmax.xlane.f32.xlu1 %v3101_v46 }
0x1648   : > { %v2996_v47 = vpop.xlane.xlu2 %2995 }
0x1649   : > { %v2997_v57 = vsub.f32 %v2993_v10, %v2996_v47 }
0x164b   : > { %v2998_v40 = vmul.f32 1.442695, %v2997_v57 }
0x164d   : > { %5280 = vpow2.f32 %v2998_v40 }
0x1650   : > { %v3126_v48 = vpop.permute.xlu2 %3125 }
0x1651   : > { %3146 = vmatpush.msra.mxu0 %v3126_v48 }
0x1653   : > { %v5281_v49 = vpop.eup %5280 }
0x1654   : > { %v3000_v54 = vsel %vm1252_vm1, %v5281_v49, 0.0 }
0x1655   : > { %3001 = vadd.xlane.f32.xlu0 %v3000_v54 }
0x1658   : > { %v3178_v50 = vpop.permute.xlu2 %3177 }
0x1659   : > { %4984 = vmatpush.xpose.msk.msrb.mxu3 %vm1252_vm1, %v3178_v50 }
0x165c   : > { %3279 = vrot.lane.b32.xlu1 %v2938_v32, %s6541_s13 }
0x16b6   : > { %v3103_v51 = vpop.xlane.xlu1 %3102 }
0x16b7   : > { %v3104_v52 = vsub.f32 %v3100_v45, %v3103_v51 }
0x16b9   : > { %v3105_v53 = vmul.f32 1.442695, %v3104_v52 }
0x16bb   : > { %5282 = vpow2.f32 %v3105_v53 }
0x16c1   : > { %v5283_v55 = vpop.eup %5282 }
0x16c2   : > { %v3107_v56 = vsel %vm1252_vm1, %v5283_v55, 0.0 }
0x16c3   : > { %3108 = vadd.xlane.f32.xlu0 %v3107_v56 }
0x16c8   : > { %v3002_v58 = vpop.xlane.xlu0 %3001 }
0x16c9   : > { %5284 = vrcp.f32 %v3002_v58  ;;  %v3014_v4 = vand.u32 2147483648, %v3002_v58  ;;  %vm3008_vm15 = vweird.f32 %v3002_v58  ;;  %v3012_v8 = vand.u32 2147483647, %v3002_v58 }
0x16cb   : > { %v3015_v16 = vor.u32 1.1754944e-38, %v3014_v4  ;;  %vm3013_vm5 = vcmp.eq.f32.partialorder %v3012_v8, 8.507059e+37 }
0x16ce   : > { %v3280_v15 = vpop.permute.xlu1 %3279 }
0x16cf   : > { %v5285_v59 = vpop.eup %5284 }
0x16d0   : > { %v3004_v60 = vmul.f32 %v5285_v59, %v3002_v58  ;;  %vm3009_vm14 = vweird.f32 %v5285_v59 }
0x16d1   : > { %vm3010_vm2 = vmor %vm3008_vm15, %vm3009_vm14 }
0x16d2   : > { %v3005_v62 = vsub.f32 1.0, %v3004_v60 }
0x16d4   : > { %v3006_v63 = vmul.f32 %v5285_v59, %v3005_v62 }
0x16d6   : > { %v3007_v2 = vadd.f32 %v5285_v59, %v3006_v63 }
0x16d7   : > { %3018 = vrot.lane.b32.xlu0 %v6071_v34, %s6547_s26 }
0x16d8   : > { %v3011_v13 = vsel %vm3010_vm2, %v5285_v59, %v3007_v2 }
0x16d9   : > { %v3016_v7 = vsel %vm3013_vm5, %v3015_v16, %v3011_v13 }
0x16da   : > { %v3017_v21 = vmul.f32 %v5281_v49, %v3016_v7 }
0x16df   : > { %3281 = vrot.lane.b32.xlu0 %v6071_v34, %s6541_s13 }
0x16e7   : > { %3175 = vrot.lane.b32.xlu0 %v2938_v32, %s6539_s5 }
0x1736   : > { %v3109_v61 = vpop.xlane.xlu0 %3108 }
0x1737   : > { %5286 = vrcp.f32 %v3109_v61  ;;  %v3121_v9 = vand.u32 2147483648, %v3109_v61  ;;  %v3119_v12 = vand.u32 2147483647, %v3109_v61  ;;  %vm3115_vm4 = vweird.f32 %v3109_v61 }
0x1739   : > { %v3122_v18 = vor.u32 1.1754944e-38, %v3121_v9  ;;  %vm3120_vm7 = vcmp.eq.f32.partialorder %v3119_v12, 8.507059e+37 }
0x173d   : > { %v5287_v1 = vpop.eup %5286 }
0x173e   : > { %v3111_v19 = vmul.f32 %v5287_v1, %v3109_v61  ;;  %vm3116_vm3 = vweird.f32 %v5287_v1 }
0x173f   : > { %vm3117_vm6 = vmor %vm3115_vm4, %vm3116_vm3 }
0x1740   : > { %v3112_v5 = vsub.f32 1.0, %v3111_v19 }
0x1742   : > { %v3113_v11 = vmul.f32 %v5287_v1, %v3112_v5 }
0x1744   : > { %v3114_v17 = vadd.f32 %v5287_v1, %v3113_v11 }
0x1746   : > { %v3118_v14 = vsel %vm3117_vm6, %v5287_v1, %v3114_v17 }
0x1747   : > { %v3123_v6 = vsel %vm3120_vm7, %v3122_v18, %v3118_v14  ;;  %v2912_v14 = vld [vmem:[%s6561_s12 + $0x18] sm:$0xff] }
0x1748   : > { %v3124_v0 = vmul.f32 %v5283_v55, %v3123_v6  ;;  %v2911_v6 = vld [vmem:[%s6561_s12 + $0x10] sm:$0xff] }
0x1749   : > { %v3019_v20 = vpop.permute.xlu0 %3018  ;;  %3273 = vmatpush.msrb.mxu0 %v2911_v6 }
0x174a   : > { %3039 = vmatpush.msrb.mxu2 %v3019_v20  ;;  %4982 = vmatmul.msk.f32.vlgmr.msra.gmra.mxu0 %vm1252_vm1, %v3124_v0 }
0x174b   : > { %4978 = vmatmul.msk.f32.vlgmr.msrb.gmra.mxu2 %vm1252_vm1, %v3017_v21 }
0x174c   : > { %3169 = vmatpush.msra.mxu2 %v2910_v23 }
0x1751   : > { %v3282_v24 = vpop.permute.xlu0 %3281 }
0x1752   : > { %4988 = vmatpush.xpose.msk.msrb.mxu2 %vm1252_vm1, %v3282_v24 }
0x1759   : > { %v3176_v27 = vpop.permute.xlu0 %3175 }
0x17c7   : > { %v3148_v25 = vpop.f32.mrf.mxu0 }
0x17c8   : > { %4983 = vmatmul.msk.f32.vlgmr.msra.gmra.mxu2 %vm1252_vm1, %v3148_v25 }
0x17ce   : > { %v3041_v26 = vpop.f32.mrf.mxu2 }
0x17cf   : > { %4979 = vmatmul.msk.f32.vlgmr.msra.gmra.mxu3 %vm1252_vm1, %v3041_v26 }
0x17d0   : > { %4989 = vmatmul.msk.f32.vlgmr.msrb.gmra.mxu2 %vm1252_vm1, %v3280_v15 }
0x17d7   : > { %4985 = vmatmul.msk.f32.vlgmr.msrb.gmra.mxu3 %vm1252_vm1, %v3176_v27 }
0x184b   : > { %v3171_v29 = vpop.f32.mrf.mxu2 }
0x1852   : > { %v3064_v31 = vpop.f32.mrf.mxu3 }
0x1853   : > { %v3070_v32 = vadd.f32 %v5200_v30, %v3064_v31  ;;  %v3304_v33 = vpop.f32.mrf.mxu2 }
0x1854   : > { %v3307_v35 = vmul.f32 0.35355338, %v3304_v33  ;;  %v3419_v33 = vld [vmem:[%s6563_s22 + $0x18] sm:$0xff]  ;;  %s6567_s22 = sld [smem:[#allocation37_spill]] }
0x1855   : > { %v6111_v36 = vadd.f32 %v3171_v29, %v3070_v32  ;;  %3448 = vmatpush.msra.mxu0 %v3419_v33 }
0x1856   : > { %v3308_v37 = vadd.f32 %v6082_v39, %v3307_v35  ;;  %v3418_v35 = vld [vmem:[%s6564_s17 + $0x10] sm:$0xff] }
0x1857   : > { %3449 = vmatpush.msra.mxu0 %v3418_v35 }
0x1858   : > { %v3309_v38 = vsel %vm1252_vm1, %v3308_v37, -inf }
0x1859   : > { %3310 = vmax.xlane.f32.xlu2 %v3309_v38  ;;  %v3427_v38 = vld [vmem:[%s6565_s0 + $0x30] sm:$0xff] }
0x185a   : > { %v3200_v10 = vpop.f32.mrf.mxu3 }
0x185b   : > { %v3203_v41 = vmul.f32 0.35355338, %v3200_v10  ;;  %v3426_v10 = vld [vmem:[%s6565_s0 + $0x28] sm:$0xff] }
0x185d   : > { %v3204_v42 = vadd.f32 %v6082_v39, %v3203_v41 }
0x185f   : > { %v3205_v43 = vsel %vm1252_vm1, %v3204_v42, -inf }
0x1860   : > { %3206 = vmax.xlane.f32.xlu0 %v3205_v43  ;;  %v3425_v43 = vld [vmem:[%s6565_s0 + $0x20] sm:$0xff] }
0x1874   : > { %3333 = vrot.lane.b32.xlu0 %v6071_v34, %s6537_s11 }
0x18cc   : > { %v3311_v44 = vpop.xlane.xlu2 %3310 }
0x18cd   : > { %v3312_v45 = vsub.f32 %v3308_v37, %v3311_v44  ;;  %v3428_v37 = vld [vmem:[%s6565_s0 + $0x38] sm:$0xff] }
0x18ce   : > { %3471 = vmatpush.msra.mxu2 %v3428_v37 }
0x18cf   : > { %v3313_v46 = vmul.f32 1.442695, %v3312_v45  ;;  %v3424_v45 = vld [vmem:[%s6565_s0 + $0x18] sm:$0xff] }
0x18d0   : > { %3472 = vmatpush.msra.mxu2 %v3427_v38 }
0x18d1   : > { %5288 = vpow2.f32 %v3313_v46 }
0x18d2   : > { %3473 = vmatpush.msra.mxu2 %v3426_v10 }
0x18d3   : > { %v3207_v47 = vpop.xlane.xlu0 %3206 }
0x18d4   : > { %v3208_v57 = vsub.f32 %v3204_v42, %v3207_v47  ;;  %3474 = vmatpush.msra.mxu2 %v3425_v43 }
0x18d6   : > { %v3209_v40 = vmul.f32 1.442695, %v3208_v57  ;;  %3475 = vmatpush.msra.mxu2 %v3424_v45 }
0x18d7   : > { %v5289_v48 = vpop.eup %5288 }
0x18d8   : > { %5290 = vpow2.f32 %v3209_v40  ;;  %v3315_v49 = vsel %vm1252_vm1, %v5289_v48, 0.0 }
0x18d9   : > { %3316 = vadd.xlane.f32.xlu1 %v3315_v49 }
0x18de   : > { %v5291_v54 = vpop.eup %5290 }
0x18df   : > { %v3211_v50 = vsel %vm1252_vm1, %v5291_v54, 0.0 }
0x18e0   : > { %3212 = vadd.xlane.f32.xlu2 %v3211_v50 }
0x18e6   : > { %v3334_v51 = vpop.permute.xlu0 %3333 }
0x18e7   : > { %3354 = vmatpush.msra.mxu3 %v3334_v51 }
0x18f8   : > { %3229 = vrot.lane.b32.xlu2 %v6071_v34, %s6538_s18 }
0x194c   : > { %v3317_v52 = vpop.xlane.xlu1 %3316 }
0x194d   : > { %5292 = vrcp.f32 %v3317_v52  ;;  %v3329_v59 = vand.u32 2147483648, %v3317_v52  ;;  %v3327_v61 = vand.u32 2147483647, %v3317_v52  ;;  %vm3323_vm10 = vweird.f32 %v3317_v52 }
0x194f   : > { %v3330_v1 = vor.u32 1.1754944e-38, %v3329_v59  ;;  %vm3328_vm12 = vcmp.eq.f32.partialorder %v3327_v61, 8.507059e+37  ;;  %v3421_v59 = vld [vmem:[%s6565_s0] sm:$0xff] }
0x1953   : > { %v5293_v53 = vpop.eup %5292  ;;  %v3213_v55 = vpop.xlane.xlu2 %3212 }
0x1954   : > { %v3319_v56 = vmul.f32 %v5293_v53, %v3317_v52  ;;  %5294 = vrcp.f32 %v3213_v55  ;;  %vm3324_vm9 = vweird.f32 %v5293_v53  ;;  %v3225_v8 = vand.u32 2147483648, %v3213_v55  ;;  %v5202_v52 = vld [vmem:[%s6567_s22] ss:$0 sm:$0xff]  ;;  %s6570_s22 = sld [smem:[#allocation42_spill]] }
0x1955   : > { %vm3325_vm11 = vmor %vm3323_vm10, %vm3324_vm9  ;;  %v3223_v12 = vand.u32 2147483647, %v3213_v55  ;;  %vm3219_vm14 = vweird.f32 %v3213_v55 }
0x1956   : > { %v3320_v58 = vsub.f32 1.0, %v3319_v56  ;;  %v3226_v16 = vor.u32 1.1754944e-38, %v3225_v8  ;;  %v3423_v56 = vld [vmem:[%s6565_s0 + $0x10] sm:$0xff] }
0x1957   : > { %vm3224_vm2 = vcmp.eq.f32.partialorder %v3223_v12, 8.507059e+37  ;;  %3476 = vmatpush.msra.mxu2 %v3423_v56 }
0x1958   : > { %v3321_v60 = vmul.f32 %v5293_v53, %v3320_v58  ;;  %v3422_v58 = vld [vmem:[%s6565_s0 + $0x8] sm:$0xff] }
0x1959   : > { %3477 = vmatpush.msra.mxu2 %v3422_v58  ;;  %v5000_v58 = vld [vmem:[%s6551_s23 + $0x28] sm:$0xff] }
0x195a   : > { %v5295_v62 = vpop.eup %5294  ;;  %v3322_v63 = vadd.f32 %v5293_v53, %v3321_v60 }
0x195b   : > { %v3215_v19 = vmul.f32 %v5295_v62, %v3213_v55  ;;  %v3230_v2 = vpop.permute.xlu2 %3229  ;;  %vm3220_vm13 = vweird.f32 %v5295_v62  ;;  %3478 = vmatpush.msra.mxu2 %v3421_v59 }
0x195c   : > { %v3326_v4 = vsel %vm3325_vm11, %v5293_v53, %v3322_v63  ;;  %3250 = vmatpush.msra.mxu1 %v3230_v2  ;;  %vm3221_vm15 = vmor %vm3219_vm14, %vm3220_vm13 }
0x195d   : > { %v3331_v34 = vsel %vm3328_vm12, %v3330_v1, %v3326_v4  ;;  %v3216_v5 = vsub.f32 1.0, %v3215_v19  ;;  %v5204_v1 = vld [vmem:[%s6569_s20] ss:$0 sm:$0xff]  ;;  %s6571_s20 = smov %s6570_s22  ;;  %3760 = vmatpush.msrb.mxu2 %v5000_v58 }
0x195e   : > { %v3332_v9 = vmul.f32 %v5289_v48, %v3331_v34  ;;  %3377 = vmatpush.msrb.mxu1 %v2912_v14 }
0x195f   : > { %v3217_v11 = vmul.f32 %v5295_v62, %v3216_v5 }
0x1960   : > { %4990 = vmatmul.msk.f32.vlgmr.msra.gmra.mxu3 %vm1252_vm1, %v3332_v9 }
0x1961   : > { %v3218_v13 = vadd.f32 %v5295_v62, %v3217_v11 }
0x1963   : > { %v3222_v17 = vsel %vm3221_vm15, %v5295_v62, %v3218_v13  ;;  %v4997_v13 = vld [vmem:[%s6542_s3 + $0x38] sm:$0xff] }
0x1964   : > { %v3227_v18 = vsel %vm3224_vm2, %v3226_v16, %v3222_v17  ;;  %3548 = vmatpush.msrb.mxu3 %v4997_v13  ;;  %v4996_v16 = vld [vmem:[%s6542_s3 + $0x30] sm:$0xff]  ;;  %v4995_v17 = vld [vmem:[%s6542_s3 + $0x28] sm:$0xff] }
0x1965   : > { %v3228_v7 = vmul.f32 %v5291_v54, %v3227_v18  ;;  %v5201_v54 = vld [vmem:[%s6566_s27] ss:$0 sm:$0xff] }
0x1966   : > { %3549 = vmatpush.msrb.mxu3 %v4996_v16  ;;  %v4994_v18 = vld [vmem:[%s6542_s3 + $0x20] sm:$0xff] }
0x1967   : > { %4986 = vmatmul.msk.f32.vlgmr.msra.gmra.mxu1 %vm1252_vm1, %v3228_v7 }
0x1968   : > { %3550 = vmatpush.msrb.mxu3 %v4995_v17 }
0x196a   : > { %3551 = vmatpush.msrb.mxu3 %v4994_v18 }
0x19e3   : > { %v3356_v0 = vpop.f32.mrf.mxu3 }
0x19e4   : > { %v3252_v20 = vpop.f32.mrf.mxu1  ;;  %4991 = vmatmul.msk.f32.vlgmr.msrb.gmra.mxu1 %vm1252_vm1, %v3356_v0 }
0x19e5   : > { %4987 = vmatmul.msk.f32.vlgmr.msrb.gmra.mxu0 %vm1252_vm1, %v3252_v20 }
0x1a61   : > { %v3379_v24 = vpop.f32.mrf.mxu1 }
0x1a62   : > { %v3275_v21 = vpop.f32.mrf.mxu0 }
0x1a63   : > { %v3278_v23 = vadd.f32 %v3275_v21, %v6111_v36  ;;  %v3416_v36 = vld [vmem:[%s6564_s17] sm:$0xff] }
0x1a65   : > { %v3382_v25 = vadd.f32 %v3379_v24, %v3278_v23 }
0x1a67   : > { %v3383_v26 = vadd.f32 %v3382_v25, %v6059_v22  ;;  %v3417_v22 = vld [vmem:[%s6564_s17 + $0x8] sm:$0xff]  ;;  %s6568_s17 = sld [smem:[#allocation39_spill]] }
0x1a68   : > { %3450 = vmatpush.msra.mxu0 %v3417_v22 }
0x1a69   : > { %v3386_v15 = vsel %vm1225_vm0, %v3383_v26, 0.0 }
0x1a6a   : > { %3387 = vadd.xlane.f32.xlu1 %v3386_v15  ;;  %3451 = vmatpush.msra.mxu0 %v3416_v36 }
0x1a6d   : > { %v5203_v60 = vld [vmem:[%s6568_s17] ss:$0 sm:$0xff] }
0x1add   : > { %v3388_v27 = vpop.xlane.xlu1 %3387 }
0x1ade   : > { %v3389_v29 = vmul.f32 %v3388_v27, %v5824_v3 }
0x1ae0   : > { %v3390_v30 = vsub.f32 %v3383_v26, %v3389_v29  ;;  %v5205_v26 = vld [vmem:[%s6570_s22] ss:$0 sm:$0xff] }
0x1ae1   : > { %v5206_v29 = vld [vmem:[%s5674_s9] ss:$0 sm:$0xff] }
0x1ae2   : > { %v3391_v31 = vmul.f32 %v3390_v30, %v3390_v30 }
0x1ae4   : > { %v3392_v32 = vsel %vm1225_vm0, %v3391_v31, 0.0 }
0x1ae5   : > { %3393 = vadd.xlane.f32.xlu1 %v3392_v32  ;;  %v5207_v32 = vld [vmem:[%s6545_s25 + $0x1] ss:$0 sm:$0xff] }
0x1b58   : > { %v3394_v41 = vpop.xlane.xlu1 %3393 }
0x1b59   : > { %v3395_v42 = vmul.f32 %v3394_v41, %v5824_v3  ;;  %v6182_v41 = vld [vmem:[%s5952_s15] sm:$0xff] }
0x1b5b   : > { %v3396_v44 = vadd.f32 1e-05, %v3395_v42 }
0x1b5d   : > { %5296 = vrsqrt.f32 %v3396_v44  ;;  %vm3403_vm4 = vweird.f32 %v3396_v44 }
0x1b63   : > { %v5297_v46 = vpop.eup %5296 }
0x1b64   : > { %v3398_v47 = vmul.f32 %v5297_v46, %v3396_v44  ;;  %vm3404_vm3 = vweird.f32 %v5297_v46 }
0x1b65   : > { %vm3405_vm5 = vmor %vm3403_vm4, %vm3404_vm3 }
0x1b66   : > { %v3399_v57 = vmul.f32 %v5297_v46, %v3398_v47 }
0x1b68   : > { %v3400_v40 = vmul.f32 0.5, %v3399_v57 }
0x1b6a   : > { %v3401_v48 = vsub.f32 1.5, %v3400_v40 }
0x1b6c   : > { %v3402_v49 = vmul.f32 %v5297_v46, %v3401_v48 }
0x1b6e   : > { %v3406_v50 = vsel %vm3405_vm5, %v5297_v46, %v3402_v49 }
0x1b6f   : > { %v3407_v51 = vmul.f32 %v3406_v50, %v3390_v30 }
0x1b71   : > { %v3411_v53 = vmul.f32 %v5201_v54, %v3407_v51 }
0x1b73   : > { %v3415_v55 = vadd.f32 %v5202_v52, %v3411_v53 }
0x1b75   : > { %4992 = vmatmul.msk.f32.vlgmr.msra.gmra.mxu0 %vm1225_vm0, %v3415_v55 }
0x1bf2   : > { %v3453_v61 = vpop.f32.mrf.mxu0 }
0x1bf3   : > { %v3454_v62 = vadd.f32 %v5203_v60, %v3453_v61  ;;  %v4999_v61 = vld [vmem:[%s6551_s23 + $0x20] sm:$0xff] }
0x1bf4   : > { %3653 = vmatpush.msra.mxu3 %v4999_v61 }
0x1bf5   : > { %v3456_v63 = vmax.f32 %v3454_v62, 0.0 }
0x1bf7   : > { %4993 = vmatmul.msk.f32.vlgmr.msra.gmra.mxu2 %vm1755_vm8, %v3456_v63 }
0x1c7a   : > { %v3480_v19 = vpop.f32.mrf.mxu2 }
0x1c7b   : > { %v3481_v2 = vadd.f32 %v5204_v1, %v3480_v19 }
0x1c7d   : > { %v3483_v4 = vadd.f32 %v3481_v2, %v3415_v55 }
0x1c7f   : > { %v3486_v34 = vsel %vm1225_vm0, %v3483_v4, 0.0 }
0x1c80   : > { %3487 = vadd.xlane.f32.xlu0 %v3486_v34 }
0x1cf3   : > { %v3488_v5 = vpop.xlane.xlu0 %3487 }
0x1cf4   : > { %v3489_v8 = vmul.f32 %v3488_v5, %v5824_v3 }
0x1cf6   : > { %v3490_v9 = vsub.f32 %v3483_v4, %v3489_v8 }
0x1cf8   : > { %v3491_v11 = vmul.f32 %v3490_v9, %v3490_v9 }
0x1cfa   : > { %v3492_v12 = vsel %vm1225_vm0, %v3491_v11, 0.0 }
0x1cfb   : > { %3493 = vadd.xlane.f32.xlu1 %v3492_v12 }
0x1d6e   : > { %v3494_v7 = vpop.xlane.xlu1 %3493 }
0x1d6f   : > { %v3495_v14 = vmul.f32 %v3494_v7, %v5824_v3 }
0x1d71   : > { %v3496_v6 = vadd.f32 1e-05, %v3495_v14 }
0x1d73   : > { %5298 = vrsqrt.f32 %v3496_v6  ;;  %vm3503_vm7 = vweird.f32 %v3496_v6 }
0x1d79   : > { %v5299_v0 = vpop.eup %5298 }
0x1d7a   : > { %v3498_v20 = vmul.f32 %v5299_v0, %v3496_v6  ;;  %vm3504_vm6 = vweird.f32 %v5299_v0 }
0x1d7b   : > { %vm3505_vm9 = vmor %vm3503_vm7, %vm3504_vm6 }
0x1d7c   : > { %v3499_v21 = vmul.f32 %v5299_v0, %v3498_v20 }
0x1d7e   : > { %v3500_v23 = vmul.f32 0.5, %v3499_v21 }
0x1d80   : > { %v3501_v24 = vsub.f32 1.5, %v3500_v23 }
0x1d82   : > { %v3502_v25 = vmul.f32 %v5299_v0, %v3501_v24 }
0x1d84   : > { %v3506_v15 = vsel %vm3505_vm9, %v5299_v0, %v3502_v25 }
0x1d85   : > { %v3507_v27 = vmul.f32 %v3506_v15, %v3490_v9  ;;  %v5031_v15 = vld [vmem:[%s6555_s6 + $0x38] sm:$0xff] }
0x1d87   : > { %v3511_v30 = vmul.f32 %v5205_v26, %v3507_v27 }
0x1d89   : > { %v6163_v31 = vadd.f32 %v5206_v29, %v3511_v30  ;;  %v5030_v30 = vld [vmem:[%s6555_s6 + $0x30] sm:$0xff] }
0x1d8b   : > { %5004 = vmatmul.msk.f32.vlgmr.msrb.gmra.mxu3 %vm1225_vm0, %v6163_v31 }
0x1e0e   : > { %v3553_v33 = vpop.f32.mrf.mxu3 }
0x1e0f   : > { %v6168_v35 = vadd.f32 %v5207_v32, %v3553_v33  ;;  %v5029_v32 = vld [vmem:[%s6555_s6 + $0x28] sm:$0xff]  ;;  %v5028_v33 = vld [vmem:[%s6555_s6 + $0x20] sm:$0xff] }
0x1e11   : > { %3664 = vrot.lane.b32.xlu1 %v6168_v35, %s6546_s21  ;;  %3557 = vrot.lane.b32.xlu2 %v6168_v35, %s6547_s26 }
0x1e19   : > { %3662 = vrot.lane.b32.xlu2 %v6168_v35, %s6548_s10 }
0x1e6b   : > { %v3558_v22 = vpop.permute.xlu2 %3557 }
0x1e6c   : > { %5005 = vmatpush.xpose.msk.msra.mxu1 %vm1252_vm1, %v3558_v22 }
0x1e6f   : > { %5006 = vmatmul.msk.f32.vlgmr.msra.gmra.mxu1 %vm1252_vm1, %v6168_v35 }
0x1e73   : > { %v3663_v37 = vpop.permute.xlu2 %3662 }
0x1e83   : > { %v3665_v36 = vpop.permute.xlu1 %3664 }
0x1e84   : > { %5009 = vmatpush.xpose.msk.msrb.mxu1 %vm1252_vm1, %v3665_v36 }
0x1e87   : > { %5010 = vmatmul.msk.f32.vlgmr.msrb.gmra.mxu1 %vm1252_vm1, %v3663_v37  ;;  %v5208_v37 = vld [vmem:[%s6552_s8 + $0x1] ss:$0 sm:$0xff] }
0x1eec   : > { %v3580_v38 = vpop.f32.mrf.mxu1 }
0x1eed   : > { %v3583_v10 = vmul.f32 0.35355338, %v3580_v38 }
0x1eef   : > { %v3584_v42 = vadd.f32 %v6182_v41, %v3583_v10 }
0x1ef1   : > { %v3585_v43 = vsel %vm1252_vm1, %v3584_v42, -inf }
0x1ef2   : > { %3586 = vmax.xlane.f32.xlu2 %v3585_v43 }
0x1f04   : > { %v3687_v44 = vpop.f32.mrf.mxu1 }
0x1f05   : > { %v3690_v45 = vmul.f32 0.35355338, %v3687_v44 }
0x1f07   : > { %v3691_v46 = vadd.f32 %v6182_v41, %v3690_v45 }
0x1f09   : > { %v3692_v47 = vsel %vm1252_vm1, %v3691_v46, -inf }
0x1f0a   : > { %3716 = vrot.lane.b32.xlu2 %v6168_v35, %s6540_s2  ;;  %3693 = vmax.xlane.f32.xlu1 %v3692_v47 }
0x1f12   : > { %3766 = vrot.lane.b32.xlu2 %v6168_v35, %s6539_s5 }
0x1f23   : > { %3870 = vrot.lane.b32.xlu1 %v6168_v35, %s6541_s13 }
0x1f65   : > { %v3587_v57 = vpop.xlane.xlu2 %3586 }
0x1f66   : > { %v3588_v40 = vsub.f32 %v3584_v42, %v3587_v57 }
0x1f68   : > { %v3589_v48 = vmul.f32 1.442695, %v3588_v40 }
0x1f6a   : > { %5300 = vpow2.f32 %v3589_v48  ;;  %v5209_v48 = vld [vmem:[%s6560_s7 + $0x1] ss:$0 sm:$0xff] }
0x1f6d   : > { %v3717_v6 = vpop.permute.xlu2 %3716 }
0x1f70   : > { %v5301_v49 = vpop.eup %5300 }
0x1f71   : > { %v3591_v54 = vsel %vm1252_vm1, %v5301_v49, 0.0 }
0x1f72   : > { %3592 = vadd.xlane.f32.xlu0 %v3591_v54 }
0x1f75   : > { %v3767_v27 = vpop.permute.xlu2 %3766 }
0x1f7d   : > { %v3694_v50 = vpop.xlane.xlu1 %3693 }
0x1f7e   : > { %v3695_v51 = vsub.f32 %v3691_v46, %v3694_v50 }
0x1f80   : > { %v3696_v52 = vmul.f32 1.442695, %v3695_v51 }
0x1f82   : > { %5302 = vpow2.f32 %v3696_v52 }
0x1f88   : > { %v5303_v53 = vpop.eup %5302 }
0x1f89   : > { %v3698_v55 = vsel %vm1252_vm1, %v5303_v53, 0.0 }
0x1f8a   : > { %3699 = vadd.xlane.f32.xlu0 %v3698_v55 }
0x1f95   : > { %v3871_v22 = vpop.permute.xlu1 %3870 }
0x1f9e   : > { %3609 = vrot.lane.b32.xlu0 %v6168_v35, %s6550_s29 }
0x1fa6   : > { %3872 = vrot.lane.b32.xlu0 %v6168_v35, %s6537_s11 }
0x1fae   : > { %3768 = vrot.lane.b32.xlu0 %v6168_v35, %s6538_s18 }
0x1fe5   : > { %v3593_v56 = vpop.xlane.xlu0 %3592 }
0x1fe6   : > { %5304 = vrcp.f32 %v3593_v56  ;;  %v3605_v34 = vand.u32 2147483648, %v3593_v56  ;;  %vm3599_vm11 = vweird.f32 %v3593_v56  ;;  %v3603_v8 = vand.u32 2147483647, %v3593_v56 }
0x1fe8   : > { %v3606_v12 = vor.u32 1.1754944e-38, %v3605_v34  ;;  %vm3604_vm13 = vcmp.eq.f32.partialorder %v3603_v8, 8.507059e+37 }
0x1fec   : > { %v5305_v59 = vpop.eup %5304 }
0x1fed   : > { %v3595_v60 = vmul.f32 %v5305_v59, %v3593_v56  ;;  %vm3600_vm10 = vweird.f32 %v5305_v59 }
0x1fee   : > { %vm3601_vm12 = vmor %vm3599_vm11, %vm3600_vm10 }
0x1fef   : > { %v3596_v63 = vsub.f32 1.0, %v3595_v60 }
0x1ff1   : > { %v3597_v1 = vmul.f32 %v5305_v59, %v3596_v63 }
0x1ff3   : > { %v3598_v4 = vadd.f32 %v5305_v59, %v3597_v1 }
0x1ff5   : > { %v3602_v9 = vsel %vm3601_vm12, %v5305_v59, %v3598_v4 }
0x1ff6   : > { %v3607_v13 = vsel %vm3604_vm13, %v3606_v12, %v3602_v9 }
0x1ff7   : > { %v3608_v14 = vmul.f32 %v5301_v49, %v3607_v13 }
0x1ffd   : > { %v3700_v62 = vpop.xlane.xlu0 %3699 }
0x1ffe   : > { %5306 = vrcp.f32 %v3700_v62  ;;  %v3712_v17 = vand.u32 2147483648, %v3700_v62  ;;  %vm3706_vm15 = vweird.f32 %v3700_v62  ;;  %v3710_v18 = vand.u32 2147483647, %v3700_v62 }
0x2000   : > { %v3713_v20 = vor.u32 1.1754944e-38, %v3712_v17  ;;  %vm3711_vm3 = vcmp.eq.f32.partialorder %v3710_v18, 8.507059e+37 }
0x2004   : > { %v5307_v19 = vpop.eup %5306 }
0x2005   : > { %v3702_v2 = vmul.f32 %v5307_v19, %v3700_v62  ;;  %vm3707_vm14 = vweird.f32 %v5307_v19 }
0x2006   : > { %vm3708_vm2 = vmor %vm3706_vm15, %vm3707_vm14 }
0x2007   : > { %v3703_v5 = vsub.f32 1.0, %v3702_v2 }
0x2009   : > { %v3704_v11 = vmul.f32 %v5307_v19, %v3703_v5 }
0x200b   : > { %v3705_v16 = vadd.f32 %v5307_v19, %v3704_v11 }
0x200d   : > { %v3709_v0 = vsel %vm3708_vm2, %v5307_v19, %v3705_v16 }
0x200e   : > { %v3714_v21 = vsel %vm3711_vm3, %v3713_v20, %v3709_v0 }
0x200f   : > { %v3715_v24 = vmul.f32 %v5303_v53, %v3714_v21 }
0x2010   : > { %v3610_v7 = vpop.permute.xlu0 %3609 }
0x2011   : > { %3630 = vmatpush.msrb.mxu0 %v3610_v7 }
0x2012   : > { %5007 = vmatmul.msk.f32.vlgmr.msrb.gmra.mxu0 %vm1252_vm1, %v3608_v14 }
0x2013   : > { %3737 = vmatpush.msra.mxu0 %v3717_v6 }
0x2018   : > { %v3873_v23 = vpop.permute.xlu0 %3872 }
0x2019   : > { %5017 = vmatpush.xpose.msk.msra.mxu2 %vm1252_vm1, %v3873_v23 }
0x201a   : > { %5011 = vmatmul.msk.f32.vlgmr.msra.gmra.mxu0 %vm1252_vm1, %v3715_v24 }
0x2020   : > { %v3769_v25 = vpop.permute.xlu0 %3768 }
0x2021   : > { %5013 = vmatpush.xpose.msk.msrb.mxu3 %vm1252_vm1, %v3769_v25 }
0x208f   : > { %v3632_v26 = vpop.f32.mrf.mxu0 }
0x2090   : > { %5008 = vmatmul.msk.f32.vlgmr.msra.gmra.mxu3 %vm1252_vm1, %v3632_v26  ;;  %v5001_v26 = vld [vmem:[%s6551_s23 + $0x30] sm:$0xff] }
0x2091   : > { %3864 = vmatpush.msrb.mxu0 %v5001_v26 }
0x2097   : > { %v3739_v29 = vpop.f32.mrf.mxu0 }
0x2098   : > { %5012 = vmatmul.msk.f32.vlgmr.msrb.gmra.mxu2 %vm1252_vm1, %v3739_v29  ;;  %5014 = vmatmul.msk.f32.vlgmr.msrb.gmra.mxu3 %vm1252_vm1, %v3767_v27 }
0x2099   : > { %4071 = vmatpush.msrb.mxu2 %v5031_v15  ;;  %v5002_v15 = vld [vmem:[%s6551_s23 + $0x38] sm:$0xff] }
0x209b   : > { %4072 = vmatpush.msrb.mxu2 %v5030_v30 }
0x209d   : > { %4073 = vmatpush.msrb.mxu2 %v5029_v32 }
0x209f   : > { %4074 = vmatpush.msrb.mxu2 %v5028_v33 }
0x20a0   : > { %5018 = vmatmul.msk.f32.vlgmr.msra.gmra.mxu2 %vm1252_vm1, %v3871_v22 }
0x20a8   : > { %5039 = vmatmul.msk.f32.vlgmr.msrb.gmra.mxu2 %vm1225_vm0, %v6065_v28 }
0x2113   : > { %v3655_v36 = vpop.f32.mrf.mxu3 }
0x2114   : > { %v3661_v38 = vadd.f32 %v5208_v37, %v3655_v36 }
0x211b   : > { %v3762_v10 = vpop.f32.mrf.mxu2  ;;  %v3791_v42 = vpop.f32.mrf.mxu3 }
0x211c   : > { %v6219_v43 = vadd.f32 %v3762_v10, %v3661_v38  ;;  %v3794_v44 = vmul.f32 0.35355338, %v3791_v42 }
0x211e   : > { %v3795_v45 = vadd.f32 %v6182_v41, %v3794_v44 }
0x2120   : > { %v3796_v46 = vsel %vm1252_vm1, %v3795_v45, -inf }
0x2121   : > { %3797 = vmax.xlane.f32.xlu2 %v3796_v46  ;;  %v5026_v46 = vld [vmem:[%s6554_s19 + $0x38] sm:$0xff] }
0x2122   : > { %4048 = vmatpush.msra.mxu0 %v5026_v46 }
0x2123   : > { %v3895_v47 = vpop.f32.mrf.mxu2 }
0x2124   : > { %v3898_v57 = vmul.f32 0.35355338, %v3895_v47  ;;  %v5025_v47 = vld [vmem:[%s6554_s19 + $0x30] sm:$0xff] }
0x2125   : > { %4049 = vmatpush.msra.mxu0 %v5025_v47 }
0x2126   : > { %v3899_v40 = vadd.f32 %v6182_v41, %v3898_v57  ;;  %v5023_v57 = vld [vmem:[%s6554_s19 + $0x20] sm:$0xff] }
0x2128   : > { %v3900_v28 = vsel %vm1252_vm1, %v3899_v40, -inf }
0x2129   : > { %3901 = vmax.xlane.f32.xlu0 %v3900_v28 }
0x212b   : > { %v4076_v49 = vpop.f32.mrf.mxu2 }
0x212c   : > { %v6228_v54 = vadd.f32 %v5209_v48, %v4076_v49 }
0x2139   : > { %3924 = vrot.lane.b32.xlu2 %v6168_v35, %s6553_s14 }
0x2141   : > { %4186 = vrot.lane.b32.xlu2 %v6228_v54, %s6548_s10 }
0x2194   : > { %v3798_v50 = vpop.xlane.xlu2 %3797 }
0x2195   : > { %v3799_v51 = vsub.f32 %v3795_v45, %v3798_v50 }
0x2197   : > { %v3800_v52 = vmul.f32 1.442695, %v3799_v51 }
0x2199   : > { %5308 = vpow2.f32 %v3800_v52 }
0x219c   : > { %v3902_v53 = vpop.xlane.xlu0 %3901  ;;  %v3925_v55 = vpop.permute.xlu2 %3924 }
0x219d   : > { %v3903_v41 = vsub.f32 %v3899_v40, %v3902_v53  ;;  %3945 = vmatpush.msra.mxu3 %v3925_v55  ;;  %v5210_v55 = vld [vmem:[%s6556_s24 + $0x1] ss:$0 sm:$0xff] }
0x219f   : > { %5040 = vmatpush.xpose.msk.msrb.mxu3 %vm1252_vm1, %v6228_v54  ;;  %v5309_v56 = vpop.eup %5308  ;;  %v3904_v58 = vmul.f32 1.442695, %v3903_v41 }
0x21a0   : > { %v3802_v59 = vsel %vm1252_vm1, %v5309_v56, 0.0 }
0x21a1   : > { %5310 = vpow2.f32 %v3904_v58  ;;  %3803 = vadd.xlane.f32.xlu0 %v3802_v59  ;;  %v5211_v58 = vld [vmem:[%s6557_s30 + $0x1] ss:$0 sm:$0xff] }
0x21a4   : > { %v4187_v60 = vpop.permute.xlu2 %4186 }
0x21a5   : > { %5044 = vmatpush.xpose.msk.msra.mxu2 %vm1252_vm1, %v4187_v60 }
0x21a7   : > { %v5311_v61 = vpop.eup %5310 }
0x21a8   : > { %v3906_v62 = vsel %vm1252_vm1, %v5311_v61, 0.0 }
0x21a9   : > { %3907 = vadd.xlane.f32.xlu1 %v3906_v62 }
0x21b5   : > { %3820 = vrot.lane.b32.xlu0 %v6168_v35, %s6543_s1  ;;  %s6578_s1 = sld [smem:[#allocation49_spill]] }
0x21bb   : > { %s5079_s29 = sshll.u32 %s6578_s1, 3 }
0x2214   : > { %v3804_v63 = vpop.xlane.xlu0 %3803 }
0x2215   : > { %5312 = vrcp.f32 %v3804_v63  ;;  %v3816_v34 = vand.u32 2147483648, %v3804_v63  ;;  %v3814_v8 = vand.u32 2147483647, %v3804_v63  ;;  %vm3810_vm5 = vweird.f32 %v3804_v63 }
0x2217   : > { %v3817_v12 = vor.u32 1.1754944e-38, %v3816_v34  ;;  %vm3815_vm7 = vcmp.eq.f32.partialorder %v3814_v8, 8.507059e+37 }
0x221b   : > { %v5313_v1 = vpop.eup %5312 }
0x221c   : > { %v3806_v19 = vmul.f32 %v5313_v1, %v3804_v63  ;;  %v3908_v2 = vpop.xlane.xlu1 %3907  ;;  %vm3811_vm4 = vweird.f32 %v5313_v1 }
0x221d   : > { %5314 = vrcp.f32 %v3908_v2  ;;  %vm3812_vm6 = vmor %vm3810_vm5, %vm3811_vm4  ;;  %v3920_v7 = vand.u32 2147483648, %v3908_v2  ;;  %v3918_v0 = vand.u32 2147483647, %v3908_v2  ;;  %vm3914_vm10 = vweird.f32 %v3908_v2 }
0x221e   : > { %v3807_v4 = vsub.f32 1.0, %v3806_v19 }
0x221f   : > { %v3921_v21 = vor.u32 1.1754944e-38, %v3920_v7  ;;  %vm3919_vm12 = vcmp.eq.f32.partialorder %v3918_v0, 8.507059e+37  ;;  %v5034_v0 = vld [vmem:[%s6561_s12 + $0x28] sm:$0xff] }
0x2220   : > { %v3808_v5 = vmul.f32 %v5313_v1, %v3807_v4 }
0x2222   : > { %v3809_v9 = vadd.f32 %v5313_v1, %v3808_v5 }
0x2223   : > { %v5315_v11 = vpop.eup %5314 }
0x2224   : > { %v3813_v13 = vsel %vm3812_vm6, %v5313_v1, %v3809_v9  ;;  %v3910_v16 = vmul.f32 %v5315_v11, %v3908_v2  ;;  %vm3915_vm9 = vweird.f32 %v5315_v11  ;;  %v6268_v9 = vld [vmem:[%s5748_s28] ss:$0 sm:$0xff]  ;;  %s6576_s28 = sld [smem:[#allocation41_spill]] }
0x2225   : > { %v3818_v35 = vsel %vm3815_vm7, %v3817_v12, %v3813_v13  ;;  %vm3916_vm11 = vmor %vm3914_vm10, %vm3915_vm9 }
0x2226   : > { %v3911_v17 = vsub.f32 1.0, %v3910_v16  ;;  %v3819_v18 = vmul.f32 %v5309_v56, %v3818_v35 }
0x2227   : > { %v3821_v14 = vpop.permute.xlu0 %3820 }
0x2228   : > { %v3912_v6 = vmul.f32 %v5315_v11, %v3911_v17  ;;  %3841 = vmatpush.msra.mxu1 %v3821_v14  ;;  %v5033_v14 = vld [vmem:[%s6561_s12 + $0x20] sm:$0xff] }
0x2229   : > { %5015 = vmatmul.msk.f32.vlgmr.msra.gmra.mxu1 %vm1252_vm1, %v3819_v18 }
0x222a   : > { %v3913_v20 = vadd.f32 %v5315_v11, %v3912_v6  ;;  %3968 = vmatpush.msrb.mxu1 %v5002_v15 }
0x222c   : > { %v3917_v23 = vsel %vm3916_vm11, %v5315_v11, %v3913_v20 }
0x222d   : > { %v3922_v24 = vsel %vm3919_vm12, %v3921_v21, %v3917_v23 }
0x222e   : > { %v3923_v25 = vmul.f32 %v5311_v61, %v3922_v24  ;;  %v5212_v61 = vld [vmem:[%s6559_s4 + $0x1] ss:$0 sm:$0xff] }
0x2230   : > { %5019 = vmatmul.msk.f32.vlgmr.msra.gmra.mxu3 %vm1252_vm1, %v3923_v25 }
0x22a6   : > { %v3843_v27 = vpop.f32.mrf.mxu1 }
0x22a7   : > { %5016 = vmatmul.msk.f32.vlgmr.msrb.gmra.mxu0 %vm1252_vm1, %v3843_v27 }
0x22b3   : > { %v3947_v29 = vpop.f32.mrf.mxu3 }
0x22b4   : > { %5020 = vmatmul.msk.f32.vlgmr.msrb.gmra.mxu1 %vm1252_vm1, %v3947_v29 }
0x2324   : > { %v3866_v30 = vpop.f32.mrf.mxu0 }
0x2325   : > { %v3869_v32 = vadd.f32 %v3866_v30, %v6219_v43  ;;  %v5024_v43 = vld [vmem:[%s6554_s19 + $0x28] sm:$0xff] }
0x2326   : > { %4050 = vmatpush.msra.mxu0 %v5024_v43 }
0x2328   : > { %4051 = vmatpush.msra.mxu0 %v5023_v57 }
0x232a   : > { %4175 = vmatpush.msrb.mxu0 %v5033_v14 }
0x2331   : > { %v3970_v33 = vpop.f32.mrf.mxu1 }
0x2332   : > { %v3973_v22 = vadd.f32 %v3970_v33, %v3869_v32 }
0x2334   : > { %v3974_v36 = vadd.f32 %v3973_v22, %v6163_v31 }
0x2336   : > { %v3979_v37 = vsel %vm1225_vm0, %v3974_v36, 0.0 }
0x2337   : > { %3980 = vadd.xlane.f32.xlu1 %v3979_v37 }
0x23aa   : > { %v3981_v38 = vpop.xlane.xlu1 %3980 }
0x23ab   : > { %v3982_v10 = vmul.f32 %v3981_v38, %v5824_v3 }
0x23ad   : > { %v3983_v42 = vsub.f32 %v3974_v36, %v3982_v10 }
0x23af   : > { %v3984_v44 = vmul.f32 %v3983_v42, %v3983_v42 }
0x23b1   : > { %v3985_v45 = vsel %vm1225_vm0, %v3984_v44, 0.0 }
0x23b2   : > { %3986 = vadd.xlane.f32.xlu1 %v3985_v45 }
0x2425   : > { %v3987_v31 = vpop.xlane.xlu1 %3986 }
0x2426   : > { %v3988_v40 = vmul.f32 %v3987_v31, %v5824_v3 }
0x2428   : > { %v3989_v28 = vadd.f32 1e-05, %v3988_v40 }
0x242a   : > { %5316 = vrsqrt.f32 %v3989_v28  ;;  %vm3996_vm14 = vweird.f32 %v3989_v28 }
0x2430   : > { %v5317_v48 = vpop.eup %5316 }
0x2431   : > { %v3991_v49 = vmul.f32 %v5317_v48, %v3989_v28  ;;  %vm3997_vm13 = vweird.f32 %v5317_v48 }
0x2432   : > { %vm3998_vm15 = vmor %vm3996_vm14, %vm3997_vm13 }
0x2433   : > { %v3992_v50 = vmul.f32 %v5317_v48, %v3991_v49 }
0x2435   : > { %v3993_v51 = vmul.f32 0.5, %v3992_v50 }
0x2437   : > { %v3994_v52 = vsub.f32 1.5, %v3993_v51 }
0x2439   : > { %v3995_v53 = vmul.f32 %v5317_v48, %v3994_v52 }
0x243b   : > { %v3999_v41 = vsel %vm3998_vm15, %v5317_v48, %v3995_v53 }
0x243c   : > { %v4000_v56 = vmul.f32 %v3999_v41, %v3983_v42 }
0x243e   : > { %v4004_v59 = vmul.f32 %v5210_v55, %v4000_v56 }
0x2440   : > { %v6257_v60 = vadd.f32 %v5211_v58, %v4004_v59 }
0x2442   : > { %5038 = vmatmul.msk.f32.vlgmr.msra.gmra.mxu0 %vm1225_vm0, %v6257_v60 }
0x24bf   : > { %v4053_v62 = vpop.f32.mrf.mxu0 }
0x24c0   : > { %v4054_v63 = vadd.f32 %v5212_v61, %v4053_v62 }
0x24c2   : > { %4184 = vrot.lane.b32.xlu1 %v4054_v63, %s6548_s10  ;;  %5041 = vmatmul.msk.f32.vlgmr.msrb.gmra.mxu3 %vm1252_vm1, %v4054_v63  ;;  %s6575_s10 = sld [smem:[#allocation37_spill]] }
0x2534   : > { %v4185_v1 = vpop.permute.xlu1 %4184 }
0x2535   : > { %5045 = vmatmul.msk.f32.vlgmr.msra.gmra.mxu2 %vm1252_vm1, %v4185_v1 }
0x2545   : > { %v4102_v19 = vpop.f32.mrf.mxu3 }
0x2546   : > { %v4105_v2 = vmul.f32 0.35355338, %v4102_v19 }
0x2548   : > { %v4106_v4 = vadd.f32 %v6082_v39, %v4105_v2 }
0x254a   : > { %v4107_v34 = vsel %vm1252_vm1, %v4106_v4, -inf }
0x254b   : > { %4108 = vmax.xlane.f32.xlu0 %v4107_v34 }
0x25b8   : > { %v4209_v5 = vpop.f32.mrf.mxu2 }
0x25b9   : > { %v4212_v8 = vmul.f32 0.35355338, %v4209_v5 }
0x25bb   : > { %v4213_v11 = vadd.f32 %v6268_v9, %v4212_v8 }
0x25bd   : > { %v4214_v12 = vsel %vm1252_vm1, %v4213_v11, -inf }
0x25be   : > { %v4109_v13 = vpop.xlane.xlu0 %4108  ;;  %4215 = vmax.xlane.f32.xlu2 %v4214_v12 }
0x25bf   : > { %v4110_v16 = vsub.f32 %v4106_v4, %v4109_v13 }
0x25c1   : > { %v4111_v35 = vmul.f32 1.442695, %v4110_v16 }
0x25c3   : > { %5318 = vpow2.f32 %v4111_v35 }
0x25c9   : > { %v5319_v17 = vpop.eup %5318 }
0x25ca   : > { %v4113_v39 = vsel %vm1252_vm1, %v5319_v17, 0.0 }
0x25cb   : > { %4114 = vadd.xlane.f32.xlu1 %v4113_v39 }
0x25d6   : > { %4131 = vrot.lane.b32.xlu2 %v6228_v54, %s6547_s26 }
0x25de   : > { %4396 = vrot.lane.b32.xlu2 %v6228_v54, %s6541_s13 }
0x25e4   : > { %4291 = vrot.lane.b32.xlu1 %v6228_v54, %s6539_s5 }
0x2631   : > { %v4216_v18 = vpop.xlane.xlu2 %4215 }
0x2632   : > { %v4217_v7 = vsub.f32 %v4213_v11, %v4216_v18 }
0x2634   : > { %v4218_v6 = vmul.f32 1.442695, %v4217_v7 }
0x2636   : > { %5320 = vpow2.f32 %v4218_v6 }
0x2639   : > { %v4132_v20 = vpop.permute.xlu2 %4131 }
0x263a   : > { %4152 = vmatpush.msra.mxu1 %v4132_v20 }
0x263c   : > { %4282 = vmatpush.msrb.mxu1 %v5034_v0  ;;  %v5321_v21 = vpop.eup %5320 }
0x263d   : > { %v4220_v23 = vsel %vm1252_vm1, %v5321_v21, 0.0 }
0x263e   : > { %v4115_v24 = vpop.xlane.xlu1 %4114  ;;  %4221 = vadd.xlane.f32.xlu0 %v4220_v23 }
0x263f   : > { %5322 = vrcp.f32 %v4115_v24  ;;  %v4127_v27 = vand.u32 2147483648, %v4115_v24  ;;  %v4125_v30 = vand.u32 2147483647, %v4115_v24  ;;  %vm4121_vm3 = vweird.f32 %v4115_v24 }
0x2641   : > { %v4128_v33 = vor.u32 1.1754944e-38, %v4127_v27  ;;  %vm4126_vm5 = vcmp.eq.f32.partialorder %v4125_v30, 8.507059e+37  ;;  %v4397_v38 = vpop.permute.xlu2 %4396 }
0x2645   : > { %v5323_v25 = vpop.eup %5322 }
0x2646   : > { %v4117_v26 = vmul.f32 %v5323_v25, %v4115_v24  ;;  %vm4122_vm2 = vweird.f32 %v5323_v25 }
0x2647   : > { %vm4123_vm4 = vmor %vm4121_vm3, %vm4122_vm2 }
0x2648   : > { %v4118_v15 = vsub.f32 1.0, %v4117_v26 }
0x264a   : > { %v4119_v29 = vmul.f32 %v5323_v25, %v4118_v15 }
0x264c   : > { %v4120_v32 = vadd.f32 %v5323_v25, %v4119_v29 }
0x264e   : > { %v4124_v22 = vsel %vm4123_vm4, %v5323_v25, %v4120_v32 }
0x264f   : > { %v4129_v36 = vsel %vm4126_vm5, %v4128_v33, %v4124_v22 }
0x2650   : > { %v6282_v37 = vmul.f32 %v5319_v17, %v4129_v36 }
0x2652   : > { %4238 = vrot.lane.b32.xlu0 %v6228_v54, %s6546_s21  ;;  %5042 = vmatmul.msk.f32.vlgmr.msra.gmra.mxu1 %vm1252_vm1, %v6282_v37  ;;  %s6579_s21 = sld [smem:[#allocation45_spill]] }
0x2653   : > { %5052 = vmatpush.xpose.msk.msra.mxu1 %vm1252_vm1, %v4397_v38 }
0x2656   : > { %v4292_v10 = vpop.permute.xlu1 %4291 }
0x2657   : > { %5048 = vmatpush.xpose.msk.msra.mxu0 %vm1252_vm1, %v4292_v10 }
0x2658   : > { %s4714_s22 = scalar_lea.hbm %s6579_s21, %s5079_s29 }
0x265a   : > { %4289 = vrot.lane.b32.xlu0 %v4054_v63, %s6539_s5  ;;  %s6572_s5 = sld [smem:[#allocation35_spill]] }
0x2660   : > { %v5213_v62 = vld [vmem:[%s6572_s5 + $0x1] ss:$0 sm:$0xff] }
0x2662   : > { %4394 = vrot.lane.b32.xlu0 %v4054_v63, %s6541_s13  ;;  %s6315_s13 = sand.u32 1, %s5431_s16  }
0x2663   : > { %s6470_s14 = sshll.u32 %s6315_s13, 3 }
0x2664   : > { %s6323_s15 = scalar_lea.vmem [#allocation4], %s6470_s14 }
0x2665   : > { %s4716_s5 = sshll.u32 %s6323_s15, 4  ;;  %s4717_s5 = int_to_ptr.vmem [resolvable:$true] %s4716_s5 }
0x26b1   : > { %v4222_v42 = vpop.xlane.xlu0 %4221 }
0x26b2   : > { %5324 = vrcp.f32 %v4222_v42  ;;  %v4234_v47 = vand.u32 2147483648, %v4222_v42  ;;  %v4232_v57 = vand.u32 2147483647, %v4222_v42  ;;  %vm4228_vm7 = vweird.f32 %v4222_v42 }
0x26b4   : > { %v4235_v40 = vor.u32 1.1754944e-38, %v4234_v47  ;;  %vm4233_vm10 = vcmp.eq.f32.partialorder %v4232_v57, 8.507059e+37 }
0x26b8   : > { %v5325_v44 = vpop.eup %5324 }
0x26b9   : > { %v4224_v45 = vmul.f32 %v5325_v44, %v4222_v42  ;;  %vm4229_vm6 = vweird.f32 %v5325_v44 }
0x26ba   : > { %vm4230_vm9 = vmor %vm4228_vm7, %vm4229_vm6 }
0x26bb   : > { %v4225_v46 = vsub.f32 1.0, %v4224_v45 }
0x26bd   : > { %v4226_v43 = vmul.f32 %v5325_v44, %v4225_v46 }
0x26bf   : > { %v4227_v31 = vadd.f32 %v5325_v44, %v4226_v43 }
0x26c1   : > { %v4231_v28 = vsel %vm4230_vm9, %v5325_v44, %v4227_v31 }
0x26c2   : > { %v4236_v48 = vsel %vm4233_vm10, %v4235_v40, %v4231_v28  ;;  %v5035_v28 = vld [vmem:[%s6561_s12 + $0x30] sm:$0xff] }
0x26c3   : > { %v6292_v49 = vmul.f32 %v5321_v21, %v4236_v48  ;;  %v5036_v48 = vld [vmem:[%s6561_s12 + $0x38] sm:$0xff] }
0x26c4   : > { %v4239_v50 = vpop.permute.xlu0 %4238 }
0x26c5   : > { %4259 = vmatpush.msra.mxu3 %v4239_v50  ;;  %v4288_v46 = vadd.f32 %v6292_v49, %v6282_v37 }
0x26c6   : > { %5046 = vmatmul.msk.f32.vlgmr.msra.gmra.mxu3 %vm1252_vm1, %v6292_v49 }
0x26c7   : > { %4387 = vmatpush.msrb.mxu3 %v5035_v28 }
0x26cc   : > { %v4290_v52 = vpop.permute.xlu0 %4289 }
0x26cf   : > { %v4154_v51 = vpop.f32.mrf.mxu1 }
0x26d0   : > { %5043 = vmatmul.msk.f32.vlgmr.msrb.gmra.mxu0 %vm1252_vm1, %v4154_v51 }
0x26d4   : > { %v4395_v41 = vpop.permute.xlu0 %4394 }
0x26d8   : > { %5049 = vmatmul.msk.f32.vlgmr.msra.gmra.mxu0 %vm1252_vm1, %v4290_v52 }
0x2749   : > { %v4261_v53 = vpop.f32.mrf.mxu3 }
0x274a   : > { %5047 = vmatmul.msk.f32.vlgmr.msrb.gmra.mxu1 %vm1252_vm1, %v4261_v53 }
0x274d   : > { %v4177_v55 = vpop.f32.mrf.mxu0 }
0x274e   : > { %v4183_v63 = vadd.f32 %v5213_v62, %v4177_v55 }
0x2752   : > { %5053 = vmatmul.msk.f32.vlgmr.msra.gmra.mxu1 %vm1252_vm1, %v4395_v41 }
0x2755   : > { %v4314_v56 = vpop.f32.mrf.mxu0 }
0x2756   : > { %v4317_v58 = vmul.f32 0.35355338, %v4314_v56 }
0x2758   : > { %v4318_v59 = vadd.f32 %v6268_v9, %v4317_v58 }
0x275a   : > { %v4319_v61 = vsel %vm1252_vm1, %v4318_v59, -inf }
0x275b   : > { %4320 = vmax.xlane.f32.xlu2 %v4319_v61 }
0x27c7   : > { %v4284_v1 = vpop.f32.mrf.mxu1 }
0x27c8   : > { %v6303_v19 = vadd.f32 %v4284_v1, %v4183_v63 }
0x27ce   : > { %v4321_v2 = vpop.xlane.xlu2 %4320 }
0x27cf   : > { %v4322_v4 = vsub.f32 %v4318_v59, %v4321_v2  ;;  %v4419_v34 = vpop.f32.mrf.mxu1  ;;  %v5070_v2 = vld [vmem:[%s6565_s0 + $0x78] sm:$0xff] }
0x27d0   : > { %v4422_v5 = vmul.f32 0.35355338, %v4419_v34  ;;  %4594 = vmatpush.msrb.mxu1 %v5070_v2  ;;  %v5068_v34 = vld [vmem:[%s6565_s0 + $0x68] sm:$0xff] }
0x27d1   : > { %v4323_v8 = vmul.f32 1.442695, %v4322_v4  ;;  %v5069_v4 = vld [vmem:[%s6565_s0 + $0x70] sm:$0xff] }
0x27d2   : > { %v4423_v11 = vadd.f32 %v6268_v9, %v4422_v5  ;;  %4595 = vmatpush.msrb.mxu1 %v5069_v4 }
0x27d3   : > { %5326 = vpow2.f32 %v4323_v8 }
0x27d4   : > { %v4424_v12 = vsel %vm1252_vm1, %v4423_v11, -inf  ;;  %4596 = vmatpush.msrb.mxu1 %v5068_v34 }
0x27d5   : > { %4425 = vmax.xlane.f32.xlu0 %v4424_v12 }
0x27d9   : > { %v5327_v13 = vpop.eup %5326 }
0x27da   : > { %v4325_v16 = vsel %vm1252_vm1, %v5327_v13, 0.0 }
0x27db   : > { %4326 = vadd.xlane.f32.xlu1 %v4325_v16 }
0x27e9   : > { %4448 = vrot.lane.b32.xlu0 %v6228_v54, %s6537_s11  ;;  %s6577_s11 = sld [smem:[#allocation43_spill]] }
0x2848   : > { %v4426_v35 = vpop.xlane.xlu0 %4425 }
0x2849   : > { %v4427_v17 = vsub.f32 %v4423_v11, %v4426_v35  ;;  %v5067_v11 = vld [vmem:[%s6565_s0 + $0x60] sm:$0xff] }
0x284a   : > { %4597 = vmatpush.msrb.mxu1 %v5067_v11 }
0x284b   : > { %v4428_v39 = vmul.f32 1.442695, %v4427_v17 }
0x284d   : > { %5328 = vpow2.f32 %v4428_v39 }
0x284e   : > { %v4327_v14 = vpop.xlane.xlu1 %4326 }
0x284f   : > { %5330 = vrcp.f32 %v4327_v14  ;;  %v4339_v24 = vand.u32 2147483648, %v4327_v14  ;;  %vm4333_vm12 = vweird.f32 %v4327_v14  ;;  %v4337_v25 = vand.u32 2147483647, %v4327_v14 }
0x2851   : > { %v4340_v27 = vor.u32 1.1754944e-38, %v4339_v24  ;;  %vm4338_vm14 = vcmp.eq.f32.partialorder %v4337_v25, 8.507059e+37  ;;  %v5064_v24 = vld [vmem:[%s6565_s0 + $0x48] sm:$0xff]  ;;  %v5063_v25 = vld [vmem:[%s6565_s0 + $0x40] sm:$0xff] }
0x2853   : > { %v5329_v18 = vpop.eup %5328 }
0x2854   : > { %v4430_v7 = vsel %vm1252_vm1, %v5329_v18, 0.0 }
0x2855   : > { %4431 = vadd.xlane.f32.xlu2 %v4430_v7  ;;  %v5331_v6 = vpop.eup %5330 }
0x2856   : > { %v4329_v0 = vmul.f32 %v5331_v6, %v4327_v14  ;;  %vm4334_vm11 = vweird.f32 %v5331_v6 }
0x2857   : > { %vm4335_vm13 = vmor %vm4333_vm12, %vm4334_vm11 }
0x2858   : > { %v4330_v20 = vsub.f32 1.0, %v4329_v0  ;;  %v5215_v0 = vld [vmem:[%s6575_s10 + $0x1] ss:$0 sm:$0xff]  ;;  %s4690_s10 = scalar_lea.sflag [#allocation5], %s6315_s13 }
0x285a   : > { %v4331_v21 = vmul.f32 %v5331_v6, %v4330_v20 }
0x285b   : > { %v4449_v9 = vpop.permute.xlu0 %4448 }
0x285c   : > { %4469 = vmatpush.msrb.mxu0 %v4449_v9  ;;  %v4332_v23 = vadd.f32 %v5331_v6, %v4331_v21  ;;  %v5214_v9 = vld [vmem:[%s6566_s27 + $0x1] ss:$0 sm:$0xff] }
0x285e   : > { %v4336_v15 = vsel %vm4335_vm13, %v5331_v6, %v4332_v23  ;;  %v5065_v23 = vld [vmem:[%s6565_s0 + $0x50] sm:$0xff] }
0x285f   : > { %v4341_v29 = vsel %vm4338_vm14, %v4340_v27, %v4336_v15 }
0x2860   : > { %v4342_v33 = vmul.f32 %v5327_v13, %v4341_v29  ;;  %v5066_v13 = vld [vmem:[%s6565_s0 + $0x58] sm:$0xff]  ;;  %s5365_s0 = scalar_lea.hbm %s6579_s21, 16 }
0x2861   : > { %4598 = vmatpush.msrb.mxu1 %v5066_v13 }
0x2862   : > { %v4393_v57 = vadd.f32 %v4342_v33, %v4288_v46  ;;  %v4643_v46 = vld [vmem:[%s6577_s11 + $0x10] sm:$0xff] }
0x2863   : > { %4599 = vmatpush.msrb.mxu1 %v5065_v23 }
0x2865   : > { %4600 = vmatpush.msrb.mxu1 %v5064_v24 }
0x2867   : > { %4601 = vmatpush.msrb.mxu1 %v5063_v25 }
0x286d   : > { %4343 = vrot.lane.b32.xlu2 %v6228_v54, %s6538_s18  ;;  %s6573_s18 = sld [smem:[#allocation38_spill]] }
0x2873   : > { %s6574_s2 = smov %s6573_s18  ;;  %v5061_v63 = vld [vmem:[%s6573_s18 + $0x38] sm:$0xff]  ;;  %s4718_s18 = sshll.u32 %s4714_s22, 4  ;;  %s4719_s18 = int_to_ptr.hbm [resolvable:$true] %s4718_s18 }
0x2874   : > { %4571 = vmatpush.msra.mxu3 %v5061_v63  ;;  %v5060_v1 = vld [vmem:[%s6574_s2 + $0x30] sm:$0xff] }
0x2876   : > { %4572 = vmatpush.msra.mxu3 %v5060_v1 }
0x28c8   : > { %v4432_v26 = vpop.xlane.xlu2 %4431 }
0x28c9   : > { %5332 = vrcp.f32 %v4432_v26  ;;  %v4444_v36 = vand.u32 2147483648, %v4432_v26  ;;  %v4442_v10 = vand.u32 2147483647, %v4432_v26  ;;  %vm4438_vm2 = vweird.f32 %v4432_v26 }
0x28cb   : > { %v4445_v44 = vor.u32 1.1754944e-38, %v4444_v36  ;;  %vm4443_vm4 = vcmp.eq.f32.partialorder %v4442_v10, 8.507059e+37 }
0x28cf   : > { %v5333_v54 = vpop.eup %5332 }
0x28d0   : > { %v4434_v30 = vmul.f32 %v5333_v54, %v4432_v26  ;;  %v4344_v32 = vpop.permute.xlu2 %4343  ;;  %vm4439_vm15 = vweird.f32 %v5333_v54  ;;  %v5216_v26 = vld [vmem:[%s6568_s17 + $0x1] ss:$0 sm:$0xff] }
0x28d1   : > { %4364 = vmatpush.msrb.mxu2 %v4344_v32  ;;  %vm4440_vm3 = vmor %vm4438_vm2, %vm4439_vm15 }
0x28d2   : > { %v4435_v22 = vsub.f32 1.0, %v4434_v30  ;;  %5050 = vmatmul.msk.f32.vlgmr.msrb.gmra.mxu2 %vm1252_vm1, %v4342_v33 }
0x28d3   : > { %4492 = vmatpush.msra.mxu2 %v5036_v48 }
0x28d4   : > { %v4436_v38 = vmul.f32 %v5333_v54, %v4435_v22 }
0x28d6   : > { %v4437_v42 = vadd.f32 %v5333_v54, %v4436_v38 }
0x28d8   : > { %v4441_v45 = vsel %vm4440_vm3, %v5333_v54, %v4437_v42  ;;  %v5217_v54 = vld [vmem:[%s6576_s28 + $0x1] ss:$0 sm:$0xff]  ;;  %s5359_s28 = sshra.s32 %s4719_s18, 4  ;;  %s5360_s28 = int_to_ptr.hbm [resolvable:$true] %s5359_s28 }
0x28d9   : > { %v4446_v47 = vsel %vm4443_vm4, %v4445_v44, %v4441_v45  ;;  %v4644_v45 = vld [vmem:[%s6577_s11 + $0x18] sm:$0xff]  ;;  %s5361_s14 = scalar_lea.hbm %s5360_s28, 8  ;;  %p5366_p0 = scmp.lt.s32.totalorder %s5360_s28, %s6579_s21 }
0x28da   : > { %v4447_v43 = vmul.f32 %v5329_v18, %v4446_v47  ;;  %4660 = vmatpush.msra.mxu0 %v4644_v45  ;;  %v4642_v47 = vld [vmem:[%s6577_s11 + $0x8] sm:$0xff]  ;;  %p5362_p11 = scmp.ne.s32.totalorder %s5360_s28, %s5361_s14  ;;  %p5367_p1 = scmp.lt.s32.totalorder %s5365_s0, %s5361_s14 }
0x28dc   : > { %5054 = vmatmul.msk.f32.vlgmr.msrb.gmra.mxu0 %vm1252_vm1, %v4447_v43  ;;  %v4498_v31 = vadd.f32 %v4447_v43, %v4393_v57  ;;  %v4641_v43 = vld [vmem:[%s6577_s11] sm:$0xff]  ;;  %p5363_p12 = pnand %p5362_p11, %p5729_p5  ;;  %p5368_p2 = por %p5367_p1, %p5366_p0 }
0x28dd   : > { %4661 = vmatpush.msra.mxu0 %v4643_v46 }
0x28de   : > { %v4499_v40 = vmul.f32 0.25, %v4498_v31  ;;  %p5364_p13 = pneg %p5363_p12 }
0x28df   : > { %4662 = vmatpush.msra.mxu0 %v4642_v47 }
0x28e0   : > { %4683 = vst.msk [vmem:[%s6323_s15] sm:$0xff] %vm1252_vm1, %v4499_v40  ;;  %p5369_p3 = pnand %p5368_p2, %p5364_p13 }
0x28e1   : > { %4663 = vmatpush.msra.mxu0 %v4641_v43 }
0x2955   : > { %v4366_v50 = vpop.f32.mrf.mxu2 }
0x2956   : > { %5051 = vmatmul.msk.f32.vlgmr.msrb.gmra.mxu3 %vm1252_vm1, %v4366_v50 }
0x2959   : > { %v4471_v37 = vpop.f32.mrf.mxu0 }
0x295a   : > { %5055 = vmatmul.msk.f32.vlgmr.msra.gmra.mxu2 %vm1252_vm1, %v4471_v37 }
0x29d9   : > { %v4389_v49 = vpop.f32.mrf.mxu3 }
0x29da   : > { %v4392_v51 = vadd.f32 %v4389_v49, %v6303_v19  ;;  %v5058_v19 = vld [vmem:[%s6574_s2 + $0x20] sm:$0xff] }
0x29dd   : > { %v4494_v52 = vpop.f32.mrf.mxu2 }
0x29de   : > { %v4497_v53 = vadd.f32 %v4494_v52, %v4392_v51  ;;  %v5218_v52 = vld [vmem:[%s6571_s20 + $0x1] ss:$0 sm:$0xff] }
0x29e0   : > { %v4500_v55 = vadd.f32 %v4497_v53, %v6257_v60  ;;  %v5059_v60 = vld [vmem:[%s6574_s2 + $0x28] sm:$0xff] }
0x29e1   : > { %4573 = vmatpush.msra.mxu3 %v5059_v60 }
0x29e2   : > { %v4505_v41 = vsel %vm1225_vm0, %v4500_v55, 0.0 }
0x29e3   : > { %4506 = vadd.xlane.f32.xlu1 %v4505_v41  ;;  %4574 = vmatpush.msra.mxu3 %v5058_v19  ;;  %v5219_v41 = vld [vmem:[%s5674_s9 + $0x1] ss:$0 sm:$0xff] }
0x2a56   : > { %v4507_v56 = vpop.xlane.xlu1 %4506 }
0x2a57   : > { %v4508_v58 = vmul.f32 %v4507_v56, %v5824_v3 }
0x2a59   : > { %v4509_v59 = vsub.f32 %v4500_v55, %v4508_v58 }
0x2a5b   : > { %v4510_v61 = vmul.f32 %v4509_v59, %v4509_v59 }
0x2a5d   : > { %v4511_v62 = vsel %vm1225_vm0, %v4510_v61, 0.0 }
0x2a5e   : > { %4512 = vadd.xlane.f32.xlu1 %v4511_v62 }
0x2ad1   : > { %v4513_v5 = vpop.xlane.xlu1 %4512 }
0x2ad2   : > { %v4514_v8 = vmul.f32 %v4513_v5, %v5824_v3 }
0x2ad4   : > { %v4515_v12 = vadd.f32 1e-05, %v4514_v8 }
0x2ad6   : > { %5334 = vrsqrt.f32 %v4515_v12  ;;  %vm4522_vm5 = vweird.f32 %v4515_v12 }
0x2adc   : > { %v5335_v16 = vpop.eup %5334 }
0x2add   : > { %v4517_v35 = vmul.f32 %v5335_v16, %v4515_v12  ;;  %vm4523_vm1 = vweird.f32 %v5335_v16 }
0x2ade   : > { %vm4524_vm6 = vmor %vm4522_vm5, %vm4523_vm1 }
0x2adf   : > { %v4518_v17 = vmul.f32 %v5335_v16, %v4517_v35 }
0x2ae1   : > { %v4519_v39 = vmul.f32 0.5, %v4518_v17 }
0x2ae3   : > { %v4520_v18 = vsub.f32 1.5, %v4519_v39 }
0x2ae5   : > { %v4521_v7 = vmul.f32 %v5335_v16, %v4520_v18 }
0x2ae7   : > { %v4525_v14 = vsel %vm4524_vm6, %v5335_v16, %v4521_v7 }
0x2ae8   : > { %v4526_v6 = vmul.f32 %v4525_v14, %v4509_v59 }
0x2aea   : > { %v4530_v20 = vmul.f32 %v5214_v9, %v4526_v6 }
0x2aec   : > { %v4534_v21 = vadd.f32 %v5215_v0, %v4530_v20 }
0x2aee   : > { %5072 = vmatmul.msk.f32.vlgmr.msra.gmra.mxu3 %vm1225_vm0, %v4534_v21 }
0x2b71   : > { %v4576_v15 = vpop.f32.mrf.mxu3 }
0x2b72   : > { %v4577_v27 = vadd.f32 %v5216_v26, %v4576_v15 }
0x2b74   : > { %v4579_v29 = vmax.f32 %v4577_v27, 0.0 }
0x2b76   : > { %5073 = vmatmul.msk.f32.vlgmr.msrb.gmra.mxu1 %vm1755_vm8, %v4579_v29 }
0x2bf3   : > { %v4603_v30 = vpop.f32.mrf.mxu1 }
0x2bf4   : > { %v4604_v32 = vadd.f32 %v5217_v54, %v4603_v30 }
0x2bf6   : > { %v4606_v33 = vadd.f32 %v4604_v32, %v4534_v21 }
0x2bf8   : > { %v4611_v22 = vsel %vm1225_vm0, %v4606_v33, 0.0 }
0x2bf9   : > { %4612 = vadd.xlane.f32.xlu0 %v4611_v22 }
0x2c6c   : > { %v4613_v36 = vpop.xlane.xlu0 %4612 }
0x2c6d   : > { %v4614_v38 = vmul.f32 %v4613_v36, %v5824_v3 }
0x2c6f   : > { %v4615_v10 = vsub.f32 %v4606_v33, %v4614_v38 }
0x2c71   : > { %v4616_v42 = vmul.f32 %v4615_v10, %v4615_v10 }
0x2c73   : > { %v4617_v44 = vsel %vm1225_vm0, %v4616_v42, 0.0 }
0x2c74   : > { %4618 = vadd.xlane.f32.xlu1 %v4617_v44 }
0x2ce7   : > { %v4619_v57 = vpop.xlane.xlu1 %4618 }
0x2ce8   : > { %v4620_v31 = vmul.f32 %v4619_v57, %v5824_v3  ;;  %v4668_v3 = vlaneseq }
0x2cea   : > { %v4621_v40 = vadd.f32 1e-05, %v4620_v31  ;;  %v4669_v59 = vand.u32 127, %v4668_v3 }
0x2cec   : > { %5336 = vrsqrt.f32 %v4621_v40  ;;  %vm4628_vm7 = vweird.f32 %v4621_v40  ;;  %vm4670_vm10 = vcmp.lt.s32.totalorder %v4669_v59, 16 }
0x2cf2   : > { %v5337_v28 = vpop.eup %5336 }
0x2cf3   : > { %v4623_v48 = vmul.f32 %v5337_v28, %v4621_v40  ;;  %vm4629_vm8 = vweird.f32 %v5337_v28 }
0x2cf4   : > { %vm4630_vm9 = vmor %vm4628_vm7, %vm4629_vm8 }
0x2cf5   : > { %v4624_v50 = vmul.f32 %v5337_v28, %v4623_v48 }
0x2cf7   : > { %v4625_v37 = vmul.f32 0.5, %v4624_v50 }
0x2cf9   : > { %v4626_v49 = vsub.f32 1.5, %v4625_v37 }
0x2cfb   : > { %v4627_v51 = vmul.f32 %v5337_v28, %v4626_v49 }
0x2cfd   : > { %v4631_v53 = vsel %vm4630_vm9, %v5337_v28, %v4627_v51 }
0x2cfe   : > { %v4632_v55 = vmul.f32 %v4631_v53, %v4615_v10 }
0x2d00   : > { %v4636_v56 = vmul.f32 %v5218_v52, %v4632_v55 }
0x2d02   : > { %v4640_v58 = vadd.f32 %v5219_v41, %v4636_v56 }
0x2d04   : > { %5076 = vmatmul.msk.f32.vlgmr.msra.gmra.mxu0 %vm1225_vm0, %v4640_v58 }
0x2d81   : > { %v4665_v61 = vpop.f32.mrf.mxu0 }
0x2d82   : > { %v4671_v62 = vsel %vm4670_vm10, %v4665_v61, -1e+30 }
0x2d83   : > { %4672 = vmax.xlane.f32.xlu2 %v4671_v62 }
0x2df6   : > { %v4673_v63 = vpop.xlane.xlu2 %4672 }
0x2df7   : > { %v4674_v1 = vsub.f32 %v4671_v62, %v4673_v63 }
0x2df9   : > { %v4675_v60 = vmul.f32 1.442695, %v4674_v1 }
0x2dfb   : > { %5338 = vpow2.f32 %v4675_v60 }
0x2e01   : > { %v5339_v19 = vpop.eup %5338 }
0x2e02   : > { %4677 = vadd.xlane.f32.xlu1 %v5339_v19 }
0x2e03   : > { %5372 = shalt.err (!%p5369_p3)
}
0x2e04   : > { %s6581_s15 = sld [smem:[#allocation44_spill]]  ;;  %s6583_s2 = sshll.u32 %s6315_s13, 3 }
0x2e05   : > { %5084 = dma.vmem_to_hbm [thread:$0]  (%p5729_p5), %s4717_s5, 128, %s4719_s18, %s4690_s10  }
0x2e06   : > { %s1186_s3 = scalar_lea.vmem [#allocation2], %s6583_s2  ;;  %s4685_s14 = scalar_lea.sflag [#allocation3], %s6315_s13 }
0x2e07   : > { %s4702_s28 = sshll.u32 %s1186_s3, 4  ;;  %s4703_s28 = int_to_ptr.vmem [resolvable:$true] %s4702_s28 }
0x2e0a   : > { %s6582_s1 = smov %s6581_s15  ;;  %s4700_s22 = scalar_lea.hbm %s6581_s15, %s5079_s29 }
0x2e0b   : > { %s4704_s0 = sshll.u32 %s4700_s22, 4  ;;  %s5393_s29 = scalar_lea.hbm %s6582_s1, 16  ;;  %s4705_s0 = int_to_ptr.hbm [resolvable:$true] %s4704_s0 }
0x2e0c   : > { %s5387_s4 = sshra.s32 %s4705_s0, 4  ;;  %s5388_s4 = int_to_ptr.hbm [resolvable:$true] %s5387_s4 }
0x2e0d   : > { %s5389_s5 = scalar_lea.hbm %s5388_s4, 8  ;;  %p5394_p9 = scmp.lt.s32.totalorder %s5388_s4, %s6582_s1 }
0x2e0e   : > { %p5390_p4 = scmp.ne.s32.totalorder %s5388_s4, %s5389_s5  ;;  %p5395_p10 = scmp.lt.s32.totalorder %s5393_s29, %s5389_s5 }
0x2e10   : > { %p5391_p7 = pnand %p5390_p4, %p5729_p5  ;;  %p5396_p11 = por %p5395_p10, %p5394_p9 }
0x2e12   : > { %p5392_p8 = pneg %p5391_p7 }
0x2e14   : > { %p5397_p12 = pnand %p5396_p11, %p5392_p8 }
0x2e75   : > { %v4678_v2 = vpop.xlane.xlu1 %4677 }
0x2e76   : > { %5340 = vlog2.f32 %v4678_v2 }
0x2e7c   : > { %v5341_v4 = vpop.eup %5340 }
0x2e7d   : > { %v4680_v34 = vmul.f32 0.6931472, %v5341_v4 }
0x2e7f   : > { %v4681_v5 = vsub.f32 %v4674_v1, %v4680_v34 }
0x2e81   : > { %4682 = vst [vmem:[%s1186_s3] sm:$0xff] %v4681_v5 }
0x2e82   : > { %5400 = shalt.err (!%p5397_p12)
}
0x2e83   : > { %5083 = dma.vmem_to_hbm [thread:$0]  (%p5729_p5), %s4703_s28, 128, %s4705_s0, %s4685_s14  }
0x2e84 PF: > { %s6584_s2 = sld [smem:[#allocation48_spill]] }
0x2e85   : > { %s6585_s3 = sld [smem:[#allocation46_spill]] }
0x2e8a   : > { %p5094_p13 = scmp.ge.s32.totalorder %s6584_s2, 2 }
0x2e8b   : > { %s4730_s18 = sand.u32 1, %s6585_s3  }
0x2e8c   : > { %p5088_p0 = pnand %p5094_p13, %p5733_p6  ;;  %s4731_s10 = scalar_lea.sflag [#allocation3], %s4730_s18 }
0x2e8e   : > { %p5089_p1 = pneg %p5088_p0 }
0x2e90   : > { %5418 = dma.done.wait (%p5089_p1), %s4731_s10, 128  }
0x2e91   : > { %5420 = vsyncadd (%p5089_p1), %s4731_s10, 4294967168  ;;  %s4741_s4 = scalar_lea.sflag [#allocation5], %s4730_s18 }
0x2e92   : > { %5422 = dma.done.wait (%p5089_p1), %s4741_s4, 128  }
0x2e93   : > { %5424 = vsyncadd (%p5089_p1), %s4741_s4, 4294967168  ;;  %s6587_s22 = sld [smem:[#allocation50_spill]]  ;;  %s6590_s15 = smov %s5431_s16 }
0x2e94   : > { %s6588_s5 = sld [smem:[#allocation47_spill]] }
0x2e95   : > { %s6589_s18 = sld [smem:[#allocation51_spill]] }
0x2e99   : > { %p91_p5 = scmp.ge.s32.totalorder %s6587_s22, 4  }
0x2e9a   : > { %s6591_s16 = smov %s6588_s5 }
0x2e9b   :  { %93 = sbr.rel (!%p91_p5) target bundleno = 96 (0x60), region = 299 }
0x2ea0   :  { %4747 = vsyncpa [#allocation3], 1 }
0x2ea1   :  { %4749 = vsyncpa [#allocation3 + $0x1], 1 }
0x2ea2   :  { %4750 = vsyncpa [#allocation5], 1 }
0x2ea3   :  { %4752 = vsyncpa [#allocation5 + $0x1], 1 }

</bundles_post_ra>
